<compile_context>
chip_gen: v7x
topology: tpu7x:2x2x1
jax: 0.10.0
libtpu: 0.0.40
codegen_flags: <defaults>
</compile_context>

<pallas_src>
import functools

import jax
import jax.numpy as jnp
from jax.experimental import pallas as pl
from jax.experimental.pallas import tpu as pltpu

_INT32_MAX = (1 << 31) - 1
# Safe on every generation at these block sizes; raise toward ~100 MiB on
# v5e/v6e (128 MiB physical VMEM) for very large M, keep <= ~48 MiB on v7x.
_VMEM_LIMIT_BYTES = 32 * 1024 * 1024


def _pair_sqdist(a, b_t):
    """Squared distances between rows of `a` (R,3) and columns of `b_t` (3,C).

    Computed on the VPU as sum_c (a[:,c] - b_t[c,:])**2 rather than a K=3 MXU
    matmul (which would run the MXU at ~2% utilization).  The difference form
    is >= 0 by construction, so no clamp is needed before min / 1/(d+eps).
    """
    d = None
    for c in range(3):
        diff = a[:, c:c + 1] - b_t[c:c + 1, :]
        sq = diff * diff
        d = sq if d is None else d + sq
    return d


def _sort_keys(d, n_cols):
    """Monotone int32 sort keys with a per-row-unique column tie-break.

    For d >= 0, the f32 bit pattern viewed as int32 is monotone in d.  The low
    ceil(log2(n_cols)) bits are replaced by the column index, making every
    row's keys pairwise distinct: each min-extraction step then selects exactly
    one element with a single cross-lane reduction (half the XLU work of a
    value-min + tie-break-min scheme).  Tie-breaking differs from torch.topk
    only where torch's own behaviour is unspecified.
    """
    col_bits = max(1, (n_cols - 1).bit_length())
    bits = pltpu.bitcast(d, jnp.int32)                       # d >= 0 -> monotone
    col = jax.lax.broadcasted_iota(jnp.int32, d.shape, 1)
    mask = ~((1 << col_bits) - 1)
    return (bits & mask) | col


def _curvature_kernel(pb_ref, pt_ref, p_ref, out_ref, *, n_cols):
    """curvature(pc2): sum over the 10 nearest neighbours of (nbr - pt) / 9."""
    pb = pb_ref[...].astype(jnp.float32)          # (T, 3)  row block of pc2
    p_t = pt_ref[...].astype(jnp.float32)         # (3, M)  full pc2, transposed
    p = p_ref[...].astype(jnp.float32)            # (M, 3)  full pc2

    d = _pair_sqdist(pb, p_t)                     # (T, M)
    keys = _sort_keys(d, n_cols)
    acc = jnp.zeros(pb.shape, jnp.float32)        # (T, 3)
    for _ in range(10):                           # one XLU reduce per neighbour
        kmin = jnp.min(keys, axis=1, keepdims=True)
        onehot = keys == kmin
        keys = jnp.where(onehot, _INT32_MAX, keys)
        acc = acc + jnp.dot(onehot.astype(jnp.float32), p,
                            preferred_element_type=jnp.float32)
    out_ref[...] = (acc - 10.0 * pb) / 9.0


def _pointpwc_row_kernel(p1b_ref, flowb_ref, p1_ref, flow_ref, p1t_ref, p2t_ref,
                         curv2_ref, parts_ref, colmin_ref,
                         *, k_smooth, n_pts, m_pts):
    f32 = jnp.float32
    p1b = p1b_ref[...].astype(f32)                # (T, 3)  pc1 row block
    flowb = flowb_ref[...].astype(f32)            # (T, 3)  flow row block
    p1wb = p1b + flowb                            # warped row block
    tn = p1b.shape[0]

    # -------- chain A: KNN on pc1 (d_11 row block), smoothness + curvatureWarp
    # Fused k_smooth-NN / 10-NN extraction loop; neighbour flows and warped
    # points are gathered per step, so the (T, N) temporaries die before
    # chain B is built (shorter live ranges -> no spills).
    p1 = p1_ref[...].astype(f32)                  # (N, 3) full pc1
    flow = flow_ref[...].astype(f32)              # (N, 3) full flow
    p1w = p1 + flow                               # (N, 3) full warped pc1
    p1t = p1t_ref[...].astype(f32)                # (3, N)

    d11 = _pair_sqdist(p1b, p1t)                  # (T, N)
    keys = _sort_keys(d11, n_pts)                 # d11 dead after this
    curv_acc = jnp.zeros((tn, 3), f32)
    smooth_acc = jnp.zeros((tn, 1), f32)
    for t in range(max(10, k_smooth)):
        kmin = jnp.min(keys, axis=1, keepdims=True)    # single XLU reduce
        onehot = keys == kmin                          # exactly one 1 per row
        keys = jnp.where(onehot, _INT32_MAX, keys)
        sel = onehot.astype(f32)                       # (T, N)
        if t < 10:        # curvatureWarp: gather warped neighbour
            curv_acc = curv_acc + jnp.dot(sel, p1w, preferred_element_type=f32)
        if t < k_smooth:  # computeSmooth: exact per-neighbour flow-diff norm
            dfl = jnp.dot(sel, flow, preferred_element_type=f32) - flowb
            smooth_acc = smooth_acc + jnp.sqrt(
                jnp.sum(dfl * dfl, axis=1, keepdims=True))
    curv1w = (curv_acc - 10.0 * p1wb) / 9.0            # (T, 3)
    # torch's computeSmooth divides by a hard-coded 8.0 (independent of k).
    smooth_part = jnp.sum(smooth_acc) / 8.0

    # -------- chain B: warped pc1 vs pc2 (d_w2 row block)
    p2t = p2t_ref[...].astype(f32)                # (3, M)
    dw2 = _pair_sqdist(p1wb, p2t)                 # (T, M), >= 0 by construction

    # computeChamfer
    chamfer1_part = jnp.sum(jnp.min(dw2, axis=1, keepdims=True))
    colmin = jnp.min(dw2, axis=0, keepdims=True)  # (1, M) per-block column mins

    # interpolateCurvature: 5-NN inverse-distance interpolation of curv(pc2)
    keysw = _sort_keys(dw2, m_pts)
    m5 = jnp.zeros(dw2.shape, f32)
    for _ in range(5):
        kmin = jnp.min(keysw, axis=1, keepdims=True)
        onehot = keysw == kmin
        keysw = jnp.where(onehot, _INT32_MAX, keysw)
        m5 = m5 + onehot.astype(f32)
    invd = m5 / (dw2 + 1e-8)
    weight = invd / jnp.sum(invd, axis=1, keepdims=True)
    curv2 = curv2_ref[...].astype(f32)            # (M, 3)
    inter_curv2 = jnp.dot(weight, curv2, preferred_element_type=f32)  # (T, 3)
    dcv = inter_curv2 - curv1w
    curv_part = jnp.sum(dcv * dcv)

    # -------- lane-dense per-block outputs (reduced in JAX)
    row = jax.lax.broadcasted_iota(jnp.int32, (8, 128), 0)
    lane = jax.lax.broadcasted_iota(jnp.int32, (8, 128), 1)
    zeros = jnp.zeros((8, 128), f32)
    parts = jnp.where((row == 0) & (lane == 0), chamfer1_part, zeros)
    parts = parts + jnp.where((row == 0) & (lane == 1), smooth_part, zeros)
    parts = parts + jnp.where((row == 0) & (lane == 2), curv_part, zeros)
    parts_ref[...] = parts
    colmin_ref[...] = jnp.zeros((8, m_pts), f32) + colmin


def _run_scale(p1, p2, flow, k_smooth):
    """One scale of multiScaleChamferSmoothCurvature -> (chamfer, smooth, curv)."""
    p1 = p1.astype(jnp.float32)
    p2 = p2.astype(jnp.float32)
    flow = flow.astype(jnp.float32)
    n, _ = p1.shape
    m, _ = p2.shape
    tn = min(128, n)          # row-block sizes: at (128, M) f32 the per-block
    tm = min(128, m)          # working set stays well inside VMEM on v5e-v7x
    if n % tn or m % tm:
        # TODO(synk): pad N/M to a multiple of the row-block size (with +inf
        # distance rows) to support arbitrary point counts.
        raise ValueError("point counts must be multiples of the row-block size")

    p1_t = p1.T               # (3, N) column layout for the VPU sqdist
    p2_t = p2.T               # (3, M)

    cparams = pltpu.CompilerParams(
        dimension_semantics=("parallel",),        # row blocks shard across the
        vmem_limit_bytes=_VMEM_LIMIT_BYTES)       # two TensorCores on v7x

    # 1) curvature of pc2 (independent of pc1 / flow), tiled over pc2 rows.
    curv2 = pl.pallas_call(
        functools.partial(_curvature_kernel, n_cols=m),
        out_shape=jax.ShapeDtypeStruct((m, 3), jnp.float32),
        grid=(m // tm,),
        in_specs=[pl.BlockSpec((tm, 3), lambda i: (i, 0)),
                  pl.BlockSpec((3, m), lambda i: (0, 0)),
                  pl.BlockSpec((m, 3), lambda i: (0, 0))],
        out_specs=pl.BlockSpec((tm, 3), lambda i: (i, 0)),
        compiler_params=cparams,
    )(p2, p2_t, p2)

    # 2) chamfer / smoothness / curvature terms, tiled over pc1 row blocks.
    g = n // tn
    kern = functools.partial(_pointpwc_row_kernel, k_smooth=int(k_smooth),
                             n_pts=n, m_pts=m)
    parts, colmin = pl.pallas_call(
        kern,
        out_shape=(jax.ShapeDtypeStruct((g, 8, 128), jnp.float32),
                   jax.ShapeDtypeStruct((g, 8, m), jnp.float32)),
        grid=(g,),
        in_specs=[pl.BlockSpec((tn, 3), lambda i: (i, 0)),   # pc1 row block
                  pl.BlockSpec((tn, 3), lambda i: (i, 0)),   # flow row block
                  pl.BlockSpec((n, 3), lambda i: (0, 0)),    # full pc1
                  pl.BlockSpec((n, 3), lambda i: (0, 0)),    # full flow
                  pl.BlockSpec((3, n), lambda i: (0, 0)),    # pc1^T
                  pl.BlockSpec((3, m), lambda i: (0, 0)),    # pc2^T
                  pl.BlockSpec((m, 3), lambda i: (0, 0))],   # curvature(pc2)
        out_specs=(pl.BlockSpec((None, 8, 128), lambda i: (i, 0, 0)),
                   pl.BlockSpec((None, 8, m), lambda i: (i, 0, 0))),
        compiler_params=cparams,
    )(p1, flow, p1, flow, p1_t, p2_t, curv2)

    chamfer = jnp.sum(parts[:, 0, 0]) + jnp.sum(jnp.min(colmin, axis=(0, 1)))
    smooth = jnp.sum(parts[:, 0, 1])
    curv = jnp.sum(parts[:, 0, 2])
    return chamfer, smooth, curv


def pointpwc_forward(registration_pred, registration_gt, coords, config):
    """JAX/Pallas equivalent of PointPWC.forward (returns total_loss, shape (1,))."""
    pred_flows = registration_pred                 # list of (N, 3) flows
    pc1 = coords[None]                             # pc1 = coords.unsqueeze(0)
    pc2 = coords + registration_gt                 # broadcasts exactly like torch
    alpha = (0.02, 0.04, 0.08, 0.16)

    chamfer_loss = jnp.zeros((1,), jnp.float32)
    smoothness_loss = jnp.zeros((1,), jnp.float32)
    curvature_loss = jnp.zeros((1,), jnp.float32)
    for i in range(len(pred_flows)):
        # NOTE: pc1[i] in the torch code is only valid for i == 0 (pc1 has batch 1),
        # so the effective multi-scale count here is 1; the loop mirrors the source.
        cur_pc1 = pc1[i]                           # (N, 3)
        cur_pc2 = pc2[i]                           # (M, 3)
        cur_flow = pred_flows[i]                   # (N, 3)
        ch, sm, cv = _run_scale(cur_pc1, cur_pc2, cur_flow, config["smoothness_k"])
        chamfer_loss = chamfer_loss + alpha[i] * ch
        smoothness_loss = smoothness_loss + alpha[i] * sm
        curvature_loss = curvature_loss + alpha[i] * cv

    total_loss = (config["chamfer_w"] * chamfer_loss
                  + config["curvature_w"] * curvature_loss
                  + config["smoothness_w"] * smoothness_loss)
    return total_loss


if __name__ == "__main__":
    key = jax.random.PRNGKey(0)
    N = 128                                            # number of points per scale
    k1, k2, k3 = jax.random.split(key, 3)
    coords = jax.random.normal(k1, (N, 3), jnp.float32)
    registration_gt = 0.1 * jax.random.normal(k2, (1, N, 3), jnp.float32)
    registration_pred = [0.1 * jax.random.normal(k3, (N, 3), jnp.float32)]

    # stand-in for wandb.config (deterministic hyperparameters, no checkpoint)
    config = dict(curvature_w=0.3, smoothness_w=1.0, chamfer_w=1.0, smoothness_k=9)

    total = pointpwc_forward(registration_pred, registration_gt, coords, config)
    total = jax.block_until_ready(total)
    assert total.shape == (1,)
    assert bool(jnp.isfinite(total[0]))
    print("KERNEL_OK")
</pallas_src>

<mosaic_0001>
module attributes {stable_mosaic.version = 11 : i64} {
  func.func @_curvature_kernel(%arg0: i32, %arg1: memref<128x3xf32, #tpu.memory_space<vmem>>, %arg2: memref<3x128xf32, #tpu.memory_space<vmem>>, %arg3: memref<128x3xf32, #tpu.memory_space<vmem>>, %arg4: memref<128x3xf32, #tpu.memory_space<vmem>>) attributes {dimension_semantics = [#tpu.dimension_semantics<parallel>], iteration_bounds = array<i64: 1>, scalar_prefetch = 0 : i64, scratch_operands = 0 : i64, tpu.core_type = #tpu.core_type<tc>, window_params = [{transform_indices = @transform_0, window_bounds = array<i64: 128, 3>}, {pipeline_mode = #tpu.pipeline_mode<synchronous>, transform_indices = @transform_1, window_bounds = array<i64: 3, 128>}, {pipeline_mode = #tpu.pipeline_mode<synchronous>, transform_indices = @transform_2, window_bounds = array<i64: 128, 3>}, {transform_indices = @transform_3, window_bounds = array<i64: 128, 3>}]} {
    %c0 = arith.constant 0 : index
    %c0_0 = arith.constant 0 : index
    %0 = vector.load %arg1[%c0, %c0_0] : memref<128x3xf32, #tpu.memory_space<vmem>>, vector<128x3xf32>
    %c0_1 = arith.constant 0 : index
    %c0_2 = arith.constant 0 : index
    %1 = vector.load %arg2[%c0_1, %c0_2] : memref<3x128xf32, #tpu.memory_space<vmem>>, vector<3x128xf32>
    %c0_3 = arith.constant 0 : index
    %c0_4 = arith.constant 0 : index
    %2 = vector.load %arg3[%c0_3, %c0_4] : memref<128x3xf32, #tpu.memory_space<vmem>>, vector<128x3xf32>
    %3 = vector.extract_strided_slice %0 {offsets = [0, 0], sizes = [128, 1], strides = [1, 1]} : vector<128x3xf32> to vector<128x1xf32>
    %4 = vector.extract_strided_slice %1 {offsets = [0, 0], sizes = [1, 128], strides = [1, 1]} : vector<3x128xf32> to vector<1x128xf32>
    %5 = vector.broadcast %3 : vector<128x1xf32> to vector<128x128xf32>
    %6 = vector.broadcast %4 : vector<1x128xf32> to vector<128x128xf32>
    %7 = arith.subf %5, %6 : vector<128x128xf32>
    %8 = arith.mulf %7, %7 : vector<128x128xf32>
    %9 = vector.extract_strided_slice %0 {offsets = [0, 1], sizes = [128, 1], strides = [1, 1]} : vector<128x3xf32> to vector<128x1xf32>
    %10 = vector.extract_strided_slice %1 {offsets = [1, 0], sizes = [1, 128], strides = [1, 1]} : vector<3x128xf32> to vector<1x128xf32>
    %11 = vector.broadcast %9 : vector<128x1xf32> to vector<128x128xf32>
    %12 = vector.broadcast %10 : vector<1x128xf32> to vector<128x128xf32>
    %13 = arith.subf %11, %12 : vector<128x128xf32>
    %14 = arith.mulf %13, %13 : vector<128x128xf32>
    %15 = arith.addf %8, %14 : vector<128x128xf32>
    %16 = vector.extract_strided_slice %0 {offsets = [0, 2], sizes = [128, 1], strides = [1, 1]} : vector<128x3xf32> to vector<128x1xf32>
    %17 = vector.extract_strided_slice %1 {offsets = [2, 0], sizes = [1, 128], strides = [1, 1]} : vector<3x128xf32> to vector<1x128xf32>
    %18 = vector.broadcast %16 : vector<128x1xf32> to vector<128x128xf32>
    %19 = vector.broadcast %17 : vector<1x128xf32> to vector<128x128xf32>
    %20 = arith.subf %18, %19 : vector<128x128xf32>
    %21 = arith.mulf %20, %20 : vector<128x128xf32>
    %22 = arith.addf %15, %21 : vector<128x128xf32>
    %23 = tpu.bitcast %22 : vector<128x128xf32> -> vector<128x128xi32>
    %24 = tpu.iota {dimensions = array<i32: 1>} : vector<128x128xi32>
    %c-128_i32 = arith.constant -128 : i32
    %25 = vector.broadcast %c-128_i32 : i32 to vector<128x128xi32>
    %26 = arith.andi %23, %25 : vector<128x128xi32>
    %27 = arith.ori %26, %24 : vector<128x128xi32>
    %cst = arith.constant 0.000000e+00 : f32
    %28 = vector.broadcast %cst : f32 to vector<128x3xf32>
    %cst_5 = arith.constant dense<2147483647> : vector<128xi32>
    %29 = vector.multi_reduction <minsi>, %27, %cst_5 [1] : vector<128x128xi32> to vector<128xi32>
    %30 = vector.shape_cast %29 : vector<128xi32> to vector<128x1xi32>
    %31 = vector.broadcast %30 : vector<128x1xi32> to vector<128x128xi32>
    %32 = arith.cmpi eq, %27, %31 : vector<128x128xi32>
    %c2147483647_i32 = arith.constant 2147483647 : i32
    %33 = vector.broadcast %c2147483647_i32 : i32 to vector<128x128xi32>
    %34 = arith.select %32, %33, %27 : vector<128x128xi1>, vector<128x128xi32>
    %35 = arith.extui %32 : vector<128x128xi1> to vector<128x128xi32>
    %36 = arith.sitofp %35 : vector<128x128xi32> to vector<128x128xf32>
    %cst_6 = arith.constant dense<0.000000e+00> : vector<128x3xf32>
    %37 = tpu.matmul %36, %2, %cst_6 {dimension_numbers = #tpu.dot_dimension_numbers<[1], [0], [0], [1], [0, 0, 1, 1], [], []>} : vector<128x128xf32>, vector<128x3xf32>, vector<128x3xf32> -> vector<128x3xf32>
    %38 = arith.addf %28, %37 : vector<128x3xf32>
    %cst_7 = arith.constant dense<2147483647> : vector<128xi32>
    %39 = vector.multi_reduction <minsi>, %34, %cst_7 [1] : vector<128x128xi32> to vector<128xi32>
    %40 = vector.shape_cast %39 : vector<128xi32> to vector<128x1xi32>
    %41 = vector.broadcast %40 : vector<128x1xi32> to vector<128x128xi32>
    %42 = arith.cmpi eq, %34, %41 : vector<128x128xi32>
    %c2147483647_i32_8 = arith.constant 2147483647 : i32
    %43 = vector.broadcast %c2147483647_i32_8 : i32 to vector<128x128xi32>
    %44 = arith.select %42, %43, %34 : vector<128x128xi1>, vector<128x128xi32>
    %45 = arith.extui %42 : vector<128x128xi1> to vector<128x128xi32>
    %46 = arith.sitofp %45 : vector<128x128xi32> to vector<128x128xf32>
    %cst_9 = arith.constant dense<0.000000e+00> : vector<128x3xf32>
    %47 = tpu.matmul %46, %2, %cst_9 {dimension_numbers = #tpu.dot_dimension_numbers<[1], [0], [0], [1], [0, 0, 1, 1], [], []>} : vector<128x128xf32>, vector<128x3xf32>, vector<128x3xf32> -> vector<128x3xf32>
    %48 = arith.addf %38, %47 : vector<128x3xf32>
    %cst_10 = arith.constant dense<2147483647> : vector<128xi32>
    %49 = vector.multi_reduction <minsi>, %44, %cst_10 [1] : vector<128x128xi32> to vector<128xi32>
    %50 = vector.shape_cast %49 : vector<128xi32> to vector<128x1xi32>
    %51 = vector.broadcast %50 : vector<128x1xi32> to vector<128x128xi32>
    %52 = arith.cmpi eq, %44, %51 : vector<128x128xi32>
    %c2147483647_i32_11 = arith.constant 2147483647 : i32
    %53 = vector.broadcast %c2147483647_i32_11 : i32 to vector<128x128xi32>
    %54 = arith.select %52, %53, %44 : vector<128x128xi1>, vector<128x128xi32>
    %55 = arith.extui %52 : vector<128x128xi1> to vector<128x128xi32>
    %56 = arith.sitofp %55 : vector<128x128xi32> to vector<128x128xf32>
    %cst_12 = arith.constant dense<0.000000e+00> : vector<128x3xf32>
    %57 = tpu.matmul %56, %2, %cst_12 {dimension_numbers = #tpu.dot_dimension_numbers<[1], [0], [0], [1], [0, 0, 1, 1], [], []>} : vector<128x128xf32>, vector<128x3xf32>, vector<128x3xf32> -> vector<128x3xf32>
    %58 = arith.addf %48, %57 : vector<128x3xf32>
    %cst_13 = arith.constant dense<2147483647> : vector<128xi32>
    %59 = vector.multi_reduction <minsi>, %54, %cst_13 [1] : vector<128x128xi32> to vector<128xi32>
    %60 = vector.shape_cast %59 : vector<128xi32> to vector<128x1xi32>
    %61 = vector.broadcast %60 : vector<128x1xi32> to vector<128x128xi32>
    %62 = arith.cmpi eq, %54, %61 : vector<128x128xi32>
    %c2147483647_i32_14 = arith.constant 2147483647 : i32
    %63 = vector.broadcast %c2147483647_i32_14 : i32 to vector<128x128xi32>
    %64 = arith.select %62, %63, %54 : vector<128x128xi1>, vector<128x128xi32>
    %65 = arith.extui %62 : vector<128x128xi1> to vector<128x128xi32>
    %66 = arith.sitofp %65 : vector<128x128xi32> to vector<128x128xf32>
    %cst_15 = arith.constant dense<0.000000e+00> : vector<128x3xf32>
    %67 = tpu.matmul %66, %2, %cst_15 {dimension_numbers = #tpu.dot_dimension_numbers<[1], [0], [0], [1], [0, 0, 1, 1], [], []>} : vector<128x128xf32>, vector<128x3xf32>, vector<128x3xf32> -> vector<128x3xf32>
    %68 = arith.addf %58, %67 : vector<128x3xf32>
    %cst_16 = arith.constant dense<2147483647> : vector<128xi32>
    %69 = vector.multi_reduction <minsi>, %64, %cst_16 [1] : vector<128x128xi32> to vector<128xi32>
    %70 = vector.shape_cast %69 : vector<128xi32> to vector<128x1xi32>
    %71 = vector.broadcast %70 : vector<128x1xi32> to vector<128x128xi32>
    %72 = arith.cmpi eq, %64, %71 : vector<128x128xi32>
    %c2147483647_i32_17 = arith.constant 2147483647 : i32
    %73 = vector.broadcast %c2147483647_i32_17 : i32 to vector<128x128xi32>
    %74 = arith.select %72, %73, %64 : vector<128x128xi1>, vector<128x128xi32>
    %75 = arith.extui %72 : vector<128x128xi1> to vector<128x128xi32>
    %76 = arith.sitofp %75 : vector<128x128xi32> to vector<128x128xf32>
    %cst_18 = arith.constant dense<0.000000e+00> : vector<128x3xf32>
    %77 = tpu.matmul %76, %2, %cst_18 {dimension_numbers = #tpu.dot_dimension_numbers<[1], [0], [0], [1], [0, 0, 1, 1], [], []>} : vector<128x128xf32>, vector<128x3xf32>, vector<128x3xf32> -> vector<128x3xf32>
    %78 = arith.addf %68, %77 : vector<128x3xf32>
    %cst_19 = arith.constant dense<2147483647> : vector<128xi32>
    %79 = vector.multi_reduction <minsi>, %74, %cst_19 [1] : vector<128x128xi32> to vector<128xi32>
    %80 = vector.shape_cast %79 : vector<128xi32> to vector<128x1xi32>
    %81 = vector.broadcast %80 : vector<128x1xi32> to vector<128x128xi32>
    %82 = arith.cmpi eq, %74, %81 : vector<128x128xi32>
    %c2147483647_i32_20 = arith.constant 2147483647 : i32
    %83 = vector.broadcast %c2147483647_i32_20 : i32 to vector<128x128xi32>
    %84 = arith.select %82, %83, %74 : vector<128x128xi1>, vector<128x128xi32>
    %85 = arith.extui %82 : vector<128x128xi1> to vector<128x128xi32>
    %86 = arith.sitofp %85 : vector<128x128xi32> to vector<128x128xf32>
    %cst_21 = arith.constant dense<0.000000e+00> : vector<128x3xf32>
    %87 = tpu.matmul %86, %2, %cst_21 {dimension_numbers = #tpu.dot_dimension_numbers<[1], [0], [0], [1], [0, 0, 1, 1], [], []>} : vector<128x128xf32>, vector<128x3xf32>, vector<128x3xf32> -> vector<128x3xf32>
    %88 = arith.addf %78, %87 : vector<128x3xf32>
    %cst_22 = arith.constant dense<2147483647> : vector<128xi32>
    %89 = vector.multi_reduction <minsi>, %84, %cst_22 [1] : vector<128x128xi32> to vector<128xi32>
    %90 = vector.shape_cast %89 : vector<128xi32> to vector<128x1xi32>
    %91 = vector.broadcast %90 : vector<128x1xi32> to vector<128x128xi32>
    %92 = arith.cmpi eq, %84, %91 : vector<128x128xi32>
    %c2147483647_i32_23 = arith.constant 2147483647 : i32
    %93 = vector.broadcast %c2147483647_i32_23 : i32 to vector<128x128xi32>
    %94 = arith.select %92, %93, %84 : vector<128x128xi1>, vector<128x128xi32>
    %95 = arith.extui %92 : vector<128x128xi1> to vector<128x128xi32>
    %96 = arith.sitofp %95 : vector<128x128xi32> to vector<128x128xf32>
    %cst_24 = arith.constant dense<0.000000e+00> : vector<128x3xf32>
    %97 = tpu.matmul %96, %2, %cst_24 {dimension_numbers = #tpu.dot_dimension_numbers<[1], [0], [0], [1], [0, 0, 1, 1], [], []>} : vector<128x128xf32>, vector<128x3xf32>, vector<128x3xf32> -> vector<128x3xf32>
    %98 = arith.addf %88, %97 : vector<128x3xf32>
    %cst_25 = arith.constant dense<2147483647> : vector<128xi32>
    %99 = vector.multi_reduction <minsi>, %94, %cst_25 [1] : vector<128x128xi32> to vector<128xi32>
    %100 = vector.shape_cast %99 : vector<128xi32> to vector<128x1xi32>
    %101 = vector.broadcast %100 : vector<128x1xi32> to vector<128x128xi32>
    %102 = arith.cmpi eq, %94, %101 : vector<128x128xi32>
    %c2147483647_i32_26 = arith.constant 2147483647 : i32
    %103 = vector.broadcast %c2147483647_i32_26 : i32 to vector<128x128xi32>
    %104 = arith.select %102, %103, %94 : vector<128x128xi1>, vector<128x128xi32>
    %105 = arith.extui %102 : vector<128x128xi1> to vector<128x128xi32>
    %106 = arith.sitofp %105 : vector<128x128xi32> to vector<128x128xf32>
    %cst_27 = arith.constant dense<0.000000e+00> : vector<128x3xf32>
    %107 = tpu.matmul %106, %2, %cst_27 {dimension_numbers = #tpu.dot_dimension_numbers<[1], [0], [0], [1], [0, 0, 1, 1], [], []>} : vector<128x128xf32>, vector<128x3xf32>, vector<128x3xf32> -> vector<128x3xf32>
    %108 = arith.addf %98, %107 : vector<128x3xf32>
    %cst_28 = arith.constant dense<2147483647> : vector<128xi32>
    %109 = vector.multi_reduction <minsi>, %104, %cst_28 [1] : vector<128x128xi32> to vector<128xi32>
    %110 = vector.shape_cast %109 : vector<128xi32> to vector<128x1xi32>
    %111 = vector.broadcast %110 : vector<128x1xi32> to vector<128x128xi32>
    %112 = arith.cmpi eq, %104, %111 : vector<128x128xi32>
    %c2147483647_i32_29 = arith.constant 2147483647 : i32
    %113 = vector.broadcast %c2147483647_i32_29 : i32 to vector<128x128xi32>
    %114 = arith.select %112, %113, %104 : vector<128x128xi1>, vector<128x128xi32>
    %115 = arith.extui %112 : vector<128x128xi1> to vector<128x128xi32>
    %116 = arith.sitofp %115 : vector<128x128xi32> to vector<128x128xf32>
    %cst_30 = arith.constant dense<0.000000e+00> : vector<128x3xf32>
    %117 = tpu.matmul %116, %2, %cst_30 {dimension_numbers = #tpu.dot_dimension_numbers<[1], [0], [0], [1], [0, 0, 1, 1], [], []>} : vector<128x128xf32>, vector<128x3xf32>, vector<128x3xf32> -> vector<128x3xf32>
    %118 = arith.addf %108, %117 : vector<128x3xf32>
    %cst_31 = arith.constant dense<2147483647> : vector<128xi32>
    %119 = vector.multi_reduction <minsi>, %114, %cst_31 [1] : vector<128x128xi32> to vector<128xi32>
    %120 = vector.shape_cast %119 : vector<128xi32> to vector<128x1xi32>
    %121 = vector.broadcast %120 : vector<128x1xi32> to vector<128x128xi32>
    %122 = arith.cmpi eq, %114, %121 : vector<128x128xi32>
    %123 = arith.extui %122 : vector<128x128xi1> to vector<128x128xi32>
    %124 = arith.sitofp %123 : vector<128x128xi32> to vector<128x128xf32>
    %cst_32 = arith.constant dense<0.000000e+00> : vector<128x3xf32>
    %125 = tpu.matmul %124, %2, %cst_32 {dimension_numbers = #tpu.dot_dimension_numbers<[1], [0], [0], [1], [0, 0, 1, 1], [], []>} : vector<128x128xf32>, vector<128x3xf32>, vector<128x3xf32> -> vector<128x3xf32>
    %126 = arith.addf %118, %125 : vector<128x3xf32>
    %cst_33 = arith.constant 1.000000e+01 : f32
    %127 = vector.broadcast %cst_33 : f32 to vector<128x3xf32>
    %128 = arith.mulf %127, %0 : vector<128x3xf32>
    %129 = arith.subf %126, %128 : vector<128x3xf32>
    %cst_34 = arith.constant 9.000000e+00 : f32
    %130 = vector.broadcast %cst_34 : f32 to vector<128x3xf32>
    %131 = arith.divf %129, %130 : vector<128x3xf32>
    %c0_35 = arith.constant 0 : index
    %c0_36 = arith.constant 0 : index
    %132 = vector.load %arg4[%c0_35, %c0_36] : memref<128x3xf32, #tpu.memory_space<vmem>>, vector<128x3xf32>
    tpu.vector_store %arg4[%c0_35, %c0_36], %131 {strides = array<i32>} : memref<128x3xf32, #tpu.memory_space<vmem>>, vector<128x3xf32>,
    return
  }
  func.func @transform_0(%arg0: i32) -> (i32, i32) {
    %c0_i32 = arith.constant 0 : i32
    %c0_i32_0 = arith.constant 0 : i32
    return %arg0, %c0_i32 : i32, i32
  }
  func.func @transform_1(%arg0: i32) -> (i32, i32) {
    %c0_i32 = arith.constant 0 : i32
    %c0_i32_0 = arith.constant 0 : i32
    %c0_i32_1 = arith.constant 0 : i32
    return %c0_i32, %c0_i32_0 : i32, i32
  }
  func.func @transform_2(%arg0: i32) -> (i32, i32) {
    %c0_i32 = arith.constant 0 : i32
    %c0_i32_0 = arith.constant 0 : i32
    %c0_i32_1 = arith.constant 0 : i32
    return %c0_i32, %c0_i32_0 : i32, i32
  }
  func.func @transform_3(%arg0: i32) -> (i32, i32) {
    %c0_i32 = arith.constant 0 : i32
    %c0_i32_0 = arith.constant 0 : i32
    return %arg0, %c0_i32 : i32, i32
  }
}

</mosaic_0001>

<bundles_post_ra>
// kernel: tpu_custom_call.1
= control target key start
LH: loop header
LB: loop body
LE: loop exit
PB: predicated region body
PF: predicated region fallthrough
CT: control target
= control target key end

     0   :  { %v6668_v0 = vmov 1   ;;  %v6669_v1 = vmov 0   ;;  %v6670_v5 = vmov 2   ;;  %v127_v23 = vlaneseq  ;;  %s9769_s0 = inlined_call_operand.vmem [shape: f32[128,3], index: 0, kind: input, shape index: {}]   ;;  %s9770_s1 = inlined_call_operand.vmem [shape: f32[3,128], index: 1, kind: input, shape index: {}]   ;;  %s9771_s2 = inlined_call_operand.vmem [shape: f32[128,3], index: 2, kind: input, shape index: {}]   ;;  %s9772_s3 = inlined_call_operand.vmem [shape: f32[128,3], index: 3, kind: output, shape index: {}]  }
   0x1   :  { %6625 = vset.pattern.permute.xlu0 %v6668_v0  ;;  %6627 = vset.pattern.permute.xlu1 %v6669_v1  ;;  %v15_v2 = vld [vmem:[%s9769_s0 + $0x8] sm:$0xff]  ;;  %v14_v3 = vld [vmem:[%s9769_s0] sm:$0xff]  ;;  %v17_v4 = vld [vmem:[%s9769_s0 + $0x18] sm:$0xff] }
   0x2   :  { %54 = vperm.xlu1 %6627, %v15_v2   ;;  %164 = vperm.xlu0 %6625, %v14_v3   ;;  %v19_v6 = vld [vmem:[%s9769_s0 + $0x28] sm:$0xff]  ;;  %v16_v7 = vld [vmem:[%s9769_s0 + $0x10] sm:$0xff]  ;;  %v21_v8 = vld [vmem:[%s9769_s0 + $0x38] sm:$0xff]  ;;  %v128_v26 = vshrl.u32 %v127_v23, 7 }
   0x3   :  { %v23_v9 = vld [vmem:[%s9769_s0 + $0x48] sm:$0xff]  ;;  %v25_v10 = vld [vmem:[%s9769_s0 + $0x58] sm:$0xff]  ;;  %v18_v13 = vld [vmem:[%s9769_s0 + $0x20] sm:$0xff] }
   0x4   :  { %v27_v11 = vld [vmem:[%s9769_s0 + $0x68] sm:$0xff]  ;;  %v29_v12 = vld [vmem:[%s9769_s0 + $0x78] sm:$0xff]  ;;  %v20_v14 = vld [vmem:[%s9769_s0 + $0x30] sm:$0xff]  ;;  %v129_v29 = vsub.s32 0, %v128_v26  ;;  %v229_v30 = vsub.s32 1, %v128_v26  ;;  %v345_v33 = vsub.s32 2, %v128_v26 }
   0x5   :  { %v22_v15 = vld [vmem:[%s9769_s0 + $0x40] sm:$0xff]  ;;  %v24_v16 = vld [vmem:[%s9769_s0 + $0x50] sm:$0xff] }
   0x6   :  { %6628 = vset.pattern.permute.xlu1 %v6668_v0  ;;  %6626 = vset.pattern.permute.xlu0 %v6669_v1  ;;  %v26_v17 = vld [vmem:[%s9769_s0 + $0x60] sm:$0xff]  ;;  %v28_v18 = vld [vmem:[%s9769_s0 + $0x70] sm:$0xff] }
   0x7   :  { %168 = vperm.xlu1 %6628, %v15_v2   ;;  %49 = vperm.xlu0 %6626, %v14_v3   ;;  %v30_v31 = vld [vmem:[%s9770_s1] sm:$0x7] }
   0x8   :  { %v6772_v34 = vrot.slane %v30_v31, %v129_v29  ;;  %v6774_v35 = vrot.slane %v30_v31, %v229_v30  ;;  %v6780_v40 = vrot.slane %v30_v31, %v345_v33 }
   0xb   :  { %6629 = vset.pattern.permute.xlu1 %v6670_v5  ;;  %64 = vperm.xlu0 %6626, %v17_v4  }
   0xc   :  { %280 = vperm.xlu1 %6629, %v14_v3  }
   0xf   :  { %74 = vperm.xlu0 %6626, %v19_v6  }
  0x10   :  { %6630 = vset.pattern.permute.xlu1 %v6669_v1 }
  0x11   :  { %59 = vperm.xlu1 %6630, %v16_v7  }
  0x13   :  { %84 = vperm.xlu0 %6626, %v21_v8  }
  0x15   :  { %6631 = vset.pattern.permute.xlu1 %v6668_v0 }
  0x16   :  { %172 = vperm.xlu1 %6631, %v16_v7  }
  0x17   :  { %94 = vperm.xlu0 %6626, %v23_v9  }
  0x1a   :  { %176 = vperm.xlu1 %6631, %v17_v4  }
  0x1b   :  { %104 = vperm.xlu0 %6626, %v25_v10  }
  0x1e   :  { %6632 = vset.pattern.permute.xlu1 %v6670_v5 }
  0x1f   :  { %288 = vperm.xlu1 %6632, %v16_v7   ;;  %114 = vperm.xlu0 %6626, %v27_v11  }
  0x23   :  { %6633 = vset.pattern.permute.xlu1 %v6669_v1  ;;  %124 = vperm.xlu0 %6626, %v29_v12  }
  0x24   :  { %69 = vperm.xlu1 %6633, %v18_v13  }
  0x27   :  { %6650 = vset.pattern.permute.xlu0 %v6670_v5 }
  0x28   :  { %6634 = vset.pattern.permute.xlu1 %v6668_v0  ;;  %284 = vperm.xlu0 %6650, %v15_v2  }
  0x29   :  { %180 = vperm.xlu1 %6634, %v18_v13  }
  0x2c   :  { %292 = vperm.xlu0 %6650, %v17_v4  }
  0x2d   :  { %184 = vperm.xlu1 %6634, %v19_v6  }
  0x30   :  { %300 = vperm.xlu0 %6650, %v19_v6  }
  0x31   :  { %6635 = vset.pattern.permute.xlu1 %v6670_v5 }
  0x32   :  { %296 = vperm.xlu1 %6635, %v18_v13  }
  0x34   :  { %308 = vperm.xlu0 %6650, %v21_v8  }
  0x36   :  { %6636 = vset.pattern.permute.xlu1 %v6669_v1 }
  0x37   :  { %79 = vperm.xlu1 %6636, %v20_v14  }
  0x38   :  { %316 = vperm.xlu0 %6650, %v23_v9  }
  0x3b   :  { %6637 = vset.pattern.permute.xlu1 %v6668_v0 }
  0x3c   :  { %188 = vperm.xlu1 %6637, %v20_v14   ;;  %324 = vperm.xlu0 %6650, %v25_v10  }
  0x40   :  { %192 = vperm.xlu1 %6637, %v21_v8   ;;  %332 = vperm.xlu0 %6650, %v27_v11  }
  0x44   :  { %6638 = vset.pattern.permute.xlu1 %v6670_v5  ;;  %340 = vperm.xlu0 %6650, %v29_v12  }
  0x45   :  { %304 = vperm.xlu1 %6638, %v20_v14  }
  0x49   :  { %6639 = vset.pattern.permute.xlu1 %v6669_v1 }
  0x4a   :  { %89 = vperm.xlu1 %6639, %v22_v15  }
  0x4e   :  { %6640 = vset.pattern.permute.xlu1 %v6668_v0 }
  0x4f   :  { %196 = vperm.xlu1 %6640, %v22_v15  }
  0x53   :  { %200 = vperm.xlu1 %6640, %v23_v9  }
  0x57   :  { %6641 = vset.pattern.permute.xlu1 %v6670_v5 }
  0x58   :  { %312 = vperm.xlu1 %6641, %v22_v15  }
  0x5c   :  { %6642 = vset.pattern.permute.xlu1 %v6669_v1 }
  0x5d   :  { %99 = vperm.xlu1 %6642, %v24_v16  }
  0x61   :  { %6643 = vset.pattern.permute.xlu1 %v6668_v0 }
  0x62   :  { %204 = vperm.xlu1 %6643, %v24_v16  }
  0x66   :  { %208 = vperm.xlu1 %6643, %v25_v10  }
  0x6a   :  { %6644 = vset.pattern.permute.xlu1 %v6670_v5 }
  0x6b   :  { %320 = vperm.xlu1 %6644, %v24_v16  }
  0x6f   :  { %6645 = vset.pattern.permute.xlu1 %v6669_v1 }
  0x70   :  { %109 = vperm.xlu1 %6645, %v26_v17  }
  0x74   :  { %6646 = vset.pattern.permute.xlu1 %v6668_v0 }
  0x75   :  { %212 = vperm.xlu1 %6646, %v26_v17  }
  0x79   :  { %216 = vperm.xlu1 %6646, %v27_v11  }
  0x7d   :  { %6647 = vset.pattern.permute.xlu1 %v6670_v5 }
  0x7e   :  { %328 = vperm.xlu1 %6647, %v26_v17  }
  0x81   :  { %v55_v19 = vpop.permute.xlu1 %54  ;;  %v165_v20 = vpop.permute.xlu0 %164 }
  0x82   :  { %6648 = vset.pattern.permute.xlu1 %v6669_v1  ;;  %v231_v38 = vsub.f32 %v165_v20, %v6774_v35  ;;  %v132_v60 = vsub.f32 %v55_v19, %v6772_v34  ;;  %v6796_v1 = vand.u32 127, %v127_v23 }
  0x83   :  { %119 = vperm.xlu1 %6648, %v28_v18  }
  0x84   :  { %v247_v43 = vmul.f32 %v231_v38, %v231_v38 }
  0x86   :  { %v169_v21 = vpop.permute.xlu1 %168  ;;  %v50_v22 = vpop.permute.xlu0 %49 }
  0x87   :  { %6649 = vset.pattern.permute.xlu1 %v6668_v0  ;;  %v131_v39 = vsub.f32 %v50_v22, %v6772_v34  ;;  %v232_v54 = vsub.f32 %v169_v21, %v6774_v35 }
  0x88   :  { %220 = vperm.xlu1 %6649, %v28_v18  }
  0x89   :  { %v147_v44 = vmul.f32 %v131_v39, %v131_v39  ;;  %v248_v62 = vmul.f32 %v232_v54, %v232_v54 }
  0x8a   :  { %v65_v24 = vpop.permute.xlu0 %64 }
  0x8b   :  { %v281_v25 = vpop.permute.xlu1 %280  ;;  %v263_v49 = vadd.f32 %v247_v43, %v147_v44  ;;  %v134_v63 = vsub.f32 %v65_v24, %v6772_v34 }
  0x8c   :  { %224 = vperm.xlu1 %6649, %v29_v12   ;;  %v347_v45 = vsub.f32 %v281_v25, %v6780_v40 }
  0x8d   :  { %v150_v10 = vmul.f32 %v134_v63, %v134_v63 }
  0x8e   :  { %v75_v27 = vpop.permute.xlu0 %74  ;;  %v363_v50 = vmul.f32 %v347_v45, %v347_v45 }
  0x8f   :  { %v136_v8 = vsub.f32 %v75_v27, %v6772_v34 }
  0x90   :  { %6651 = vset.pattern.permute.xlu1 %v6670_v5  ;;  %v60_v28 = vpop.permute.xlu1 %59  ;;  %v379_v56 = vadd.f32 %v363_v50, %v263_v49  ;;  %v148_v5 = vmul.f32 %v132_v60, %v132_v60 }
  0x91   :  { %336 = vperm.xlu1 %6651, %v28_v18   ;;  %v133_v51 = vsub.f32 %v60_v28, %v6772_v34  ;;  %v152_v20 = vmul.f32 %v136_v8, %v136_v8 }
  0x92   :  { %v6770_v32 = vpop.permute.xlu0 %84  ;;  %v413_v2 = vand.u32 4294967168, %v379_v56  ;;  %v264_v9 = vadd.f32 %v248_v62, %v148_v5 }
  0x93   :  { %v149_v57 = vmul.f32 %v133_v51, %v133_v51  ;;  %v138_v5 = vsub.f32 %v6770_v32, %v6772_v34 }
  0x94   :  { %v6801_v13 = vor.u32 %v413_v2, %v6796_v1 }
  0x95   :  { %v173_v36 = vpop.permute.xlu1 %172 }
  0x96   :  { %v6776_v37 = vpop.permute.xlu0 %94  ;;  %v233_v46 = vsub.f32 %v173_v36, %v6774_v35  ;;  %v446_v30 = vshra.s32 %v6801_v13, 16 }
  0x98   :  { %v249_v53 = vmul.f32 %v233_v46, %v233_v46  ;;  %v6817_v49 = vcvt.s32.f32 %v446_v30 }
  0x99   :  { %v177_v41 = vpop.permute.xlu1 %176 }
  0x9a   :  { %v6782_v42 = vpop.permute.xlu0 %104  ;;  %v265_v61 = vadd.f32 %v249_v53, %v149_v57  ;;  %v234_v0 = vsub.f32 %v177_v41, %v6774_v35 }
  0x9c   :  { %v250_v11 = vmul.f32 %v234_v0, %v234_v0 }
  0x9e   :  { %v289_v47 = vpop.permute.xlu1 %288  ;;  %v6786_v48 = vpop.permute.xlu0 %114  ;;  %v266_v23 = vadd.f32 %v250_v11, %v150_v10 }
  0x9f   :  { %v349_v52 = vsub.f32 %v289_v47, %v6780_v40 }
  0xa1   :  { %v365_v58 = vmul.f32 %v349_v52, %v349_v52 }
  0xa2   :  { %v6791_v55 = vpop.permute.xlu0 %124 }
  0xa3   :  { %v70_v59 = vpop.permute.xlu1 %69  ;;  %v381_v3 = vadd.f32 %v365_v58, %v265_v61 }
  0xa4   :  { %v135_v21 = vsub.f32 %v70_v59, %v6772_v34 }
  0xa5   :  { %v415_v14 = vand.u32 4294967168, %v381_v3 }
  0xa6   :  { %v151_v38 = vmul.f32 %v135_v21, %v135_v21 }
  0xa7   :  { %v285_v4 = vpop.permute.xlu0 %284  ;;  %v6808_v26 = vor.u32 %v415_v14, %v6796_v1 }
  0xa8   :  { %v348_v6 = vsub.f32 %v285_v4, %v6780_v40  ;;  %v181_v7 = vpop.permute.xlu1 %180 }
  0xa9   :  { %v235_v15 = vsub.f32 %v181_v7, %v6774_v35  ;;  %v474_v50 = vshra.s32 %v6808_v26, 16 }
  0xaa   :  { %v364_v12 = vmul.f32 %v348_v6, %v348_v6 }
  0xab   :  { %v293_v16 = vpop.permute.xlu0 %292  ;;  %v251_v27 = vmul.f32 %v235_v15, %v235_v15  ;;  %v6828_v60 = vcvt.s32.f32 %v474_v50 }
  0xac   :  { %v380_v17 = vadd.f32 %v364_v12, %v264_v9  ;;  %v350_v18 = vsub.f32 %v293_v16, %v6780_v40  ;;  %v185_v19 = vpop.permute.xlu1 %184  ;;  %v154_v12 = vmul.f32 %v138_v5, %v138_v5 }
  0xad   :  { %v236_v22 = vsub.f32 %v185_v19, %v6774_v35  ;;  %v267_v47 = vadd.f32 %v251_v27, %v151_v38 }
  0xae   :  { %v414_v24 = vand.u32 4294967168, %v380_v17  ;;  %v366_v25 = vmul.f32 %v350_v18, %v350_v18 }
  0xaf   :  { %v252_v28 = vmul.f32 %v236_v22, %v236_v22  ;;  %v301_v29 = vpop.permute.xlu0 %300 }
  0xb0   :  { %v6812_v31 = vor.u32 %v414_v24, %v6796_v1  ;;  %v382_v33 = vadd.f32 %v366_v25, %v266_v23  ;;  %v352_v36 = vsub.f32 %v301_v29, %v6780_v40 }
  0xb1   :  { %v268_v39 = vadd.f32 %v252_v28, %v152_v20  ;;  %v297_v41 = vpop.permute.xlu1 %296 }
  0xb2   :  { %v416_v43 = vand.u32 4294967168, %v382_v33  ;;  %v368_v44 = vmul.f32 %v352_v36, %v352_v36  ;;  %v351_v45 = vsub.f32 %v297_v41, %v6780_v40  ;;  %v460_v46 = vshra.s32 %v6812_v31, 16 }
  0xb3   :  { %v309_v4 = vpop.permute.xlu0 %308 }
  0xb4   :  { %v6821_v51 = vor.u32 %v416_v43, %v6796_v1  ;;  %v384_v52 = vadd.f32 %v368_v44, %v268_v39  ;;  %v367_v53 = vmul.f32 %v351_v45, %v351_v45  ;;  %v6823_v54 = vcvt.s32.f32 %v460_v46 }
  0xb5   :  { %449 = vmin.xlane.f32.xlu1 %v6817_v49  ;;  %v354_v9 = vsub.f32 %v309_v4, %v6780_v40  ;;  %v140_v43 = vsub.f32 %v6776_v37, %v6772_v34 }
  0xb6   :  { %v418_v56 = vand.u32 4294967168, %v384_v52  ;;  %v383_v57 = vadd.f32 %v367_v53, %v267_v47  ;;  %v80_v58 = vpop.permute.xlu1 %79  ;;  %463 = vmin.xlane.f32.xlu0 %v6823_v54  ;;  %v488_v59 = vshra.s32 %v6821_v51, 16 }
  0xb7   :  { %v137_v32 = vsub.f32 %v80_v58, %v6772_v34  ;;  %v370_v16 = vmul.f32 %v354_v9, %v354_v9  ;;  %v317_v41 = vpop.permute.xlu0 %316  ;;  %v156_v52 = vmul.f32 %v140_v43, %v140_v43 }
  0xb8   :  { %v6831_v61 = vor.u32 %v418_v56, %v6796_v1  ;;  %v417_v62 = vand.u32 4294967168, %v383_v57  ;;  %v6833_v63 = vcvt.s32.f32 %v488_v59  ;;  %v356_v46 = vsub.f32 %v317_v41, %v6780_v40 }
  0xb9   :  { %477 = vmin.xlane.f32.xlu1 %v6828_v60  ;;  %v153_v20 = vmul.f32 %v137_v32, %v137_v32 }
  0xba   :  { %9802 = vst [vmem:[#allocation2_spill] sm:$0xff] %v6831_v61  ;;  %v6837_v0 = vor.u32 %v417_v62, %v6796_v1  ;;  %491 = vmin.xlane.f32.xlu0 %v6833_v63  ;;  %v516_v2 = vshra.s32 %v6831_v61, 16  ;;  %v372_v37 = vmul.f32 %v356_v46, %v356_v46 }
  0xbb   :  { %v189_v3 = vpop.permute.xlu1 %188 }
  0xbc   :  { %9803 = vst [vmem:[#allocation3_spill] sm:$0xff] %v6837_v0  ;;  %v6843_v6 = vcvt.s32.f32 %v516_v2  ;;  %v502_v7 = vshra.s32 %v6837_v0, 16  ;;  %v237_v10 = vsub.f32 %v189_v3, %v6774_v35 }
  0xbe   :  { %519 = vmin.xlane.f32.xlu0 %v6843_v6  ;;  %v6847_v8 = vcvt.s32.f32 %v502_v7  ;;  %v253_v17 = vmul.f32 %v237_v10, %v237_v10 }
  0xbf   :  { %v193_v11 = vpop.permute.xlu1 %192 }
  0xc0   :  { %v238_v14 = vsub.f32 %v193_v11, %v6774_v35  ;;  %505 = vmin.xlane.f32.xlu1 %v6847_v8  ;;  %v269_v23 = vadd.f32 %v253_v17, %v153_v20  ;;  %v142_v20 = vsub.f32 %v6782_v42, %v6772_v34 }
  0xc2   :  { %v254_v15 = vmul.f32 %v238_v14, %v238_v14 }
  0xc4   :  { %v270_v18 = vadd.f32 %v254_v15, %v154_v12  ;;  %v305_v19 = vpop.permute.xlu1 %304 }
  0xc5   :  { %v353_v21 = vsub.f32 %v305_v19, %v6780_v40 }
  0xc6   :  { %v386_v22 = vadd.f32 %v370_v16, %v270_v18  ;;  %v325_v18 = vpop.permute.xlu0 %324 }
  0xc7   :  { %v369_v24 = vmul.f32 %v353_v21, %v353_v21 }
  0xc8   :  { %v420_v25 = vand.u32 4294967168, %v386_v22  ;;  %v358_v22 = vsub.f32 %v325_v18, %v6780_v40 }
  0xc9   :  { %v385_v27 = vadd.f32 %v369_v24, %v269_v23  ;;  %v90_v28 = vpop.permute.xlu1 %89 }
  0xca   :  { %v6856_v29 = vor.u32 %v420_v25, %v6796_v1  ;;  %v139_v56 = vsub.f32 %v90_v28, %v6772_v34  ;;  %v158_v28 = vmul.f32 %v142_v20, %v142_v20 }
  0xcb   :  { %v419_v30 = vand.u32 4294967168, %v385_v27 }
  0xcc   :  { %9804 = vst [vmem:[#allocation4_spill] sm:$0xff] %v6856_v29  ;;  %v544_v33 = vshra.s32 %v6856_v29, 16  ;;  %v155_v2 = vmul.f32 %v139_v56, %v139_v56 }
  0xcd   :  { %v6860_v36 = vor.u32 %v419_v30, %v6796_v1 }
  0xce   :  { %v197_v38 = vpop.permute.xlu1 %196  ;;  %v6862_v39 = vcvt.s32.f32 %v544_v33  ;;  %v374_v33 = vmul.f32 %v358_v22, %v358_v22 }
  0xcf   :  { %9805 = vst [vmem:[#allocation5_spill] sm:$0xff] %v6860_v36  ;;  %v530_v44 = vshra.s32 %v6860_v36, 16  ;;  %v239_v47 = vsub.f32 %v197_v38, %v6774_v35 }
  0xd0   :  { %547 = vmin.xlane.f32.xlu0 %v6862_v39 }
  0xd1   :  { %v6868_v45 = vcvt.s32.f32 %v530_v44  ;;  %v255_v58 = vmul.f32 %v239_v47, %v239_v47 }
  0xd2   :  { %v201_v50 = vpop.permute.xlu1 %200 }
  0xd3   :  { %v240_v53 = vsub.f32 %v201_v50, %v6774_v35  ;;  %533 = vmin.xlane.f32.xlu1 %v6868_v45  ;;  %v271_v5 = vadd.f32 %v255_v58, %v155_v2 }
  0xd5   :  { %v256_v57 = vmul.f32 %v240_v53, %v240_v53 }
  0xd7   :  { %v272_v59 = vadd.f32 %v256_v57, %v156_v52  ;;  %v313_v62 = vpop.permute.xlu1 %312 }
  0xd8   :  { %v355_v3 = vsub.f32 %v313_v62, %v6780_v40 }
  0xd9   :  { %v388_v4 = vadd.f32 %v372_v37, %v272_v59 }
  0xda   :  { %v371_v7 = vmul.f32 %v355_v3, %v355_v3 }
  0xdb   :  { %v422_v9 = vand.u32 4294967168, %v388_v4  ;;  %v144_v4 = vsub.f32 %v6786_v48, %v6772_v34 }
  0xdc   :  { %v387_v10 = vadd.f32 %v371_v7, %v271_v5  ;;  %v100_v11 = vpop.permute.xlu1 %99  ;;  %v333_v7 = vpop.permute.xlu0 %332 }
  0xdd   :  { %v6877_v12 = vor.u32 %v422_v9, %v6796_v1  ;;  %v141_v27 = vsub.f32 %v100_v11, %v6772_v34  ;;  %v360_v11 = vsub.f32 %v333_v7, %v6780_v40 }
  0xde   :  { %v421_v14 = vand.u32 4294967168, %v387_v10 }
  0xdf   :  { %9806 = vst [vmem:[#allocation6_spill] sm:$0xff] %v6877_v12  ;;  %v572_v32 = vshra.s32 %v6877_v12, 16  ;;  %v157_v42 = vmul.f32 %v141_v27, %v141_v27  ;;  %v376_v20 = vmul.f32 %v360_v11, %v360_v11 }
  0xe0   :  { %v6881_v15 = vor.u32 %v421_v14, %v6796_v1 }
  0xe1   :  { %v205_v16 = vpop.permute.xlu1 %204  ;;  %v6883_v17 = vcvt.s32.f32 %v572_v32 }
  0xe2   :  { %9807 = vst [vmem:[#allocation7_spill] sm:$0xff] %v6881_v15  ;;  %v558_v19 = vshra.s32 %v6881_v15, 16  ;;  %v241_v23 = vsub.f32 %v205_v16, %v6774_v35  ;;  %v160_v16 = vmul.f32 %v144_v4, %v144_v4 }
  0xe3   :  { %575 = vmin.xlane.f32.xlu0 %v6883_v17 }
  0xe4   :  { %v6889_v21 = vcvt.s32.f32 %v558_v19  ;;  %v257_v38 = vmul.f32 %v241_v23, %v241_v23 }
  0xe5   :  { %v209_v24 = vpop.permute.xlu1 %208 }
  0xe6   :  { %v242_v25 = vsub.f32 %v209_v24, %v6774_v35  ;;  %561 = vmin.xlane.f32.xlu1 %v6889_v21  ;;  %v273_v47 = vadd.f32 %v257_v38, %v157_v42 }
  0xe8   :  { %v258_v30 = vmul.f32 %v242_v25, %v242_v25 }
  0xea   :  { %v274_v41 = vadd.f32 %v258_v30, %v158_v28  ;;  %v321_v43 = vpop.permute.xlu1 %320 }
  0xeb   :  { %v357_v44 = vsub.f32 %v321_v43, %v6780_v40 }
  0xec   :  { %v390_v46 = vadd.f32 %v374_v33, %v274_v41 }
  0xed   :  { %v373_v50 = vmul.f32 %v357_v44, %v357_v44 }
  0xee   :  { %v424_v52 = vand.u32 4294967168, %v390_v46 }
  0xef   :  { %v389_v53 = vadd.f32 %v373_v50, %v273_v47  ;;  %v110_v56 = vpop.permute.xlu1 %109 }
  0xf0   :  { %v6898_v57 = vor.u32 %v424_v52, %v6796_v1  ;;  %v143_v32 = vsub.f32 %v110_v56, %v6772_v34  ;;  %v341_v52 = vpop.permute.xlu0 %340 }
  0xf1   :  { %v423_v37 = vand.u32 4294967168, %v389_v53  ;;  %v146_v53 = vsub.f32 %v6791_v55, %v6772_v34 }
  0xf2   :  { %9808 = vst [vmem:[#allocation8_spill] sm:$0xff] %v6898_v57  ;;  %v600_v58 = vshra.s32 %v6898_v57, 16  ;;  %v159_v23 = vmul.f32 %v143_v32, %v143_v32 }
  0xf3   :  { %v6902_v59 = vor.u32 %v423_v37, %v6796_v1  ;;  %v162_v7 = vmul.f32 %v146_v53, %v146_v53 }
  0xf4   :  { %v213_v62 = vpop.permute.xlu1 %212  ;;  %v6904_v2 = vcvt.s32.f32 %v600_v58 }
  0xf5   :  { %9809 = vst [vmem:[#allocation9_spill] sm:$0xff] %v6902_v59  ;;  %v586_v3 = vshra.s32 %v6902_v59, 16  ;;  %v243_v9 = vsub.f32 %v213_v62, %v6774_v35  ;;  %v362_v62 = vsub.f32 %v341_v52, %v6780_v40 }
  0xf6   :  { %603 = vmin.xlane.f32.xlu0 %v6904_v2 }
  0xf7   :  { %v6910_v5 = vcvt.s32.f32 %v586_v3  ;;  %v259_v19 = vmul.f32 %v243_v9, %v243_v9  ;;  %v378_v11 = vmul.f32 %v362_v62, %v362_v62 }
  0xf8   :  { %v217_v10 = vpop.permute.xlu1 %216 }
  0xf9   :  { %v244_v14 = vsub.f32 %v217_v10, %v6774_v35  ;;  %589 = vmin.xlane.f32.xlu1 %v6910_v5  ;;  %v275_v27 = vadd.f32 %v259_v19, %v159_v23 }
  0xfb   :  { %v260_v18 = vmul.f32 %v244_v14, %v244_v14 }
  0xfd   :  { %v276_v22 = vadd.f32 %v260_v18, %v160_v16  ;;  %v329_v48 = vpop.permute.xlu1 %328 }
  0xfe   :  { %v359_v24 = vsub.f32 %v329_v48, %v6780_v40 }
  0xff   :  { %v392_v25 = vadd.f32 %v376_v20, %v276_v22 }
 0x100   :  { %v375_v28 = vmul.f32 %v359_v24, %v359_v24 }
 0x101   :  { %v426_v30 = vand.u32 4294967168, %v392_v25 }
 0x102   :  { %v391_v33 = vadd.f32 %v375_v28, %v275_v27  ;;  %v120_v38 = vpop.permute.xlu1 %119  ;;  %v445_v28 = vand.u32 65535, %v6801_v13 }
 0x103   :  { %v6919_v41 = vor.u32 %v426_v30, %v6796_v1  ;;  %v145_v4 = vsub.f32 %v120_v38, %v6772_v34  ;;  %v459_v30 = vand.u32 65535, %v6812_v31 }
 0x104   :  { %v425_v43 = vand.u32 4294967168, %v391_v33  ;;  %v447_v38 = vcvt.s32.f32 %v445_v28  ;;  %v599_v28 = vand.u32 65535, %v6898_v57 }
 0x105   :  { %9810 = vst [vmem:[#allocation10_spill] sm:$0xff] %v6919_v41  ;;  %v628_v42 = vshra.s32 %v6919_v41, 16  ;;  %v161_v55 = vmul.f32 %v145_v4, %v145_v4  ;;  %v501_v4 = vand.u32 65535, %v6837_v0 }
 0x106   :  { %v6923_v44 = vor.u32 %v425_v43, %v6796_v1 }
 0x107   :  { %v221_v46 = vpop.permute.xlu1 %220  ;;  %v6925_v47 = vcvt.s32.f32 %v628_v42  ;;  %v461_v42 = vcvt.s32.f32 %v459_v30  ;;  %v585_v30 = vand.u32 65535, %v6902_v59 }
 0x108   :  { %9811 = vst [vmem:[#allocation11_spill] sm:$0xff] %v6923_v44  ;;  %v614_v50 = vshra.s32 %v6923_v44, 16  ;;  %v245_v37 = vsub.f32 %v221_v46, %v6774_v35  ;;  %v487_v46 = vand.u32 65535, %v6821_v51 }
 0x109   :  { %631 = vmin.xlane.f32.xlu0 %v6925_v47 }
 0x10a   :  { %v6931_v56 = vcvt.s32.f32 %v614_v50  ;;  %v261_v10 = vmul.f32 %v245_v37, %v245_v37  ;;  %v489_v62 = vcvt.s32.f32 %v487_v46  ;;  %v587_v46 = vcvt.s32.f32 %v585_v30 }
 0x10b   :  { %v225_v58 = vpop.permute.xlu1 %224 }
 0x10c   :  { %v246_v3 = vsub.f32 %v225_v58, %v6774_v35  ;;  %617 = vmin.xlane.f32.xlu1 %v6931_v56  ;;  %v277_v19 = vadd.f32 %v261_v10, %v161_v55 }
 0x10e   :  { %v262_v9 = vmul.f32 %v246_v3, %v246_v3 }
 0x110   :  { %v278_v14 = vadd.f32 %v262_v9, %v162_v7  ;;  %v337_v32 = vpop.permute.xlu1 %336 }
 0x111   :  { %v361_v16 = vsub.f32 %v337_v32, %v6780_v40  ;;  %v529_v32 = vand.u32 65535, %v6860_v36 }
 0x112   :  { %v394_v18 = vadd.f32 %v378_v11, %v278_v14  ;;  %v503_v11 = vcvt.s32.f32 %v501_v4  ;;  %v543_v14 = vand.u32 65535, %v6856_v29 }
 0x113   :  { %v377_v20 = vmul.f32 %v361_v16, %v361_v16 }
 0x114   :  { %v428_v22 = vand.u32 4294967168, %v394_v18  ;;  %v545_v16 = vcvt.s32.f32 %v543_v14 }
 0x115   :  { %v393_v48 = vadd.f32 %v377_v20, %v277_v19  ;;  %v531_v19 = vcvt.s32.f32 %v529_v32  ;;  %v571_v20 = vand.u32 65535, %v6877_v12 }
 0x116   :  { %v6940_v35 = vor.u32 %v428_v22, %v6796_v1  ;;  %v557_v22 = vand.u32 65535, %v6881_v15 }
 0x117   :  { %v427_v23 = vand.u32 4294967168, %v393_v48 }
 0x118   :  { %9812 = vst [vmem:[#allocation12_spill] sm:$0xff] %v6940_v35  ;;  %v656_v34 = vshra.s32 %v6940_v35, 16 }
 0x119   :  { %v6944_v24 = vor.u32 %v427_v23, %v6796_v1  ;;  %v473_v1 = vand.u32 65535, %v6808_v26  ;;  %v573_v23 = vcvt.s32.f32 %v571_v20 }
 0x11a   :  { %v6946_v25 = vcvt.s32.f32 %v656_v34 }
 0x11b   :  { %9813 = vst [vmem:[#allocation13_spill] sm:$0xff] %v6944_v24  ;;  %v642_v27 = vshra.s32 %v6944_v24, 16  ;;  %v475_v37 = vcvt.s32.f32 %v473_v1  ;;  %v601_v1 = vcvt.s32.f32 %v599_v28  ;;  %v641_v4 = vand.u32 65535, %v6944_v24 }
 0x11c   :  { %659 = vmin.xlane.f32.xlu0 %v6946_v25 }
 0x11d   :  { %v6950_v40 = vcvt.s32.f32 %v642_v27  ;;  %v559_v27 = vcvt.s32.f32 %v557_v22 }
 0x11f   :  { %645 = vmin.xlane.f32.xlu1 %v6950_v40 }
 0x142   :  { %v6955_v33 = vpop.xlane.xlu1 %449 }
 0x143   :  { %v6958_v43 = vpop.xlane.xlu0 %463  ;;  %vm451_vm0 = vcmp.eq.f32.partialorder %v6817_v49, %v6955_v33  ;;  %v515_v49 = vand.u32 65535, %v6831_v61  ;;  %v456_v14 = vcvt.f32.s32 %v6955_v33 }
 0x144   :  { %v452_v50 = vsel %vm451_vm0, %v447_v38, inf  ;;  %vm465_vm1 = vcmp.eq.f32.partialorder %v6823_v54, %v6958_v43  ;;  %v470_v32 = vcvt.f32.s32 %v6958_v43 }
 0x145   :  { %453 = vmin.xlane.f32.xlu1 %v452_v50  ;;  %v466_v52 = vsel %vm465_vm1, %v461_v42, inf  ;;  %v517_v9 = vcvt.s32.f32 %v515_v49  ;;  %v627_v50 = vand.u32 65535, %v6919_v41 }
 0x146   :  { %v6965_v53 = vpop.xlane.xlu1 %477  ;;  %467 = vmin.xlane.f32.xlu0 %v466_v52  ;;  %v613_v52 = vand.u32 65535, %v6923_v44  ;;  %v471_v20 = vshll.u32 %v470_v32, 16 }
 0x147   :  { %v6967_v58 = vpop.xlane.xlu0 %491  ;;  %vm479_vm2 = vcmp.eq.f32.partialorder %v6828_v60, %v6965_v53 }
 0x148   :  { %v480_v3 = vsel %vm479_vm2, %v475_v37, inf  ;;  %vm493_vm3 = vcmp.eq.f32.partialorder %v6833_v63, %v6967_v58  ;;  %v498_v22 = vcvt.f32.s32 %v6967_v58 }
 0x149   :  { %481 = vmin.xlane.f32.xlu1 %v480_v3  ;;  %v494_v54 = vsel %vm493_vm3, %v489_v62, inf  ;;  %v629_v62 = vcvt.s32.f32 %v627_v50  ;;  %v615_v3 = vcvt.s32.f32 %v613_v52 }
 0x14a   :  { %495 = vmin.xlane.f32.xlu0 %v494_v54  ;;  %v655_v54 = vand.u32 65535, %v6940_v35 }
 0x14b   :  { %v6975_v7 = vpop.xlane.xlu0 %519 }
 0x14c   :  { %vm521_vm4 = vcmp.eq.f32.partialorder %v6843_v6, %v6975_v7  ;;  %v526_v33 = vcvt.f32.s32 %v6975_v7 }
 0x14d   :  { %v6979_v10 = vpop.xlane.xlu1 %505  ;;  %v522_v60 = vsel %vm521_vm4, %v517_v9, inf }
 0x14e   :  { %523 = vmin.xlane.f32.xlu0 %v522_v60  ;;  %vm507_vm5 = vcmp.eq.f32.partialorder %v6847_v8, %v6979_v10  ;;  %v657_v60 = vcvt.s32.f32 %v655_v54  ;;  %v527_v52 = vshll.u32 %v526_v33, 16 }
 0x14f   :  { %v508_v63 = vsel %vm507_vm5, %v503_v11, inf }
 0x150   :  { %509 = vmin.xlane.f32.xlu1 %v508_v63  ;;  %v643_v63 = vcvt.s32.f32 %v641_v4 }
 0x15d   :  { %v6985_v55 = vpop.xlane.xlu0 %547 }
 0x15e   :  { %vm549_vm6 = vcmp.eq.f32.partialorder %v6862_v39, %v6985_v55 }
 0x15f   :  { %v550_v6 = vsel %vm549_vm6, %v545_v16, inf }
 0x160   :  { %v6989_v18 = vpop.xlane.xlu1 %533  ;;  %551 = vmin.xlane.f32.xlu0 %v550_v6  ;;  %v457_v6 = vshll.u32 %v456_v14, 16 }
 0x161   :  { %vm535_vm7 = vcmp.eq.f32.partialorder %v6868_v45, %v6989_v18 }
 0x162   :  { %v536_v8 = vsel %vm535_vm7, %v531_v19, inf  ;;  %v484_v19 = vcvt.f32.s32 %v6965_v53  ;;  %v499_v53 = vshll.u32 %v498_v22, 16 }
 0x163   :  { %537 = vmin.xlane.f32.xlu1 %v536_v8 }
 0x170   :  { %v6995_v48 = vpop.xlane.xlu0 %575 }
 0x171   :  { %vm577_vm8 = vcmp.eq.f32.partialorder %v6883_v17, %v6995_v48 }
 0x172   :  { %v578_v39 = vsel %vm577_vm8, %v573_v23, inf }
 0x173   :  { %v6999_v34 = vpop.xlane.xlu1 %561  ;;  %579 = vmin.xlane.f32.xlu0 %v578_v39 }
 0x174   :  { %vm563_vm9 = vcmp.eq.f32.partialorder %v6889_v21, %v6999_v34 }
 0x175   :  { %v564_v45 = vsel %vm563_vm9, %v559_v27, inf }
 0x176   :  { %565 = vmin.xlane.f32.xlu1 %v564_v45  ;;  %v485_v45 = vshll.u32 %v484_v19, 16 }
 0x183   :  { %v7005_v38 = vpop.xlane.xlu0 %603 }
 0x184   :  { %vm605_vm10 = vcmp.eq.f32.partialorder %v6904_v2, %v7005_v38 }
 0x185   :  { %v606_v17 = vsel %vm605_vm10, %v601_v1, inf }
 0x186   :  { %v7009_v42 = vpop.xlane.xlu1 %589  ;;  %607 = vmin.xlane.f32.xlu0 %v606_v17 }
 0x187   :  { %vm591_vm11 = vcmp.eq.f32.partialorder %v6910_v5, %v7009_v42 }
 0x188   :  { %v592_v21 = vsel %vm591_vm11, %v587_v46, inf  ;;  %v512_v46 = vcvt.f32.s32 %v6979_v10 }
 0x189   :  { %593 = vmin.xlane.f32.xlu1 %v592_v21 }
 0x196   :  { %v7015_v37 = vpop.xlane.xlu0 %631 }
 0x197   :  { %vm633_vm12 = vcmp.eq.f32.partialorder %v6925_v47, %v7015_v37 }
 0x198   :  { %v634_v2 = vsel %vm633_vm12, %v629_v62, inf }
 0x199   :  { %v7019_v49 = vpop.xlane.xlu1 %617  ;;  %635 = vmin.xlane.f32.xlu0 %v634_v2 }
 0x19a   :  { %vm619_vm13 = vcmp.eq.f32.partialorder %v6931_v56, %v7019_v49 }
 0x19b   :  { %v620_v5 = vsel %vm619_vm13, %v615_v3, inf }
 0x19c   :  { %621 = vmin.xlane.f32.xlu1 %v620_v5 }
 0x1a9   :  { %v7025_v9 = vpop.xlane.xlu0 %659 }
 0x1aa   :  { %vm661_vm14 = vcmp.eq.f32.partialorder %v6946_v25, %v7025_v9 }
 0x1ab   :  { %v662_v47 = vsel %vm661_vm14, %v657_v60, inf }
 0x1ac   :  { %v7029_v11 = vpop.xlane.xlu1 %645  ;;  %663 = vmin.xlane.f32.xlu0 %v662_v47  ;;  %v513_v47 = vshll.u32 %v512_v46, 16 }
 0x1ad   :  { %vm647_vm15 = vcmp.eq.f32.partialorder %v6950_v40, %v7029_v11 }
 0x1ae   :  { %v648_v56 = vsel %vm647_vm15, %v643_v63, inf }
 0x1af   :  { %649 = vmin.xlane.f32.xlu1 %v648_v56 }
 0x1d2   :  { %v454_v16 = vpop.xlane.xlu1 %453 }
 0x1d3   :  { %v455_v8 = vcvt.f32.s32 %v454_v16  ;;  %v468_v25 = vpop.xlane.xlu0 %467 }
 0x1d4   :  { %v469_v23 = vcvt.f32.s32 %v468_v25 }
 0x1d5   :  { %v7037_v39 = vadd.s32 %v457_v6, %v455_v8 }
 0x1d6   :  { %v7039_v27 = vadd.s32 %v471_v20, %v469_v23  ;;  %v482_v40 = vpop.xlane.xlu1 %481 }
 0x1d7   :  { %vm669_vm0 = vcmp.eq.s32.totalorder %v6801_v13, %v7037_v39  ;;  %v483_v43 = vcvt.f32.s32 %v482_v40  ;;  %v496_v28 = vpop.xlane.xlu0 %495  ;;  %v554_v40 = vcvt.f32.s32 %v6985_v55 }
 0x1d8   :  { %vm670_vm1 = vcmp.eq.s32.totalorder %v6812_v31, %v7039_v27  ;;  %v497_v30 = vcvt.f32.s32 %v496_v28  ;;  %v7050_v58 = vsel %vm669_vm0, 2147483647, %v6801_v13 }
 0x1d9   :  { %v7052_v1 = vadd.s32 %v485_v45, %v483_v43  ;;  %v734_v7 = vshra.s32 %v7050_v58, 16  ;;  %v7059_v17 = vsel %vm670_vm1, 2147483647, %v6812_v31  ;;  %v540_v45 = vcvt.f32.s32 %v6989_v18 }
 0x1da   :  { %v7062_v21 = vadd.s32 %v499_v53, %v497_v30  ;;  %v748_v50 = vshra.s32 %v7059_v17, 16  ;;  %v555_v43 = vshll.u32 %v554_v40, 16 }
 0x1db   :  { %vm671_vm2 = vcmp.eq.s32.totalorder %v6808_v26, %v7052_v1  ;;  %v524_v62 = vpop.xlane.xlu0 %523  ;;  %v7067_v2 = vcvt.s32.f32 %v734_v7  ;;  %v541_v7 = vshll.u32 %v540_v45, 16 }
 0x1dc   :  { %vm672_vm3 = vcmp.eq.s32.totalorder %v6821_v51, %v7062_v21  ;;  %v525_v3 = vcvt.f32.s32 %v524_v62  ;;  %v7071_v5 = vcvt.s32.f32 %v748_v50  ;;  %v7077_v10 = vsel %vm671_vm2, 2147483647, %v6808_v26 }
 0x1dd   :  { %737 = vmin.xlane.f32.xlu1 %v7067_v2  ;;  %v510_v54 = vpop.xlane.xlu1 %509  ;;  %v762_v4 = vshra.s32 %v7077_v10, 16  ;;  %v7085_v60 = vsel %vm672_vm3, 2147483647, %v6821_v51 }
 0x1de   :  { %v7087_v63 = vadd.s32 %v527_v52, %v525_v3  ;;  %v511_v56 = vcvt.f32.s32 %v510_v54  ;;  %751 = vmin.xlane.f32.xlu0 %v7071_v5  ;;  %v776_v14 = vshra.s32 %v7085_v60, 16 }
 0x1df   :  { %v7091_v32 = vcvt.s32.f32 %v762_v4  ;;  %v582_v4 = vcvt.f32.s32 %v6995_v48 }
 0x1e0   :  { %9814 = vst [vmem:[#allocation14_spill] sm:$0xff] %v7087_v63  ;;  %vm674_vm4 = vcmp.eq.s32.totalorder %v6831_v61, %v7087_v63  ;;  %v7095_v16 = vadd.s32 %v513_v47, %v511_v56  ;;  %v7097_v6 = vcvt.s32.f32 %v776_v14  ;;  %v568_v47 = vcvt.f32.s32 %v6999_v34 }
 0x1e1   :  { %765 = vmin.xlane.f32.xlu1 %v7091_v32  ;;  %v7104_v19 = vsel %vm674_vm4, 2147483647, %v6831_v61  ;;  %v583_v14 = vshll.u32 %v582_v4, 16 }
 0x1e2   :  { %9815 = vst [vmem:[#allocation15_spill] sm:$0xff] %v7095_v16  ;;  %vm673_vm5 = vcmp.eq.s32.totalorder %v6837_v0, %v7095_v16  ;;  %779 = vmin.xlane.f32.xlu0 %v7097_v6  ;;  %v804_v8 = vshra.s32 %v7104_v19, 16  ;;  %v569_v45 = vshll.u32 %v568_v47, 16 }
 0x1e3   :  { %v7114_v25 = vsel %vm673_vm5, 2147483647, %v6837_v0 }
 0x1e4   :  { %v7116_v20 = vcvt.s32.f32 %v804_v8  ;;  %v790_v22 = vshra.s32 %v7114_v25, 16 }
 0x1e6   :  { %807 = vmin.xlane.f32.xlu0 %v7116_v20  ;;  %v7120_v23 = vcvt.s32.f32 %v790_v22 }
 0x1e8   :  { %793 = vmin.xlane.f32.xlu1 %v7120_v23 }
 0x1ed   :  { %v552_v33 = vpop.xlane.xlu0 %551 }
 0x1ee   :  { %v553_v28 = vcvt.f32.s32 %v552_v33 }
 0x1f0   :  { %v7125_v53 = vadd.s32 %v555_v43, %v553_v28  ;;  %v538_v30 = vpop.xlane.xlu1 %537 }
 0x1f1   :  { %v539_v46 = vcvt.f32.s32 %v538_v30 }
 0x1f2   :  { %9816 = vst [vmem:[#allocation16_spill] sm:$0xff] %v7125_v53  ;;  %vm676_vm6 = vcmp.eq.s32.totalorder %v6856_v29, %v7125_v53 }
 0x1f3   :  { %v7129_v50 = vadd.s32 %v541_v7, %v539_v46  ;;  %v7135_v55 = vsel %vm676_vm6, 2147483647, %v6856_v29 }
 0x1f4   :  { %v832_v18 = vshra.s32 %v7135_v55, 16 }
 0x1f5   :  { %9817 = vst [vmem:[#allocation17_spill] sm:$0xff] %v7129_v50  ;;  %vm675_vm7 = vcmp.eq.s32.totalorder %v6860_v36, %v7129_v50 }
 0x1f6   :  { %v7144_v52 = vsel %vm675_vm7, 2147483647, %v6860_v36  ;;  %v7146_v62 = vcvt.s32.f32 %v832_v18  ;;  %v610_v18 = vcvt.f32.s32 %v7005_v38 }
 0x1f7   :  { %v818_v3 = vshra.s32 %v7144_v52, 16 }
 0x1f8   :  { %835 = vmin.xlane.f32.xlu0 %v7146_v62  ;;  %v611_v47 = vshll.u32 %v610_v18, 16 }
 0x1f9   :  { %v7150_v54 = vcvt.s32.f32 %v818_v3  ;;  %v596_v3 = vcvt.f32.s32 %v7009_v42 }
 0x1fb   :  { %821 = vmin.xlane.f32.xlu1 %v7150_v54 }
 0x200   :  { %v580_v56 = vpop.xlane.xlu0 %579 }
 0x201   :  { %v581_v8 = vcvt.f32.s32 %v580_v56 }
 0x203   :  { %v7155_v22 = vadd.s32 %v583_v14, %v581_v8  ;;  %v566_v40 = vpop.xlane.xlu1 %565 }
 0x204   :  { %v567_v33 = vcvt.f32.s32 %v566_v40  ;;  %v597_v40 = vshll.u32 %v596_v3, 16 }
 0x205   :  { %9818 = vst [vmem:[#allocation18_spill] sm:$0xff] %v7155_v22  ;;  %vm678_vm8 = vcmp.eq.s32.totalorder %v6877_v12, %v7155_v22  ;;  %v761_v22 = vand.u32 65535, %v7077_v10 }
 0x206   :  { %v7159_v43 = vadd.s32 %v569_v45, %v567_v33  ;;  %v7165_v48 = vsel %vm678_vm8, 2147483647, %v6877_v12  ;;  %v43_v12 = vld [vmem:[%s9771_s2 + $0x60] sm:$0xff] }
 0x207   :  { %v860_v34 = vshra.s32 %v7165_v48, 16 }
 0x208   :  { %9819 = vst [vmem:[#allocation19_spill] sm:$0xff] %v7159_v43  ;;  %vm677_vm9 = vcmp.eq.s32.totalorder %v6881_v15, %v7159_v43  ;;  %v44_v43 = vld [vmem:[%s9771_s2 + $0x68] sm:$0xff] }
 0x209   :  { %v7174_v28 = vsel %vm677_vm9, 2147483647, %v6881_v15  ;;  %v7176_v30 = vcvt.s32.f32 %v860_v34  ;;  %v7360_v29 = vpack.c.bf16 %v44_v43, %v43_v12 }
 0x20a   :  { %v846_v7 = vshra.s32 %v7174_v28, 16 }
 0x20b   :  { %863 = vmin.xlane.f32.xlu0 %v7176_v30 }
 0x20c   :  { %v7180_v46 = vcvt.s32.f32 %v846_v7 }
 0x20e   :  { %849 = vmin.xlane.f32.xlu1 %v7180_v46 }
 0x213   :  { %v608_v4 = vpop.xlane.xlu0 %607 }
 0x214   :  { %v609_v56 = vcvt.f32.s32 %v608_v4  ;;  %v638_v4 = vcvt.f32.s32 %v7015_v37 }
 0x216   :  { %v7185_v14 = vadd.s32 %v611_v47, %v609_v56  ;;  %v594_v8 = vpop.xlane.xlu1 %593  ;;  %v624_v47 = vcvt.f32.s32 %v7019_v49 }
 0x217   :  { %v595_v45 = vcvt.f32.s32 %v594_v8  ;;  %v639_v8 = vshll.u32 %v638_v4, 16 }
 0x218   :  { %9820 = vst [vmem:[#allocation20_spill] sm:$0xff] %v7185_v14  ;;  %vm680_vm10 = vcmp.eq.s32.totalorder %v6898_v57, %v7185_v14 }
 0x219   :  { %v7189_v33 = vadd.s32 %v597_v40, %v595_v45  ;;  %v7195_v38 = vsel %vm680_vm10, 2147483647, %v6898_v57 }
 0x21a   :  { %v888_v42 = vshra.s32 %v7195_v38, 16 }
 0x21b   :  { %9821 = vst [vmem:[#allocation21_spill] sm:$0xff] %v7189_v33  ;;  %vm679_vm11 = vcmp.eq.s32.totalorder %v6902_v59, %v7189_v33 }
 0x21c   :  { %v7204_v34 = vsel %vm679_vm11, 2147483647, %v6902_v59  ;;  %v7206_v7 = vcvt.s32.f32 %v888_v42  ;;  %v625_v42 = vshll.u32 %v624_v47, 16  ;;  %v666_v47 = vcvt.f32.s32 %v7025_v9 }
 0x21d   :  { %v874_v18 = vshra.s32 %v7204_v34, 16 }
 0x21e   :  { %891 = vmin.xlane.f32.xlu0 %v7206_v7 }
 0x21f   :  { %v7210_v3 = vcvt.s32.f32 %v874_v18 }
 0x221   :  { %877 = vmin.xlane.f32.xlu1 %v7210_v3 }
 0x226   :  { %v636_v56 = vpop.xlane.xlu0 %635 }
 0x227   :  { %v637_v40 = vcvt.f32.s32 %v636_v56  ;;  %v652_v56 = vcvt.f32.s32 %v7029_v11 }
 0x229   :  { %v7215_v45 = vadd.s32 %v639_v8, %v637_v40  ;;  %v622_v14 = vpop.xlane.xlu1 %621  ;;  %v667_v40 = vshll.u32 %v666_v47, 16 }
 0x22a   :  { %v623_v57 = vcvt.f32.s32 %v622_v14 }
 0x22b   :  { %9822 = vst [vmem:[#allocation22_spill] sm:$0xff] %v7215_v45  ;;  %vm9794_vm12 = vcmp.eq.s32.totalorder %v6919_v41, %v7215_v45 }
 0x22c   :  { %v7219_v33 = vadd.s32 %v625_v42, %v623_v57  ;;  %v7225_v37 = vsel %vm9794_vm12, 2147483647, %v6919_v41 }
 0x22d   :  { %v916_v49 = vshra.s32 %v7225_v37, 16 }
 0x22e   :  { %9823 = vst [vmem:[#allocation23_spill] sm:$0xff] %v7219_v33  ;;  %vm681_vm13 = vcmp.eq.s32.totalorder %v6923_v44, %v7219_v33 }
 0x22f   :  { %v7234_v14 = vsel %vm681_vm13, 2147483647, %v6923_v44  ;;  %v7236_v18 = vcvt.s32.f32 %v916_v49  ;;  %v653_v49 = vshll.u32 %v652_v56, 16  ;;  %v31_v56 = vld [vmem:[%s9771_s2] sm:$0xff] }
 0x230   :  { %v902_v57 = vshra.s32 %v7234_v14, 16 }
 0x231   :  { %919 = vmin.xlane.f32.xlu0 %v7236_v18 }
 0x232   :  { %v7240_v4 = vcvt.s32.f32 %v902_v57 }
 0x234   :  { %905 = vmin.xlane.f32.xlu1 %v7240_v4 }
 0x239   :  { %v664_v8 = vpop.xlane.xlu0 %663 }
 0x23a   :  { %v665_v42 = vcvt.f32.s32 %v664_v8  ;;  %v32_v8 = vld [vmem:[%s9771_s2 + $0x8] sm:$0xff] }
 0x23c   :  { %v7245_v45 = vadd.s32 %v667_v40, %v665_v42  ;;  %v650_v41 = vpop.xlane.xlu1 %649  ;;  %v33_v40 = vld [vmem:[%s9771_s2 + $0x10] sm:$0xff]  ;;  %v7282_v42 = vpack.c.bf16 %v32_v8, %v31_v56 }
 0x23d   :  { %v651_v33 = vcvt.f32.s32 %v650_v41  ;;  %v37_v8 = vld [vmem:[%s9771_s2 + $0x30] sm:$0xff] }
 0x23e   :  { %9824 = vst [vmem:[#allocation24_spill] sm:$0xff] %v7245_v45  ;;  %vm9789_vm14 = vcmp.eq.s32.totalorder %v6940_v35, %v7245_v45  ;;  %v36_v45 = vld [vmem:[%s9771_s2 + $0x28] sm:$0xff]  ;;  %6158 = vmatprep.subr.bf16.mxu1 %v7282_v42  ;;  %6318 = vmatprep.subr.bf16.mxu0 %v7282_v42 }
 0x23f   :  { %v7249_v44 = vadd.s32 %v653_v49, %v651_v33  ;;  %v7255_v9 = vsel %vm9789_vm14, 2147483647, %v6940_v35  ;;  %v34_v49 = vld [vmem:[%s9771_s2 + $0x18] sm:$0xff]  ;;  %6160 = vmatpush3.bf16.msra.mxu1 %v7282_v42  ;;  %6320 = vmatpush3.bf16.msra.mxu0 %v7282_v42 }
 0x240   :  { %v944_v11 = vshra.s32 %v7255_v9, 16 }
 0x241   :  { %9825 = vst [vmem:[#allocation25_spill] sm:$0xff] %v7249_v44  ;;  %vm9791_vm15 = vcmp.eq.s32.totalorder %v6944_v24, %v7249_v44  ;;  %v42_v44 = vld [vmem:[%s9771_s2 + $0x58] sm:$0xff] }
 0x242   :  { %v7264_v41 = vsel %vm9791_vm15, 2147483647, %v6944_v24  ;;  %v7266_v57 = vcvt.s32.f32 %v944_v11  ;;  %v7287_v11 = vpack.c.bf16 %v34_v49, %v33_v40  ;;  %v38_v40 = vld [vmem:[%s9771_s2 + $0x38] sm:$0xff]  ;;  %v747_v24 = vand.u32 65535, %v7059_v17 }
 0x243   :  { %v930_v33 = vshra.s32 %v7264_v41, 16  ;;  %v7312_v49 = vpack.c.bf16 %v38_v40, %v37_v8  ;;  %v733_v8 = vand.u32 65535, %v7050_v58  ;;  %v41_v40 = vld [vmem:[%s9771_s2 + $0x50] sm:$0xff] }
 0x244   :  { %947 = vmin.xlane.f32.xlu0 %v7266_v57  ;;  %6162 = vmatprep.subr.bf16.mxu1 %v7287_v11 }
 0x245   :  { %v7270_v47 = vcvt.s32.f32 %v930_v33  ;;  %v35_v33 = vld [vmem:[%s9771_s2 + $0x20] sm:$0xff]  ;;  %6322 = vmatprep.subr.bf16.mxu0 %v7287_v11  ;;  %6164 = vmatpush3.bf16.msra.mxu1 %v7287_v11  ;;  %v735_v59 = vcvt.s32.f32 %v733_v8  ;;  %v9851_v13 = vld [vmem:[#allocation24_spill] sm:$0xff] }
 0x246   :  { %v7300_v56 = vpack.c.bf16 %v36_v45, %v35_v33  ;;  %6324 = vmatpush3.bf16.msra.mxu0 %v7287_v11  ;;  %v39_v45 = vld [vmem:[%s9771_s2 + $0x40] sm:$0xff]  ;;  %v40_v33 = vld [vmem:[%s9771_s2 + $0x48] sm:$0xff] }
 0x247   :  { %933 = vmin.xlane.f32.xlu1 %v7270_v47  ;;  %v7324_v35 = vpack.c.bf16 %v40_v33, %v39_v45  ;;  %v7338_v45 = vpack.c.bf16 %v42_v44, %v41_v40  ;;  %v749_v44 = vcvt.s32.f32 %v747_v24  ;;  %v775_v40 = vand.u32 65535, %v7085_v60 }
 0x248   :  { %6166 = vmatprep.subr.bf16.mxu1 %v7300_v56  ;;  %6326 = vmatprep.subr.bf16.mxu0 %v7300_v56  ;;  %v763_v24 = vcvt.s32.f32 %v761_v22  ;;  %v789_v22 = vand.u32 65535, %v7114_v25 }
 0x249   :  { %6168 = vmatpush3.bf16.msra.mxu1 %v7300_v56 }
 0x24a   :  { %6328 = vmatpush3.bf16.msra.mxu0 %v7300_v56  ;;  %6170 = vmatprep.subr.bf16.mxu1 %v7312_v49 }
 0x24b   :  { %6330 = vmatprep.subr.bf16.mxu0 %v7312_v49 }
 0x24d   :  { %6172 = vmatpush3.bf16.msra.mxu1 %v7312_v49 }
 0x24e   :  { %6332 = vmatpush3.bf16.msra.mxu0 %v7312_v49  ;;  %6174 = vmatprep.subr.bf16.mxu1 %v7324_v35 }
 0x24f   :  { %6334 = vmatprep.subr.bf16.mxu0 %v7324_v35 }
 0x251   :  { %6176 = vmatpush3.bf16.msra.mxu1 %v7324_v35 }
 0x252   :  { %6336 = vmatpush3.bf16.msra.mxu0 %v7324_v35  ;;  %6178 = vmatprep.subr.bf16.mxu1 %v7338_v45 }
 0x253   :  { %6338 = vmatprep.subr.bf16.mxu0 %v7338_v45 }
 0x255   :  { %6180 = vmatpush3.bf16.msra.mxu1 %v7338_v45 }
 0x256   :  { %6340 = vmatpush3.bf16.msra.mxu0 %v7338_v45  ;;  %6182 = vmatprep.subr.bf16.mxu1 %v7360_v29 }
 0x257   :  { %6342 = vmatprep.subr.bf16.mxu0 %v7360_v29 }
 0x259   :  { %6184 = vmatpush3.bf16.msra.mxu1 %v7360_v29 }
 0x25a   :  { %6344 = vmatpush3.bf16.msra.mxu0 %v7360_v29 }
 0x26a   :  { %v7341_v33 = vpop.xlane.xlu1 %737 }
 0x26b   :  { %v7350_v15 = vpop.xlane.xlu0 %751  ;;  %vm739_vm14 = vcmp.eq.f32.partialorder %v7067_v2, %v7341_v33  ;;  %v777_v2 = vcvt.s32.f32 %v775_v40  ;;  %v791_v40 = vcvt.s32.f32 %v789_v22 }
 0x26c   :  { %v740_v53 = vsel %vm739_vm14, %v735_v59, inf  ;;  %vm753_vm15 = vcmp.eq.f32.partialorder %v7071_v5, %v7350_v15  ;;  %v803_v5 = vand.u32 65535, %v7104_v19 }
 0x26d   :  { %741 = vmin.xlane.f32.xlu1 %v740_v53  ;;  %v754_v8 = vsel %vm753_vm15, %v749_v44, inf }
 0x26e   :  { %v7362_v50 = vpop.xlane.xlu1 %765  ;;  %755 = vmin.xlane.f32.xlu0 %v754_v8  ;;  %v805_v43 = vcvt.s32.f32 %v803_v5  ;;  %v817_v5 = vand.u32 65535, %v7144_v52 }
 0x26f   :  { %v7365_v59 = vpop.xlane.xlu0 %779  ;;  %vm767_vm14 = vcmp.eq.f32.partialorder %v7091_v32, %v7362_v50 }
 0x270   :  { %v768_v53 = vsel %vm767_vm14, %v763_v24, inf  ;;  %vm781_vm15 = vcmp.eq.f32.partialorder %v7097_v6, %v7365_v59  ;;  %v45_v24 = vld [vmem:[%s9771_s2 + $0x70] sm:$0xff]  ;;  %v786_v61 = vcvt.f32.s32 %v7365_v59 }
 0x271   :  { %769 = vmin.xlane.f32.xlu1 %v768_v53  ;;  %v782_v12 = vsel %vm781_vm15, %v777_v2, inf }
 0x272   :  { %783 = vmin.xlane.f32.xlu0 %v782_v12 }
 0x273   :  { %v7377_v32 = vpop.xlane.xlu0 %807 }
 0x274   :  { %vm809_vm14 = vcmp.eq.f32.partialorder %v7116_v20, %v7377_v32  ;;  %v46_v20 = vld [vmem:[%s9771_s2 + $0x78] sm:$0xff] }
 0x275   :  { %v7383_v6 = vpop.xlane.xlu1 %793  ;;  %v810_v44 = vsel %vm809_vm14, %v805_v43, inf  ;;  %v7393_v2 = vpack.c.bf16 %v46_v20, %v45_v24  ;;  %v845_v24 = vand.u32 65535, %v7174_v28 }
 0x276   :  { %811 = vmin.xlane.f32.xlu0 %v810_v44  ;;  %vm795_vm15 = vcmp.eq.f32.partialorder %v7120_v23, %v7383_v6  ;;  %v831_v23 = vand.u32 65535, %v7135_v55  ;;  %v819_v44 = vcvt.s32.f32 %v817_v5  ;;  %v800_v59 = vcvt.f32.s32 %v7383_v6 }
 0x277   :  { %v796_v8 = vsel %vm795_vm15, %v791_v40, inf  ;;  %6186 = vmatprep.subr.bf16.mxu1 %v7393_v2  ;;  %6346 = vmatprep.subr.bf16.mxu0 %v7393_v2  ;;  %v847_v5 = vcvt.s32.f32 %v845_v24 }
 0x278   :  { %797 = vmin.xlane.f32.xlu1 %v796_v8  ;;  %6188 = vmatpush3.bf16.msra.mxu1 %v7393_v2  ;;  %v833_v12 = vcvt.s32.f32 %v831_v23  ;;  %v859_v8 = vand.u32 65535, %v7165_v48 }
 0x279   :  { %6348 = vmatpush3.bf16.msra.mxu0 %v7393_v2  ;;  %6190 = vmatprep.subr.bf16.mxu1 %v7282_v42 }
 0x27a   :  { %6350 = vmatprep.subr.bf16.mxu0 %v7282_v42  ;;  %v861_v23 = vcvt.s32.f32 %v859_v8 }
 0x285   :  { %v7403_v53 = vpop.xlane.xlu0 %835 }
 0x286   :  { %vm837_vm14 = vcmp.eq.f32.partialorder %v7146_v62, %v7403_v53 }
 0x287   :  { %v838_v22 = vsel %vm837_vm14, %v833_v12, inf }
 0x288   :  { %v7407_v43 = vpop.xlane.xlu1 %821  ;;  %839 = vmin.xlane.f32.xlu0 %v838_v22  ;;  %v887_v22 = vand.u32 65535, %v7195_v38 }
 0x289   :  { %vm823_vm15 = vcmp.eq.f32.partialorder %v7150_v54, %v7407_v43 }
 0x28a   :  { %v824_v40 = vsel %vm823_vm15, %v819_v44, inf  ;;  %v873_v44 = vand.u32 65535, %v7204_v34  ;;  %v889_v8 = vcvt.s32.f32 %v887_v22 }
 0x28b   :  { %825 = vmin.xlane.f32.xlu1 %v824_v40 }
 0x28c   :  { %v875_v24 = vcvt.s32.f32 %v873_v44 }
 0x298   :  { %v7413_v20 = vpop.xlane.xlu0 %863 }
 0x299   :  { %vm865_vm12 = vcmp.eq.f32.partialorder %v7176_v30, %v7413_v20 }
 0x29a   :  { %v866_v62 = vsel %vm865_vm12, %v861_v23, inf }
 0x29b   :  { %v7417_v12 = vpop.xlane.xlu1 %849  ;;  %867 = vmin.xlane.f32.xlu0 %v866_v62  ;;  %v915_v62 = vand.u32 65535, %v7225_v37 }
 0x29c   :  { %vm851_vm14 = vcmp.eq.f32.partialorder %v7180_v46, %v7417_v12 }
 0x29d   :  { %v852_v54 = vsel %vm851_vm14, %v847_v5, inf  ;;  %v901_v5 = vand.u32 65535, %v7234_v14  ;;  %v917_v22 = vcvt.s32.f32 %v915_v62 }
 0x29e   :  { %853 = vmin.xlane.f32.xlu1 %v852_v54 }
 0x29f   :  { %v903_v44 = vcvt.s32.f32 %v901_v5 }
 0x2ab   :  { %v7423_v40 = vpop.xlane.xlu0 %891 }
 0x2ac   :  { %vm893_vm15 = vcmp.eq.f32.partialorder %v7206_v7, %v7423_v40 }
 0x2ad   :  { %v894_v30 = vsel %vm893_vm15, %v889_v8, inf }
 0x2ae   :  { %v7427_v23 = vpop.xlane.xlu1 %877  ;;  %895 = vmin.xlane.f32.xlu0 %v894_v30  ;;  %v943_v30 = vand.u32 65535, %v7255_v9 }
 0x2af   :  { %vm879_vm12 = vcmp.eq.f32.partialorder %v7210_v3, %v7427_v23 }
 0x2b0   :  { %v880_v46 = vsel %vm879_vm12, %v875_v24, inf  ;;  %v929_v24 = vand.u32 65535, %v7264_v41  ;;  %v945_v62 = vcvt.s32.f32 %v943_v30  ;;  %v772_v30 = vcvt.f32.s32 %v7362_v50 }
 0x2b1   :  { %881 = vmin.xlane.f32.xlu1 %v880_v46 }
 0x2b2   :  { %v931_v5 = vcvt.s32.f32 %v929_v24 }
 0x2be   :  { %v7433_v54 = vpop.xlane.xlu0 %919 }
 0x2bf   :  { %vm921_vm14 = vcmp.eq.f32.partialorder %v7236_v18, %v7433_v54 }
 0x2c0   :  { %v922_v7 = vsel %vm921_vm14, %v917_v22, inf }
 0x2c1   :  { %v7437_v8 = vpop.xlane.xlu1 %905  ;;  %923 = vmin.xlane.f32.xlu0 %v922_v7  ;;  %v744_v7 = vcvt.f32.s32 %v7341_v33 }
 0x2c2   :  { %vm907_vm15 = vcmp.eq.f32.partialorder %v7240_v4, %v7437_v8 }
 0x2c3   :  { %v908_v3 = vsel %vm907_vm15, %v903_v44, inf  ;;  %v758_v44 = vcvt.f32.s32 %v7350_v15  ;;  %v745_v36 = vshll.u32 %v744_v7, 16  ;;  %v787_v15 = vshll.u32 %v786_v61, 16 }
 0x2c4   :  { %909 = vmin.xlane.f32.xlu1 %v908_v3 }
 0x2d1   :  { %v7443_v46 = vpop.xlane.xlu0 %947 }
 0x2d2   :  { %vm949_vm12 = vcmp.eq.f32.partialorder %v7266_v57, %v7443_v46 }
 0x2d3   :  { %v950_v18 = vsel %vm949_vm12, %v945_v62, inf  ;;  %v759_v62 = vshll.u32 %v758_v44, 16 }
 0x2d4   :  { %v7447_v22 = vpop.xlane.xlu1 %933  ;;  %951 = vmin.xlane.f32.xlu0 %v950_v18 }
 0x2d5   :  { %vm935_vm14 = vcmp.eq.f32.partialorder %v7270_v47, %v7447_v22  ;;  %v773_v47 = vshll.u32 %v772_v30, 16 }
 0x2d6   :  { %v936_v4 = vsel %vm935_vm14, %v931_v5, inf  ;;  %v814_v5 = vcvt.f32.s32 %v7377_v32 }
 0x2d7   :  { %937 = vmin.xlane.f32.xlu1 %v936_v4 }
 0x2fa   :  { %v742_v3 = vpop.xlane.xlu1 %741 }
 0x2fb   :  { %v743_v63 = vcvt.f32.s32 %v742_v3  ;;  %v756_v57 = vpop.xlane.xlu0 %755  ;;  %v9800_v3 = vmov 1.0  }
 0x2fc   :  { %v757_v18 = vcvt.f32.s32 %v756_v57 }
 0x2fd   :  { %v746_v24 = vadd.s32 %v745_v36, %v743_v63 }
 0x2fe   :  { %v760_v16 = vadd.s32 %v759_v62, %v757_v18  ;;  %v770_v0 = vpop.xlane.xlu1 %769 }
 0x2ff   :  { %v771_v4 = vcvt.f32.s32 %v770_v0  ;;  %v784_v33 = vpop.xlane.xlu0 %783  ;;  %vm957_vm15 = vcmp.eq.s32.totalorder %v7050_v58, %v746_v24  ;;  %v801_v24 = vshll.u32 %v800_v59, 16 }
 0x300   :  { %v785_v7 = vcvt.f32.s32 %v784_v33  ;;  %v7458_v50 = vsel %vm957_vm15, 2147483647, %v7050_v58  ;;  %5629 = vmatprep.mubr.msk.f32.mxu1 %vm957_vm15, %v9800_v3  ;;  %vm958_vm12 = vcmp.eq.s32.totalorder %v7059_v17, %v760_v16  ;;  %v815_v58 = vshll.u32 %v814_v5, 16 }
 0x301   :  { %v774_v36 = vadd.s32 %v773_v47, %v771_v4  ;;  %v7463_v63 = vsel %vm958_vm12, 2147483647, %v7059_v17  ;;  %5630 = vmatmul.mubr.msk.f32.vlgmr.msra.gmra.mrb[0].mxu1 %vm958_vm12, %v9800_v3  ;;  %v1312_v0 = vshra.s32 %v7458_v50, 16  ;;  %v1311_v39 = vand.u32 65535, %v7458_v50 }
 0x302   :  { %v788_v61 = vadd.s32 %v787_v15, %v785_v7  ;;  %v1326_v32 = vshra.s32 %v7463_v63, 16  ;;  %6192 = vmatpush3.bf16.msra.mxu1 %v7282_v42  ;;  %v1325_v26 = vand.u32 65535, %v7463_v63 }
 0x303   :  { %v812_v44 = vpop.xlane.xlu0 %811  ;;  %vm959_vm14 = vcmp.eq.s32.totalorder %v7077_v10, %v774_v36  ;;  %v7471_v16 = vcvt.s32.f32 %v1312_v0  ;;  %6194 = vmatprep.subr.bf16.mxu1 %v7287_v11  ;;  %v1313_v27 = vcvt.s32.f32 %v1311_v39 }
 0x304   :  { %v813_v17 = vcvt.f32.s32 %v812_v44  ;;  %v7475_v30 = vsel %vm959_vm14, 2147483647, %v7077_v10  ;;  %5632 = vmatprep.mubr.msk.f32.mxu1 %vm959_vm14, %v9800_v3  ;;  %vm960_vm15 = vcmp.eq.s32.totalorder %v7085_v60, %v788_v61  ;;  %v7479_v6 = vcvt.s32.f32 %v1326_v32 }
 0x305   :  { %1315 = vmin.xlane.f32.xlu1 %v7471_v16  ;;  %v798_v57 = vpop.xlane.xlu1 %797  ;;  %v7483_v62 = vsel %vm960_vm15, 2147483647, %v7085_v60  ;;  %5633 = vmatmul.mubr.msk.f32.gmra.mrb[2].mxu1 %vm960_vm15, %v9800_v3  ;;  %v1340_v18 = vshra.s32 %v7475_v30, 16  ;;  %v828_v61 = vcvt.f32.s32 %v7407_v43  ;;  %v1339_v1 = vand.u32 65535, %v7475_v30 }
 0x306   :  { %v816_v47 = vadd.s32 %v815_v58, %v813_v17  ;;  %v799_v10 = vcvt.f32.s32 %v798_v57  ;;  %1329 = vmin.xlane.f32.xlu0 %v7479_v6  ;;  %v1354_v5 = vshra.s32 %v7483_v62, 16  ;;  %6196 = vmatpush3.bf16.msra.mxu1 %v7287_v11  ;;  %v1327_v21 = vcvt.s32.f32 %v1325_v26 }
 0x307   :  { %v7490_v4 = vcvt.s32.f32 %v1340_v18  ;;  %6198 = vmatprep.subr.bf16.mxu1 %v7300_v56  ;;  %v829_v18 = vshll.u32 %v828_v61, 16 }
 0x308   :  { %v802_v33 = vadd.s32 %v801_v24, %v799_v10  ;;  %v7493_v60 = vcvt.s32.f32 %v1354_v5  ;;  %vm962_vm12 = vcmp.eq.s32.totalorder %v7104_v19, %v816_v47 }
 0x309   :  { %1343 = vmin.xlane.f32.xlu1 %v7490_v4  ;;  %v7498_v15 = vsel %vm962_vm12, 2147483647, %v7104_v19 }
 0x30a   :  { %1357 = vmin.xlane.f32.xlu0 %v7493_v60  ;;  %vm961_vm14 = vcmp.eq.s32.totalorder %v7114_v25, %v802_v33  ;;  %v1382_v7 = vshra.s32 %v7498_v15, 16  ;;  %6200 = vmatpush3.bf16.msra.mxu1 %v7300_v56 }
 0x30b   :  { %v7505_v36 = vsel %vm961_vm14, 2147483647, %v7114_v25  ;;  %5635 = vmatprep.mubr.msk.f32.mxu1 %vm961_vm14, %v9800_v3  ;;  %6202 = vmatprep.subr.bf16.mxu1 %v7312_v49  ;;  %v842_v25 = vcvt.f32.s32 %v7403_v53 }
 0x30c   :  { %5636 = vmatmul.mubr.msk.f32.gmra.mrb[4].mxu1 %vm962_vm12, %v9800_v3  ;;  %v7510_v0 = vcvt.s32.f32 %v1382_v7  ;;  %v1368_v19 = vshra.s32 %v7505_v36, 16  ;;  %v856_v7 = vcvt.f32.s32 %v7417_v12 }
 0x30d   :  { %v843_v58 = vshll.u32 %v842_v25, 16 }
 0x30e   :  { %1385 = vmin.xlane.f32.xlu0 %v7510_v0  ;;  %v7514_v59 = vcvt.s32.f32 %v1368_v19  ;;  %6204 = vmatpush3.bf16.msra.mxu1 %v7312_v49 }
 0x30f   :  { %6206 = vmatprep.subr.bf16.mxu1 %v7324_v35 }
 0x310   :  { %1371 = vmin.xlane.f32.xlu1 %v7514_v59 }
 0x312   :  { %6208 = vmatpush3.bf16.msra.mxu1 %v7324_v35 }
 0x313   :  { %6210 = vmatprep.subr.bf16.mxu1 %v7338_v45 }
 0x315   :  { %v840_v32 = vpop.xlane.xlu0 %839 }
 0x316   :  { %v841_v44 = vcvt.f32.s32 %v840_v32  ;;  %6212 = vmatpush3.bf16.msra.mxu1 %v7338_v45 }
 0x317   :  { %6214 = vmatprep.subr.bf16.mxu1 %v7360_v29 }
 0x318   :  { %v844_v17 = vadd.s32 %v843_v58, %v841_v44  ;;  %v826_v57 = vpop.xlane.xlu1 %825  ;;  %v857_v44 = vshll.u32 %v856_v7, 16 }
 0x319   :  { %v827_v24 = vcvt.f32.s32 %v826_v57 }
 0x31a   :  { %vm964_vm15 = vcmp.eq.s32.totalorder %v7135_v55, %v844_v17  ;;  %6216 = vmatpush3.bf16.msra.mxu1 %v7360_v29 }
 0x31b   :  { %v830_v53 = vadd.s32 %v829_v18, %v827_v24  ;;  %v7528_v47 = vsel %vm964_vm15, 2147483647, %v7135_v55  ;;  %6218 = vmatprep.subr.bf16.mxu1 %v7393_v2 }
 0x31c   :  { %v1410_v43 = vshra.s32 %v7528_v47, 16 }
 0x31d   :  { %vm963_vm12 = vcmp.eq.s32.totalorder %v7144_v52, %v830_v53 }
 0x31e   :  { %v7534_v10 = vsel %vm963_vm12, 2147483647, %v7144_v52  ;;  %5638 = vmatprep.mubr.msk.f32.mxu1 %vm963_vm12, %v9800_v3  ;;  %v7537_v5 = vcvt.s32.f32 %v1410_v43  ;;  %6220 = vmatpush3.bf16.msra.mxu1 %v7393_v2  ;;  %v870_v52 = vcvt.f32.s32 %v7413_v20 }
 0x31f   :  { %5639 = vmatmul.mubr.msk.f32.gmra.mrb[6].mxu1 %vm964_vm15, %v9800_v3  ;;  %v1396_v55 = vshra.s32 %v7534_v10, 16  ;;  %6222 = vmatprep.subr.bf16.mxu1 %v7282_v42 }
 0x320   :  { %1413 = vmin.xlane.f32.xlu0 %v7537_v5  ;;  %v871_v25 = vshll.u32 %v870_v52, 16 }
 0x321   :  { %v7544_v33 = vcvt.s32.f32 %v1396_v55  ;;  %v884_v55 = vcvt.f32.s32 %v7427_v23 }
 0x323   :  { %1399 = vmin.xlane.f32.xlu1 %v7544_v33 }
 0x328   :  { %v868_v19 = vpop.xlane.xlu0 %867 }
 0x329   :  { %v869_v61 = vcvt.f32.s32 %v868_v19 }
 0x32b   :  { %v872_v32 = vadd.s32 %v871_v25, %v869_v61  ;;  %v854_v58 = vpop.xlane.xlu1 %853  ;;  %v885_v61 = vshll.u32 %v884_v55, 16 }
 0x32c   :  { %v855_v17 = vcvt.f32.s32 %v854_v58 }
 0x32d   :  { %vm966_vm14 = vcmp.eq.s32.totalorder %v7165_v48, %v872_v32 }
 0x32e   :  { %v858_v57 = vadd.s32 %v857_v44, %v855_v17  ;;  %v7551_v18 = vsel %vm966_vm14, 2147483647, %v7165_v48  ;;  %v898_v48 = vcvt.f32.s32 %v7423_v40 }
 0x32f   :  { %v1438_v24 = vshra.s32 %v7551_v18, 16 }
 0x330   :  { %vm965_vm15 = vcmp.eq.s32.totalorder %v7174_v28, %v858_v57  ;;  %v899_v52 = vshll.u32 %v898_v48, 16 }
 0x331   :  { %v7556_v20 = vsel %vm965_vm15, 2147483647, %v7174_v28  ;;  %5641 = vmatprep.mubr.msk.f32.mxu1 %vm965_vm15, %v9800_v3  ;;  %v7559_v12 = vcvt.s32.f32 %v1438_v24 }
 0x332   :  { %5642 = vmatmul.mubr.msk.f32.gmra.mrb[8].mxu1 %vm966_vm14, %v9800_v3  ;;  %v1424_v53 = vshra.s32 %v7556_v20, 16 }
 0x333   :  { %1441 = vmin.xlane.f32.xlu0 %v7559_v12 }
 0x334   :  { %v7564_v43 = vcvt.s32.f32 %v1424_v53  ;;  %v912_v53 = vcvt.f32.s32 %v7437_v8 }
 0x336   :  { %1427 = vmin.xlane.f32.xlu1 %v7564_v43 }
 0x33b   :  { %v896_v28 = vpop.xlane.xlu0 %895 }
 0x33c   :  { %v897_v7 = vcvt.f32.s32 %v896_v28 }
 0x33e   :  { %v900_v19 = vadd.s32 %v899_v52, %v897_v7  ;;  %v882_v25 = vpop.xlane.xlu1 %881  ;;  %v913_v7 = vshll.u32 %v912_v53, 16 }
 0x33f   :  { %v883_v32 = vcvt.f32.s32 %v882_v25 }
 0x340   :  { %vm968_vm12 = vcmp.eq.s32.totalorder %v7195_v38, %v900_v19 }
 0x341   :  { %v886_v58 = vadd.s32 %v885_v61, %v883_v32  ;;  %v7571_v44 = vsel %vm968_vm12, 2147483647, %v7195_v38  ;;  %v926_v38 = vcvt.f32.s32 %v7433_v54 }
 0x342   :  { %v1466_v17 = vshra.s32 %v7571_v44, 16 }
 0x343   :  { %vm967_vm14 = vcmp.eq.s32.totalorder %v7204_v34, %v886_v58  ;;  %v927_v48 = vshll.u32 %v926_v38, 16 }
 0x344   :  { %v7576_v40 = vsel %vm967_vm14, 2147483647, %v7204_v34  ;;  %5644 = vmatprep.mubr.msk.f32.mxu1 %vm967_vm14, %v9800_v3  ;;  %v7579_v23 = vcvt.s32.f32 %v1466_v17 }
 0x345   :  { %5645 = vmatmul.mubr.msk.f32.gmra.mrb[10].mxu1 %vm968_vm12, %v9800_v3  ;;  %v1452_v57 = vshra.s32 %v7576_v40, 16 }
 0x346   :  { %1469 = vmin.xlane.f32.xlu0 %v7579_v23 }
 0x347   :  { %v7584_v24 = vcvt.s32.f32 %v1452_v57  ;;  %v940_v57 = vcvt.f32.s32 %v7447_v22 }
 0x349   :  { %1455 = vmin.xlane.f32.xlu1 %v7584_v24 }
 0x34e   :  { %v924_v34 = vpop.xlane.xlu0 %923 }
 0x34f   :  { %v925_v55 = vcvt.f32.s32 %v924_v34 }
 0x351   :  { %v928_v28 = vadd.s32 %v927_v48, %v925_v55  ;;  %v910_v52 = vpop.xlane.xlu1 %909  ;;  %v941_v55 = vshll.u32 %v940_v57, 16  ;;  %v1341_v57 = vcvt.s32.f32 %v1339_v1  ;;  %v1437_v1 = vand.u32 65535, %v7551_v18 }
 0x352   :  { %v911_v19 = vcvt.f32.s32 %v910_v52 }
 0x353   :  { %vm970_vm15 = vcmp.eq.s32.totalorder %v7225_v37, %v928_v28 }
 0x354   :  { %v914_v25 = vadd.s32 %v913_v7, %v911_v19  ;;  %v7591_v61 = vsel %vm970_vm15, 2147483647, %v7225_v37  ;;  %v954_v37 = vcvt.f32.s32 %v7443_v46 }
 0x355   :  { %v1494_v32 = vshra.s32 %v7591_v61, 16 }
 0x356   :  { %vm969_vm12 = vcmp.eq.s32.totalorder %v7234_v14, %v914_v25  ;;  %v955_v38 = vshll.u32 %v954_v37, 16 }
 0x357   :  { %v7596_v54 = vsel %vm969_vm12, 2147483647, %v7234_v14  ;;  %5647 = vmatprep.mubr.msk.f32.mxu1 %vm969_vm12, %v9800_v3  ;;  %v7599_v8 = vcvt.s32.f32 %v1494_v32 }
 0x358   :  { %5648 = vmatmul.mubr.msk.f32.gmra.mrb[12].mxu1 %vm970_vm15, %v9800_v3  ;;  %v1480_v58 = vshra.s32 %v7596_v54, 16 }
 0x359   :  { %1497 = vmin.xlane.f32.xlu0 %v7599_v8 }
 0x35a   :  { %v7604_v17 = vcvt.s32.f32 %v1480_v58 }
 0x35c   :  { %1483 = vmin.xlane.f32.xlu1 %v7604_v17 }
 0x361   :  { %v952_v14 = vpop.xlane.xlu0 %951 }
 0x362   :  { %v953_v53 = vcvt.f32.s32 %v952_v14 }
 0x364   :  { %v956_v34 = vadd.s32 %v955_v38, %v953_v53  ;;  %v938_v48 = vpop.xlane.xlu1 %937 }
 0x365   :  { %v939_v28 = vcvt.f32.s32 %v938_v48 }
 0x366   :  { %vm972_vm14 = vcmp.eq.s32.totalorder %v7255_v9, %v956_v34  ;;  %v1367_v34 = vand.u32 65535, %v7505_v36 }
 0x367   :  { %v942_v52 = vadd.s32 %v941_v55, %v939_v28  ;;  %v7611_v7 = vsel %vm972_vm14, 2147483647, %v7255_v9  ;;  %v9844_v55 = vld [vmem:[#allocation10_spill] sm:$0xff] }
 0x368   :  { %v1522_v19 = vshra.s32 %v7611_v7, 16  ;;  %v9845_v28 = vld [vmem:[#allocation22_spill] sm:$0xff] }
 0x369   :  { %vm971_vm15 = vcmp.eq.s32.totalorder %v7264_v41, %v942_v52  ;;  %v9847_v52 = vld [vmem:[#allocation13_spill] sm:$0xff] }
 0x36a   :  { %v7616_v46 = vsel %vm971_vm15, 2147483647, %v7264_v41  ;;  %5650 = vmatprep.mubr.msk.f32.mxu1 %vm971_vm15, %v9800_v3  ;;  %v7619_v22 = vcvt.s32.f32 %v1522_v19  ;;  %v9848_v19 = vld [vmem:[#allocation25_spill] sm:$0xff]  ;;  %v1353_v41 = vand.u32 65535, %v7483_v62 }
 0x36b   :  { %5651 = vmatmul.mubr.msk.f32.gmra.mrb[14].mxu1 %vm972_vm14, %v9800_v3  ;;  %v1508_v25 = vshra.s32 %v7616_v46, 16 }
 0x36c   :  { %5685 = vmatprep.mubr.msk.f32.mxu1 %vm669_vm0, %v9800_v3  ;;  %1525 = vmin.xlane.f32.xlu0 %v7619_v22  ;;  %vm9846_vm0 = vcmp.eq.s32.totalorder %v9844_v55, %v9845_v28  ;;  %v1355_v38 = vcvt.s32.f32 %v1353_v41 }
 0x36d   :  { %v7628_v9 = vcvt.s32.f32 %v1508_v25  ;;  %v9850_v25 = vld [vmem:[#allocation12_spill] sm:$0xff] }
 0x36f   :  { %1511 = vmin.xlane.f32.xlu1 %v7628_v9  ;;  %5686 = vmatmul.mubr.msk.f32.vlgmr.msra.gmra.mrb[0].mxu1 %vm670_vm1, %v9800_v3  ;;  %vm9849_vm1 = vcmp.eq.s32.totalorder %v9847_v52, %v9848_v19  ;;  %v1369_v52 = vcvt.s32.f32 %v1367_v34  ;;  %v1409_v19 = vand.u32 65535, %v7528_v47 }
 0x370   :  { %5688 = vmatprep.mubr.msk.f32.mxu1 %vm671_vm2, %v9800_v3  ;;  %6224 = vmatpush3.bf16.msra.mxu1 %v7282_v42  ;;  %vm9852_vm2 = vcmp.eq.s32.totalorder %v9850_v25, %v9851_v13  ;;  %v1395_v25 = vand.u32 65535, %v7534_v10 }
 0x371   :  { %6226 = vmatprep.subr.bf16.mxu1 %v7287_v11  ;;  %v1411_v39 = vcvt.s32.f32 %v1409_v19 }
 0x373   :  { %5689 = vmatmul.mubr.msk.f32.gmra.mrb[2].mxu1 %vm672_vm3, %v9800_v3 }
 0x374   :  { %5691 = vmatprep.mubr.msk.f32.mxu1 %vm673_vm5, %v9800_v3  ;;  %6228 = vmatpush3.bf16.msra.mxu1 %v7287_v11 }
 0x375   :  { %6230 = vmatprep.subr.bf16.mxu1 %v7300_v56 }
 0x377   :  { %5692 = vmatmul.mubr.msk.f32.gmra.mrb[4].mxu1 %vm674_vm4, %v9800_v3 }
 0x378   :  { %5694 = vmatprep.mubr.msk.f32.mxu1 %vm675_vm7, %v9800_v3  ;;  %6232 = vmatpush3.bf16.msra.mxu1 %v7300_v56 }
 0x379   :  { %6234 = vmatprep.subr.bf16.mxu1 %v7312_v49 }
 0x37b   :  { %5695 = vmatmul.mubr.msk.f32.gmra.mrb[6].mxu1 %vm676_vm6, %v9800_v3 }
 0x37c   :  { %5697 = vmatprep.mubr.msk.f32.mxu1 %vm677_vm9, %v9800_v3  ;;  %6236 = vmatpush3.bf16.msra.mxu1 %v7312_v49 }
 0x37d   :  { %6238 = vmatprep.subr.bf16.mxu1 %v7324_v35 }
 0x37f   :  { %5698 = vmatmul.mubr.msk.f32.gmra.mrb[8].mxu1 %vm678_vm8, %v9800_v3 }
 0x380   :  { %5700 = vmatprep.mubr.msk.f32.mxu1 %vm679_vm11, %v9800_v3  ;;  %6240 = vmatpush3.bf16.msra.mxu1 %v7324_v35 }
 0x381   :  { %6242 = vmatprep.subr.bf16.mxu1 %v7338_v45 }
 0x383   :  { %5701 = vmatmul.mubr.msk.f32.gmra.mrb[10].mxu1 %vm680_vm10, %v9800_v3 }
 0x384   :  { %5703 = vmatprep.mubr.msk.f32.mxu1 %vm681_vm13, %v9800_v3  ;;  %6244 = vmatpush3.bf16.msra.mxu1 %v7338_v45 }
 0x385   :  { %6246 = vmatprep.subr.bf16.mxu1 %v7360_v29 }
 0x387   :  { %5704 = vmatmul.mubr.msk.f32.gmra.mrb[12].mxu1 %vm9846_vm0, %v9800_v3 }
 0x388   :  { %5706 = vmatprep.mubr.msk.f32.mxu1 %vm9849_vm1, %v9800_v3  ;;  %6248 = vmatpush3.bf16.msra.mxu1 %v7360_v29 }
 0x389   :  { %6250 = vmatprep.subr.bf16.mxu1 %v7393_v2 }
 0x38b   :  { %5707 = vmatmul.mubr.msk.f32.gmra.mrb[14].mxu1 %vm9852_vm2, %v9800_v3 }
 0x38c   :  { %6252 = vmatpush3.bf16.msra.mxu1 %v7393_v2 }
 0x38d   :  { %6254 = vmatprep.subr.bf16.mxu1 %v7282_v42 }
 0x392   :  { %v7709_v31 = vpop.xlane.xlu1 %1315 }
 0x393   :  { %v7712_v51 = vpop.xlane.xlu0 %1329  ;;  %vm1317_vm3 = vcmp.eq.f32.partialorder %v7471_v16, %v7709_v31  ;;  %v1381_v16 = vand.u32 65535, %v7498_v15 }
 0x394   :  { %v1318_v32 = vsel %vm1317_vm3, %v1313_v27, inf  ;;  %vm1331_vm4 = vcmp.eq.f32.partialorder %v7479_v6, %v7712_v51  ;;  %v1397_v27 = vcvt.s32.f32 %v1395_v25 }
 0x395   :  { %1319 = vmin.xlane.f32.xlu1 %v1318_v32  ;;  %v1332_v58 = vsel %vm1331_vm4, %v1327_v21, inf  ;;  %v1383_v55 = vcvt.s32.f32 %v1381_v16  ;;  %v1423_v21 = vand.u32 65535, %v7556_v20  ;;  %v1439_v32 = vcvt.s32.f32 %v1437_v1 }
 0x396   :  { %v7719_v37 = vpop.xlane.xlu1 %1343  ;;  %1333 = vmin.xlane.f32.xlu0 %v1332_v58  ;;  %v1451_v16 = vand.u32 65535, %v7576_v40 }
 0x397   :  { %v7721_v14 = vpop.xlane.xlu0 %1357  ;;  %vm1345_vm5 = vcmp.eq.f32.partialorder %v7490_v4, %v7719_v37 }
 0x398   :  { %v1346_v53 = vsel %vm1345_vm5, %v1341_v57, inf  ;;  %vm1359_vm6 = vcmp.eq.f32.partialorder %v7493_v60, %v7721_v14  ;;  %v1425_v57 = vcvt.s32.f32 %v1423_v21 }
 0x399   :  { %1347 = vmin.xlane.f32.xlu1 %v1346_v53  ;;  %v1360_v6 = vsel %vm1359_vm6, %v1355_v38, inf  ;;  %v1465_v38 = vand.u32 65535, %v7571_v44 }
 0x39a   :  { %1361 = vmin.xlane.f32.xlu0 %v1360_v6 }
 0x39b   :  { %v7729_v48 = vpop.xlane.xlu0 %1385  ;;  %v1467_v6 = vcvt.s32.f32 %v1465_v38 }
 0x39c   :  { %vm1387_vm7 = vcmp.eq.f32.partialorder %v7510_v0, %v7729_v48 }
 0x39d   :  { %v7733_v28 = vpop.xlane.xlu1 %1371  ;;  %v1388_v4 = vsel %vm1387_vm7, %v1383_v55, inf  ;;  %v1453_v55 = vcvt.s32.f32 %v1451_v16  ;;  %v1350_v16 = vcvt.f32.s32 %v7719_v37 }
 0x39e   :  { %1389 = vmin.xlane.f32.xlu0 %v1388_v4  ;;  %vm1373_vm8 = vcmp.eq.f32.partialorder %v7514_v59, %v7733_v28  ;;  %v1493_v4 = vand.u32 65535, %v7591_v61 }
 0x39f   :  { %v1374_v60 = vsel %vm1373_vm8, %v1369_v52, inf  ;;  %v1479_v52 = vand.u32 65535, %v7596_v54 }
 0x3a0   :  { %1375 = vmin.xlane.f32.xlu1 %v1374_v60  ;;  %v1495_v19 = vcvt.s32.f32 %v1493_v4 }
 0x3ad   :  { %v7739_v13 = vpop.xlane.xlu0 %1413 }
 0x3ae   :  { %vm1415_vm9 = vcmp.eq.f32.partialorder %v7537_v5, %v7739_v13 }
 0x3af   :  { %v1416_v0 = vsel %vm1415_vm9, %v1411_v39, inf  ;;  %v1481_v39 = vcvt.s32.f32 %v1479_v52 }
 0x3b0   :  { %v7743_v26 = vpop.xlane.xlu1 %1399  ;;  %1417 = vmin.xlane.f32.xlu0 %v1416_v0  ;;  %v1521_v0 = vand.u32 65535, %v7611_v7 }
 0x3b1   :  { %vm1401_vm10 = vcmp.eq.f32.partialorder %v7544_v33, %v7743_v26 }
 0x3b2   :  { %v1402_v59 = vsel %vm1401_vm10, %v1397_v27, inf  ;;  %v1507_v27 = vand.u32 65535, %v7616_v46  ;;  %v1523_v1 = vcvt.s32.f32 %v1521_v0 }
 0x3b3   :  { %1403 = vmin.xlane.f32.xlu1 %v1402_v59 }
 0x3c0   :  { %v7749_v41 = vpop.xlane.xlu0 %1441 }
 0x3c1   :  { %vm1443_vm11 = vcmp.eq.f32.partialorder %v7559_v12, %v7749_v41 }
 0x3c2   :  { %v1444_v5 = vsel %vm1443_vm11, %v1439_v32, inf  ;;  %v1509_v32 = vcvt.s32.f32 %v1507_v27  ;;  %v1378_v27 = vcvt.f32.s32 %v7733_v28 }
 0x3c3   :  { %v7753_v58 = vpop.xlane.xlu1 %1427  ;;  %1445 = vmin.xlane.f32.xlu0 %v1444_v5  ;;  %v1322_v5 = vcvt.f32.s32 %v7709_v31 }
 0x3c4   :  { %vm1429_vm13 = vcmp.eq.f32.partialorder %v7564_v43, %v7753_v58 }
 0x3c5   :  { %v1430_v33 = vsel %vm1429_vm13, %v1425_v57, inf  ;;  %v1336_v57 = vcvt.f32.s32 %v7712_v51  ;;  %v1323_v38 = vshll.u32 %v1322_v5, 16 }
 0x3c6   :  { %1431 = vmin.xlane.f32.xlu1 %v1430_v33 }
 0x3d3   :  { %v7759_v53 = vpop.xlane.xlu0 %1469 }
 0x3d4   :  { %vm1471_vm12 = vcmp.eq.f32.partialorder %v7579_v23, %v7759_v53 }
 0x3d5   :  { %v1472_v12 = vsel %vm1471_vm12, %v1467_v6, inf }
 0x3d6   :  { %v7763_v34 = vpop.xlane.xlu1 %1455  ;;  %1473 = vmin.xlane.f32.xlu0 %v1472_v12  ;;  %v1337_v12 = vshll.u32 %v1336_v57, 16 }
 0x3d7   :  { %vm1457_vm14 = vcmp.eq.f32.partialorder %v7584_v24, %v7763_v34 }
 0x3d8   :  { %v1458_v43 = vsel %vm1457_vm14, %v1453_v55, inf  ;;  %v1364_v55 = vcvt.f32.s32 %v7721_v14 }
 0x3d9   :  { %1459 = vmin.xlane.f32.xlu1 %v1458_v43 }
 0x3da   :  { %v1365_v51 = vshll.u32 %v1364_v55, 16 }
 0x3e6   :  { %v7769_v60 = vpop.xlane.xlu0 %1497 }
 0x3e7   :  { %vm1499_vm15 = vcmp.eq.f32.partialorder %v7599_v8, %v7769_v60 }
 0x3e8   :  { %v1500_v23 = vsel %vm1499_vm15, %v1495_v19, inf }
 0x3e9   :  { %v7773_v25 = vpop.xlane.xlu1 %1483  ;;  %1501 = vmin.xlane.f32.xlu0 %v1500_v23  ;;  %v1392_v23 = vcvt.f32.s32 %v7729_v48 }
 0x3ea   :  { %vm1485_vm0 = vcmp.eq.f32.partialorder %v7604_v17, %v7773_v25 }
 0x3eb   :  { %v1486_v24 = vsel %vm1485_vm0, %v1481_v39, inf }
 0x3ec   :  { %1487 = vmin.xlane.f32.xlu1 %v1486_v24 }
 0x3f9   :  { %v7779_v59 = vpop.xlane.xlu0 %1525 }
 0x3fa   :  { %vm1527_vm1 = vcmp.eq.f32.partialorder %v7619_v22, %v7779_v59 }
 0x3fb   :  { %v1528_v8 = vsel %vm1527_vm1, %v1523_v1, inf }
 0x3fc   :  { %v7783_v21 = vpop.xlane.xlu1 %1511  ;;  %1529 = vmin.xlane.f32.xlu0 %v1528_v8 }
 0x3fd   :  { %vm1513_vm2 = vcmp.eq.f32.partialorder %v7628_v9, %v7783_v21  ;;  %v1351_v9 = vshll.u32 %v1350_v16, 16  ;;  %v1379_v16 = vshll.u32 %v1378_v27, 16 }
 0x3fe   :  { %v1514_v17 = vsel %vm1513_vm2, %v1509_v32, inf  ;;  %v1393_v32 = vshll.u32 %v1392_v23, 16  ;;  %v1406_v23 = vcvt.f32.s32 %v7743_v26 }
 0x3ff   :  { %1515 = vmin.xlane.f32.xlu1 %v1514_v17 }
 0x422   :  { %v1320_v33 = vpop.xlane.xlu1 %1319 }
 0x423   :  { %v1321_v6 = vcvt.f32.s32 %v1320_v33  ;;  %v1334_v22 = vpop.xlane.xlu0 %1333 }
 0x424   :  { %v1335_v43 = vcvt.f32.s32 %v1334_v22 }
 0x425   :  { %v1324_v4 = vadd.s32 %v1323_v38, %v1321_v6 }
 0x426   :  { %v1338_v52 = vadd.s32 %v1337_v12, %v1335_v43  ;;  %v1348_v19 = vpop.xlane.xlu1 %1347 }
 0x427   :  { %v1349_v39 = vcvt.f32.s32 %v1348_v19  ;;  %v1362_v31 = vpop.xlane.xlu0 %1361  ;;  %vm1535_vm3 = vcmp.eq.s32.totalorder %v7458_v50, %v1324_v4 }
 0x428   :  { %vm1536_vm4 = vcmp.eq.s32.totalorder %v7463_v63, %v1338_v52  ;;  %v1363_v37 = vcvt.f32.s32 %v1362_v31  ;;  %v7795_v24 = vsel %vm1535_vm3, 2147483647, %v7458_v50  ;;  %5741 = vmatprep.mubr.msk.f32.mxu1 %vm1535_vm3, %v9800_v3 }
 0x429   :  { %v7799_v14 = vsel %vm1536_vm4, 2147483647, %v7463_v63  ;;  %v1352_v0 = vadd.s32 %v1351_v9, %v1349_v39  ;;  %5742 = vmatmul.mubr.msk.f32.vlgmr.msra.gmra.mrb[0].mxu1 %vm1536_vm4, %v9800_v3  ;;  %v1761_v48 = vshra.s32 %v7795_v24, 16 }
 0x42a   :  { %v1366_v1 = vadd.s32 %v1365_v51, %v1363_v37  ;;  %v1775_v8 = vshra.s32 %v7799_v14, 16  ;;  %6256 = vmatpush3.bf16.msra.mxu1 %v7282_v42 }
 0x42b   :  { %v1390_v50 = vpop.xlane.xlu0 %1389  ;;  %vm1537_vm5 = vcmp.eq.s32.totalorder %v7475_v30, %v1352_v0  ;;  %v7807_v17 = vcvt.s32.f32 %v1761_v48  ;;  %6258 = vmatprep.subr.bf16.mxu1 %v7287_v11  ;;  %v1407_v48 = vshll.u32 %v1406_v23, 16 }
 0x42c   :  { %v1391_v63 = vcvt.f32.s32 %v1390_v50  ;;  %v7811_v5 = vsel %vm1537_vm5, 2147483647, %v7475_v30  ;;  %5744 = vmatprep.mubr.msk.f32.mxu1 %vm1537_vm5, %v9800_v3  ;;  %vm1538_vm6 = vcmp.eq.s32.totalorder %v7483_v62, %v1366_v1  ;;  %v7815_v28 = vcvt.s32.f32 %v1775_v8 }
 0x42d   :  { %1764 = vmin.xlane.f32.xlu1 %v7807_v17  ;;  %v1376_v57 = vpop.xlane.xlu1 %1375  ;;  %v7819_v33 = vsel %vm1538_vm6, 2147483647, %v7483_v62  ;;  %5745 = vmatmul.mubr.msk.f32.gmra.mrb[2].mxu1 %vm1538_vm6, %v9800_v3  ;;  %v1789_v38 = vshra.s32 %v7811_v5, 16 }
 0x42e   :  { %v1394_v6 = vadd.s32 %v1393_v32, %v1391_v63  ;;  %v1377_v30 = vcvt.f32.s32 %v1376_v57  ;;  %1778 = vmin.xlane.f32.xlu0 %v7815_v28  ;;  %v1803_v22 = vshra.s32 %v7819_v33, 16  ;;  %6260 = vmatpush3.bf16.msra.mxu1 %v7287_v11  ;;  %v1434_v63 = vcvt.f32.s32 %v7753_v58 }
 0x42f   :  { %v7826_v12 = vcvt.s32.f32 %v1789_v38  ;;  %6262 = vmatprep.subr.bf16.mxu1 %v7300_v56 }
 0x430   :  { %v1380_v55 = vadd.s32 %v1379_v16, %v1377_v30  ;;  %v7829_v62 = vcvt.s32.f32 %v1803_v22  ;;  %vm1540_vm7 = vcmp.eq.s32.totalorder %v7498_v15, %v1394_v6  ;;  %v1435_v22 = vshll.u32 %v1434_v63, 16 }
 0x431   :  { %1792 = vmin.xlane.f32.xlu1 %v7826_v12  ;;  %v7834_v43 = vsel %vm1540_vm7, 2147483647, %v7498_v15 }
 0x432   :  { %1806 = vmin.xlane.f32.xlu0 %v7829_v62  ;;  %vm1539_vm8 = vcmp.eq.s32.totalorder %v7505_v36, %v1380_v55  ;;  %v1831_v4 = vshra.s32 %v7834_v43, 16  ;;  %6264 = vmatpush3.bf16.msra.mxu1 %v7300_v56 }
 0x433   :  { %v7841_v52 = vsel %vm1539_vm8, 2147483647, %v7505_v36  ;;  %5747 = vmatprep.mubr.msk.f32.mxu1 %vm1539_vm8, %v9800_v3  ;;  %6266 = vmatprep.subr.bf16.mxu1 %v7312_v49  ;;  %v1420_v36 = vcvt.f32.s32 %v7739_v13 }
 0x434   :  { %5748 = vmatmul.mubr.msk.f32.gmra.mrb[4].mxu1 %vm1540_vm7, %v9800_v3  ;;  %v7846_v19 = vcvt.s32.f32 %v1831_v4  ;;  %v1817_v15 = vshra.s32 %v7841_v52, 16 }
 0x435   :  { %v1421_v31 = vshll.u32 %v1420_v36, 16 }
 0x436   :  { %1834 = vmin.xlane.f32.xlu0 %v7846_v19  ;;  %v7850_v9 = vcvt.s32.f32 %v1817_v15  ;;  %6268 = vmatpush3.bf16.msra.mxu1 %v7312_v49 }
 0x437   :  { %6270 = vmatprep.subr.bf16.mxu1 %v7324_v35 }
 0x438   :  { %1820 = vmin.xlane.f32.xlu1 %v7850_v9 }
 0x43a   :  { %6272 = vmatpush3.bf16.msra.mxu1 %v7324_v35 }
 0x43b   :  { %6274 = vmatprep.subr.bf16.mxu1 %v7338_v45 }
 0x43d   :  { %v1418_v39 = vpop.xlane.xlu0 %1417 }
 0x43e   :  { %v1419_v51 = vcvt.f32.s32 %v1418_v39  ;;  %6276 = vmatpush3.bf16.msra.mxu1 %v7338_v45 }
 0x43f   :  { %6278 = vmatprep.subr.bf16.mxu1 %v7360_v29 }
 0x440   :  { %v1422_v37 = vadd.s32 %v1421_v31, %v1419_v51  ;;  %v1404_v0 = vpop.xlane.xlu1 %1403  ;;  %v1462_v31 = vcvt.f32.s32 %v7763_v34 }
 0x441   :  { %v1405_v27 = vcvt.f32.s32 %v1404_v0 }
 0x442   :  { %vm1542_vm9 = vcmp.eq.s32.totalorder %v7528_v47, %v1422_v37  ;;  %6280 = vmatpush3.bf16.msra.mxu1 %v7360_v29 }
 0x443   :  { %v1408_v13 = vadd.s32 %v1407_v48, %v1405_v27  ;;  %v7864_v1 = vsel %vm1542_vm9, 2147483647, %v7528_v47  ;;  %6282 = vmatprep.subr.bf16.mxu1 %v7393_v2  ;;  %v1463_v27 = vshll.u32 %v1462_v31, 16 }
 0x444   :  { %v1859_v26 = vshra.s32 %v7864_v1, 16 }
 0x445   :  { %vm1541_vm10 = vcmp.eq.s32.totalorder %v7534_v10, %v1408_v13 }
 0x446   :  { %v7870_v8 = vsel %vm1541_vm10, 2147483647, %v7534_v10  ;;  %5750 = vmatprep.mubr.msk.f32.mxu1 %vm1541_vm10, %v9800_v3  ;;  %v7873_v32 = vcvt.s32.f32 %v1859_v26  ;;  %6284 = vmatpush3.bf16.msra.mxu1 %v7393_v2  ;;  %v1448_v10 = vcvt.f32.s32 %v7749_v41 }
 0x447   :  { %5751 = vmatmul.mubr.msk.f32.gmra.mrb[6].mxu1 %vm1542_vm9, %v9800_v3  ;;  %v1845_v47 = vshra.s32 %v7870_v8, 16  ;;  %6286 = vmatprep.subr.bf16.mxu1 %v7282_v42 }
 0x448   :  { %1862 = vmin.xlane.f32.xlu0 %v7873_v32  ;;  %v1449_v38 = vshll.u32 %v1448_v10, 16 }
 0x449   :  { %v7880_v50 = vcvt.s32.f32 %v1845_v47 }
 0x44b   :  { %1848 = vmin.xlane.f32.xlu1 %v7880_v50 }
 0x450   :  { %v1446_v57 = vpop.xlane.xlu0 %1445 }
 0x451   :  { %v1447_v16 = vcvt.f32.s32 %v1446_v57 }
 0x453   :  { %v1450_v6 = vadd.s32 %v1449_v38, %v1447_v16  ;;  %v1432_v30 = vpop.xlane.xlu1 %1431  ;;  %v1490_v38 = vcvt.f32.s32 %v7773_v25 }
 0x454   :  { %v1433_v55 = vcvt.f32.s32 %v1432_v30 }
 0x455   :  { %vm1544_vm11 = vcmp.eq.s32.totalorder %v7551_v18, %v1450_v6 }
 0x456   :  { %v1436_v4 = vadd.s32 %v1435_v22, %v1433_v55  ;;  %v7887_v15 = vsel %vm1544_vm11, 2147483647, %v7551_v18  ;;  %v1476_v18 = vcvt.f32.s32 %v7759_v53  ;;  %v1491_v55 = vshll.u32 %v1490_v38, 16 }
 0x457   :  { %v1887_v36 = vshra.s32 %v7887_v15, 16 }
 0x458   :  { %vm1543_vm13 = vcmp.eq.s32.totalorder %v7556_v20, %v1436_v4  ;;  %v1477_v51 = vshll.u32 %v1476_v18, 16 }
 0x459   :  { %v7892_v41 = vsel %vm1543_vm13, 2147483647, %v7556_v20  ;;  %5753 = vmatprep.mubr.msk.f32.mxu1 %vm1543_vm13, %v9800_v3  ;;  %v7895_v58 = vcvt.s32.f32 %v1887_v36 }
 0x45a   :  { %5754 = vmatmul.mubr.msk.f32.gmra.mrb[8].mxu1 %vm1544_vm11, %v9800_v3  ;;  %v1873_v23 = vshra.s32 %v7892_v41, 16 }
 0x45b   :  { %1890 = vmin.xlane.f32.xlu0 %v7895_v58 }
 0x45c   :  { %v7900_v39 = vcvt.s32.f32 %v1873_v23 }
 0x45e   :  { %1876 = vmin.xlane.f32.xlu1 %v7900_v39 }
 0x463   :  { %v1474_v20 = vpop.xlane.xlu0 %1473 }
 0x464   :  { %v1475_v37 = vcvt.f32.s32 %v1474_v20 }
 0x466   :  { %v1478_v0 = vadd.s32 %v1477_v51, %v1475_v37  ;;  %v1460_v48 = vpop.xlane.xlu1 %1459  ;;  %v1518_v51 = vcvt.f32.s32 %v7783_v21 }
 0x467   :  { %v1461_v13 = vcvt.f32.s32 %v1460_v48 }
 0x468   :  { %vm1546_vm12 = vcmp.eq.s32.totalorder %v7571_v44, %v1478_v0 }
 0x469   :  { %v1464_v26 = vadd.s32 %v1463_v27, %v1461_v13  ;;  %v7907_v47 = vsel %vm1546_vm12, 2147483647, %v7571_v44  ;;  %v1504_v44 = vcvt.f32.s32 %v7769_v60  ;;  %v1519_v13 = vshll.u32 %v1518_v51, 16 }
 0x46a   :  { %v1915_v10 = vshra.s32 %v7907_v47, 16 }
 0x46b   :  { %vm1545_vm14 = vcmp.eq.s32.totalorder %v7576_v40, %v1464_v26  ;;  %v1505_v16 = vshll.u32 %v1504_v44, 16 }
 0x46c   :  { %v7912_v53 = vsel %vm1545_vm14, 2147483647, %v7576_v40  ;;  %5756 = vmatprep.mubr.msk.f32.mxu1 %vm1545_vm14, %v9800_v3  ;;  %v7915_v34 = vcvt.s32.f32 %v1915_v10 }
 0x46d   :  { %5757 = vmatmul.mubr.msk.f32.gmra.mrb[10].mxu1 %vm1546_vm12, %v9800_v3  ;;  %v1901_v63 = vshra.s32 %v7912_v53, 16 }
 0x46e   :  { %1918 = vmin.xlane.f32.xlu0 %v7915_v34 }
 0x46f   :  { %v7920_v57 = vcvt.s32.f32 %v1901_v63 }
 0x471   :  { %1904 = vmin.xlane.f32.xlu1 %v7920_v57 }
 0x476   :  { %v1502_v40 = vpop.xlane.xlu0 %1501 }
 0x477   :  { %v1503_v6 = vcvt.f32.s32 %v1502_v40 }
 0x479   :  { %v1506_v30 = vadd.s32 %v1505_v16, %v1503_v6  ;;  %v1488_v22 = vpop.xlane.xlu1 %1487  ;;  %v1774_v16 = vand.u32 65535, %v7799_v14 }
 0x47a   :  { %v1489_v4 = vcvt.f32.s32 %v1488_v22 }
 0x47b   :  { %vm1548_vm15 = vcmp.eq.s32.totalorder %v7591_v61, %v1506_v30  ;;  %v1788_v30 = vand.u32 65535, %v7811_v5 }
 0x47c   :  { %v1492_v36 = vadd.s32 %v1491_v55, %v1489_v4  ;;  %v7927_v23 = vsel %vm1548_vm15, 2147483647, %v7591_v61  ;;  %v1532_v61 = vcvt.f32.s32 %v7779_v59  ;;  %v1776_v55 = vcvt.s32.f32 %v1774_v16 }
 0x47d   :  { %v1943_v18 = vshra.s32 %v7927_v23, 16  ;;  %v1802_v4 = vand.u32 65535, %v7819_v33 }
 0x47e   :  { %vm1547_vm0 = vcmp.eq.s32.totalorder %v7596_v54, %v1492_v36  ;;  %v1533_v37 = vshll.u32 %v1532_v61, 16  ;;  %v1790_v61 = vcvt.s32.f32 %v1788_v30  ;;  %v1886_v30 = vand.u32 65535, %v7887_v15 }
 0x47f   :  { %v7932_v60 = vsel %vm1547_vm0, 2147483647, %v7596_v54  ;;  %5759 = vmatprep.mubr.msk.f32.mxu1 %vm1547_vm0, %v9800_v3  ;;  %v7935_v25 = vcvt.s32.f32 %v1943_v18 }
 0x480   :  { %5760 = vmatmul.mubr.msk.f32.gmra.mrb[12].mxu1 %vm1548_vm15, %v9800_v3  ;;  %v1929_v31 = vshra.s32 %v7932_v60, 16 }
 0x481   :  { %1946 = vmin.xlane.f32.xlu0 %v7935_v25 }
 0x482   :  { %v7940_v20 = vcvt.s32.f32 %v1929_v31 }
 0x484   :  { %1932 = vmin.xlane.f32.xlu1 %v7940_v20 }
 0x489   :  { %v1530_v54 = vpop.xlane.xlu0 %1529 }
 0x48a   :  { %v1531_v0 = vcvt.f32.s32 %v1530_v54  ;;  %v1804_v54 = vcvt.s32.f32 %v1802_v4 }
 0x48c   :  { %v1534_v48 = vadd.s32 %v1533_v37, %v1531_v0  ;;  %v1516_v27 = vpop.xlane.xlu1 %1515  ;;  %v1816_v0 = vand.u32 65535, %v7841_v52 }
 0x48d   :  { %v1517_v26 = vcvt.f32.s32 %v1516_v27 }
 0x48e   :  { %vm1550_vm1 = vcmp.eq.s32.totalorder %v7611_v7, %v1534_v48 }
 0x48f   :  { %v1520_v10 = vadd.s32 %v1519_v13, %v1517_v26  ;;  %v7947_v63 = vsel %vm1550_vm1, 2147483647, %v7611_v7  ;;  %v1760_v7 = vand.u32 65535, %v7795_v24  ;;  %v1818_v26 = vcvt.s32.f32 %v1816_v0 }
 0x490   :  { %v1971_v44 = vshra.s32 %v7947_v63, 16 }
 0x491   :  { %vm1549_vm2 = vcmp.eq.s32.totalorder %v7616_v46, %v1520_v10  ;;  %v1762_v6 = vcvt.s32.f32 %v1760_v7  ;;  %v1858_v10 = vand.u32 65535, %v7864_v1 }
 0x492   :  { %v7952_v59 = vsel %vm1549_vm2, 2147483647, %v7616_v46  ;;  %5762 = vmatprep.mubr.msk.f32.mxu1 %vm1549_vm2, %v9800_v3  ;;  %v7955_v21 = vcvt.s32.f32 %v1971_v44  ;;  %v1844_v44 = vand.u32 65535, %v7870_v8 }
 0x493   :  { %5763 = vmatmul.mubr.msk.f32.gmra.mrb[14].mxu1 %vm1550_vm1, %v9800_v3  ;;  %v1957_v38 = vshra.s32 %v7952_v59, 16  ;;  %v1860_v7 = vcvt.s32.f32 %v1858_v10 }
 0x494   :  { %1974 = vmin.xlane.f32.xlu0 %v7955_v21 }
 0x495   :  { %v7960_v40 = vcvt.s32.f32 %v1957_v38 }
 0x497   :  { %1960 = vmin.xlane.f32.xlu1 %v7960_v40 }
 0x4ba   :  { %v7965_v46 = vpop.xlane.xlu1 %1764 }
 0x4bb   :  { %v7968_v22 = vpop.xlane.xlu0 %1778  ;;  %vm1766_vm3 = vcmp.eq.f32.partialorder %v7807_v17, %v7965_v46  ;;  %v1830_v17 = vand.u32 65535, %v7834_v43 }
 0x4bc   :  { %v1767_v36 = vsel %vm1766_vm3, %v1762_v6, inf  ;;  %vm1780_vm4 = vcmp.eq.f32.partialorder %v7815_v28, %v7968_v22  ;;  %v1846_v6 = vcvt.s32.f32 %v1844_v44 }
 0x4bd   :  { %1768 = vmin.xlane.f32.xlu1 %v1767_v36  ;;  %v1781_v18 = vsel %vm1780_vm4, %v1776_v55, inf  ;;  %v1832_v27 = vcvt.s32.f32 %v1830_v17  ;;  %v1872_v55 = vand.u32 65535, %v7892_v41  ;;  %v1888_v36 = vcvt.s32.f32 %v1886_v30 }
 0x4be   :  { %v7975_v31 = vpop.xlane.xlu1 %1792  ;;  %1782 = vmin.xlane.f32.xlu0 %v1781_v18  ;;  %v1900_v17 = vand.u32 65535, %v7912_v53 }
 0x4bf   :  { %v7977_v51 = vpop.xlane.xlu0 %1806  ;;  %vm1794_vm5 = vcmp.eq.f32.partialorder %v7826_v12, %v7975_v31 }
 0x4c0   :  { %v1795_v37 = vsel %vm1794_vm5, %v1790_v61, inf  ;;  %vm1808_vm6 = vcmp.eq.f32.partialorder %v7829_v62, %v7977_v51  ;;  %v1874_v61 = vcvt.s32.f32 %v1872_v55 }
 0x4c1   :  { %1796 = vmin.xlane.f32.xlu1 %v1795_v37  ;;  %v1809_v28 = vsel %vm1808_vm6, %v1804_v54, inf  ;;  %v1914_v54 = vand.u32 65535, %v7907_v47 }
 0x4c2   :  { %1810 = vmin.xlane.f32.xlu0 %v1809_v28 }
 0x4c3   :  { %v7985_v48 = vpop.xlane.xlu0 %1834  ;;  %v1916_v28 = vcvt.s32.f32 %v1914_v54 }
 0x4c4   :  { %vm1836_vm7 = vcmp.eq.f32.partialorder %v7846_v19, %v7985_v48 }
 0x4c5   :  { %v7989_v13 = vpop.xlane.xlu1 %1820  ;;  %v1837_v12 = vsel %vm1836_vm7, %v1832_v27, inf  ;;  %v1902_v27 = vcvt.s32.f32 %v1900_v17  ;;  %v1799_v17 = vcvt.f32.s32 %v7975_v31 }
 0x4c6   :  { %1838 = vmin.xlane.f32.xlu0 %v1837_v12  ;;  %vm1822_vm8 = vcmp.eq.f32.partialorder %v7850_v9, %v7989_v13  ;;  %v1942_v12 = vand.u32 65535, %v7927_v23 }
 0x4c7   :  { %v1823_v62 = vsel %vm1822_vm8, %v1818_v26, inf  ;;  %v1928_v26 = vand.u32 65535, %v7932_v60 }
 0x4c8   :  { %1824 = vmin.xlane.f32.xlu1 %v1823_v62  ;;  %v1944_v10 = vcvt.s32.f32 %v1942_v12 }
 0x4d5   :  { %v7995_v38 = vpop.xlane.xlu0 %1862 }
 0x4d6   :  { %vm1864_vm9 = vcmp.eq.f32.partialorder %v7873_v32, %v7995_v38 }
 0x4d7   :  { %v1865_v19 = vsel %vm1864_vm9, %v1860_v7, inf  ;;  %v1930_v7 = vcvt.s32.f32 %v1928_v26 }
 0x4d8   :  { %v7999_v16 = vpop.xlane.xlu1 %1848  ;;  %1866 = vmin.xlane.f32.xlu0 %v1865_v19  ;;  %v1970_v19 = vand.u32 65535, %v7947_v63 }
 0x4d9   :  { %vm1850_vm10 = vcmp.eq.f32.partialorder %v7880_v50, %v7999_v16 }
 0x4da   :  { %v1851_v9 = vsel %vm1850_vm10, %v1846_v6, inf  ;;  %v1956_v6 = vand.u32 65535, %v7952_v59  ;;  %v1972_v30 = vcvt.s32.f32 %v1970_v19 }
 0x4db   :  { %1852 = vmin.xlane.f32.xlu1 %v1851_v9 }
 0x4e8   :  { %v8005_v4 = vpop.xlane.xlu0 %1890 }
 0x4e9   :  { %vm1892_vm11 = vcmp.eq.f32.partialorder %v7895_v58, %v8005_v4 }
 0x4ea   :  { %v1893_v32 = vsel %vm1892_vm11, %v1888_v36, inf  ;;  %v1958_v36 = vcvt.s32.f32 %v1956_v6  ;;  %v1827_v6 = vcvt.f32.s32 %v7989_v13 }
 0x4eb   :  { %v8009_v18 = vpop.xlane.xlu1 %1876  ;;  %1894 = vmin.xlane.f32.xlu0 %v1893_v32  ;;  %v1771_v32 = vcvt.f32.s32 %v7965_v46 }
 0x4ec   :  { %vm1878_vm13 = vcmp.eq.f32.partialorder %v7900_v39, %v8009_v18 }
 0x4ed   :  { %v1879_v50 = vsel %vm1878_vm13, %v1874_v61, inf  ;;  %v1785_v61 = vcvt.f32.s32 %v7968_v22  ;;  %v1772_v54 = vshll.u32 %v1771_v32, 16 }
 0x4ee   :  { %1880 = vmin.xlane.f32.xlu1 %v1879_v50 }
 0x4fb   :  { %v8015_v37 = vpop.xlane.xlu0 %1918 }
 0x4fc   :  { %vm1920_vm12 = vcmp.eq.f32.partialorder %v7915_v34, %v8015_v37 }
 0x4fd   :  { %v1921_v58 = vsel %vm1920_vm12, %v1916_v28, inf }
 0x4fe   :  { %v8019_v0 = vpop.xlane.xlu1 %1904  ;;  %1922 = vmin.xlane.f32.xlu0 %v1921_v58  ;;  %v1786_v58 = vshll.u32 %v1785_v61, 16 }
 0x4ff   :  { %vm1906_vm14 = vcmp.eq.f32.partialorder %v7920_v57, %v8019_v0 }
 0x500   :  { %v1907_v39 = vsel %vm1906_vm14, %v1902_v27, inf  ;;  %v1813_v27 = vcvt.f32.s32 %v7977_v51 }
 0x501   :  { %1908 = vmin.xlane.f32.xlu1 %v1907_v39 }
 0x502   :  { %v1814_v22 = vshll.u32 %v1813_v27, 16 }
 0x50e   :  { %v8025_v62 = vpop.xlane.xlu0 %1946 }
 0x50f   :  { %vm1948_vm15 = vcmp.eq.f32.partialorder %v7935_v25, %v8025_v62 }
 0x510   :  { %v1949_v34 = vsel %vm1948_vm15, %v1944_v10, inf }
 0x511   :  { %v8029_v44 = vpop.xlane.xlu1 %1932  ;;  %1950 = vmin.xlane.f32.xlu0 %v1949_v34  ;;  %v1841_v34 = vcvt.f32.s32 %v7985_v48 }
 0x512   :  { %vm1934_vm0 = vcmp.eq.f32.partialorder %v7940_v20, %v8029_v44 }
 0x513   :  { %v1935_v57 = vsel %vm1934_vm0, %v1930_v7, inf }
 0x514   :  { %1936 = vmin.xlane.f32.xlu1 %v1935_v57 }
 0x521   :  { %v8035_v9 = vpop.xlane.xlu0 %1974 }
 0x522   :  { %vm1976_vm1 = vcmp.eq.f32.partialorder %v7955_v21, %v8035_v9 }
 0x523   :  { %v1977_v25 = vsel %vm1976_vm1, %v1972_v30, inf }
 0x524   :  { %v8039_v55 = vpop.xlane.xlu1 %1960  ;;  %1978 = vmin.xlane.f32.xlu0 %v1977_v25 }
 0x525   :  { %vm1962_vm2 = vcmp.eq.f32.partialorder %v7960_v40, %v8039_v55  ;;  %v1800_v40 = vshll.u32 %v1799_v17, 16  ;;  %v1828_v17 = vshll.u32 %v1827_v6, 16 }
 0x526   :  { %v1963_v20 = vsel %vm1962_vm2, %v1958_v36, inf  ;;  %v1842_v36 = vshll.u32 %v1841_v34, 16  ;;  %v1855_v34 = vcvt.f32.s32 %v7999_v16 }
 0x527   :  { %1964 = vmin.xlane.f32.xlu1 %v1963_v20 }
 0x54a   :  { %v1769_v50 = vpop.xlane.xlu1 %1768 }
 0x54b   :  { %v1770_v28 = vcvt.f32.s32 %v1769_v50  ;;  %v1783_v21 = vpop.xlane.xlu0 %1782 }
 0x54c   :  { %v1784_v39 = vcvt.f32.s32 %v1783_v21 }
 0x54d   :  { %v1773_v12 = vadd.s32 %v1772_v54, %v1770_v28 }
 0x54e   :  { %v1787_v26 = vadd.s32 %v1786_v58, %v1784_v39  ;;  %v1797_v10 = vpop.xlane.xlu1 %1796 }
 0x54f   :  { %v1798_v7 = vcvt.f32.s32 %v1797_v10  ;;  %v1811_v46 = vpop.xlane.xlu0 %1810  ;;  %vm1984_vm3 = vcmp.eq.s32.totalorder %v7795_v24, %v1773_v12 }
 0x550   :  { %vm1985_vm4 = vcmp.eq.s32.totalorder %v7799_v14, %v1787_v26  ;;  %v1812_v31 = vcvt.f32.s32 %v1811_v46  ;;  %v8051_v57 = vsel %vm1984_vm3, 2147483647, %v7795_v24  ;;  %5797 = vmatprep.mubr.msk.f32.mxu1 %vm1984_vm3, %v9800_v3 }
 0x551   :  { %v8055_v51 = vsel %vm1985_vm4, 2147483647, %v7799_v14  ;;  %v1801_v19 = vadd.s32 %v1800_v40, %v1798_v7  ;;  %5798 = vmatmul.mubr.msk.f32.vlgmr.msra.gmra.mrb[0].mxu1 %vm1985_vm4, %v9800_v3  ;;  %v2210_v48 = vshra.s32 %v8051_v57, 16 }
 0x552   :  { %v1815_v30 = vadd.s32 %v1814_v22, %v1812_v31  ;;  %v2224_v25 = vshra.s32 %v8055_v51, 16  ;;  %6288 = vmatpush3.bf16.msra.mxu1 %v7282_v42 }
 0x553   :  { %v1839_v24 = vpop.xlane.xlu0 %1838  ;;  %vm1986_vm5 = vcmp.eq.s32.totalorder %v7811_v5, %v1801_v19  ;;  %v8063_v20 = vcvt.s32.f32 %v2210_v48  ;;  %6290 = vmatprep.subr.bf16.mxu1 %v7287_v11  ;;  %v1856_v48 = vshll.u32 %v1855_v34, 16 }
 0x554   :  { %v1840_v14 = vcvt.f32.s32 %v1839_v24  ;;  %v8067_v32 = vsel %vm1986_vm5, 2147483647, %v7811_v5  ;;  %5800 = vmatprep.mubr.msk.f32.mxu1 %vm1986_vm5, %v9800_v3  ;;  %vm1987_vm6 = vcmp.eq.s32.totalorder %v7819_v33, %v1815_v30  ;;  %v8071_v13 = vcvt.s32.f32 %v2224_v25 }
 0x555   :  { %2213 = vmin.xlane.f32.xlu1 %v8063_v20  ;;  %v1825_v61 = vpop.xlane.xlu1 %1824  ;;  %v8075_v50 = vsel %vm1987_vm6, 2147483647, %v7819_v33  ;;  %5801 = vmatmul.mubr.msk.f32.gmra.mrb[2].mxu1 %vm1987_vm6, %v9800_v3  ;;  %v2238_v54 = vshra.s32 %v8067_v32, 16 }
 0x556   :  { %v1843_v28 = vadd.s32 %v1842_v36, %v1840_v14  ;;  %v1826_v5 = vcvt.f32.s32 %v1825_v61  ;;  %2227 = vmin.xlane.f32.xlu0 %v8071_v13  ;;  %v2252_v21 = vshra.s32 %v8075_v50, 16  ;;  %6292 = vmatpush3.bf16.msra.mxu1 %v7287_v11  ;;  %v1897_v14 = vcvt.f32.s32 %v8005_v4 }
 0x557   :  { %v8082_v58 = vcvt.s32.f32 %v2238_v54  ;;  %6294 = vmatprep.subr.bf16.mxu1 %v7300_v56 }
 0x558   :  { %v1829_v27 = vadd.s32 %v1828_v17, %v1826_v5  ;;  %v8085_v33 = vcvt.s32.f32 %v2252_v21  ;;  %vm1989_vm7 = vcmp.eq.s32.totalorder %v7834_v43, %v1843_v28  ;;  %v1898_v54 = vshll.u32 %v1897_v14, 16 }
 0x559   :  { %2241 = vmin.xlane.f32.xlu1 %v8082_v58  ;;  %v8090_v39 = vsel %vm1989_vm7, 2147483647, %v7834_v43 }
 0x55a   :  { %2255 = vmin.xlane.f32.xlu0 %v8085_v33  ;;  %vm1988_vm8 = vcmp.eq.s32.totalorder %v7841_v52, %v1829_v27  ;;  %v2280_v12 = vshra.s32 %v8090_v39, 16  ;;  %6296 = vmatpush3.bf16.msra.mxu1 %v7300_v56 }
 0x55b   :  { %v8097_v26 = vsel %vm1988_vm8, 2147483647, %v7841_v52  ;;  %5803 = vmatprep.mubr.msk.f32.mxu1 %vm1988_vm8, %v9800_v3  ;;  %6298 = vmatprep.subr.bf16.mxu1 %v7312_v49  ;;  %v1869_v52 = vcvt.f32.s32 %v7995_v38 }
 0x55c   :  { %5804 = vmatmul.mubr.msk.f32.gmra.mrb[4].mxu1 %vm1989_vm7, %v9800_v3  ;;  %v8102_v10 = vcvt.s32.f32 %v2280_v12  ;;  %v2266_v43 = vshra.s32 %v8097_v26, 16 }
 0x55d   :  { %v1870_v46 = vshll.u32 %v1869_v52, 16 }
 0x55e   :  { %2283 = vmin.xlane.f32.xlu0 %v8102_v10  ;;  %v8106_v40 = vcvt.s32.f32 %v2266_v43  ;;  %6300 = vmatpush3.bf16.msra.mxu1 %v7312_v49 }
 0x55f   :  { %6302 = vmatprep.subr.bf16.mxu1 %v7324_v35 }
 0x560   :  { %2269 = vmin.xlane.f32.xlu1 %v8106_v40 }
 0x562   :  { %6304 = vmatpush3.bf16.msra.mxu1 %v7324_v35 }
 0x563   :  { %6306 = vmatprep.subr.bf16.mxu1 %v7338_v45 }
 0x565   :  { %v1867_v7 = vpop.xlane.xlu0 %1866 }
 0x566   :  { %v1868_v22 = vcvt.f32.s32 %v1867_v7  ;;  %6308 = vmatpush3.bf16.msra.mxu1 %v7338_v45 }
 0x567   :  { %6310 = vmatprep.subr.bf16.mxu1 %v7360_v29 }
 0x568   :  { %v1871_v31 = vadd.s32 %v1870_v46, %v1868_v22  ;;  %v1853_v19 = vpop.xlane.xlu1 %1852  ;;  %v1911_v46 = vcvt.f32.s32 %v8019_v0 }
 0x569   :  { %v1854_v6 = vcvt.f32.s32 %v1853_v19 }
 0x56a   :  { %vm1991_vm9 = vcmp.eq.s32.totalorder %v7864_v1, %v1871_v31  ;;  %6312 = vmatpush3.bf16.msra.mxu1 %v7360_v29 }
 0x56b   :  { %v1857_v38 = vadd.s32 %v1856_v48, %v1854_v6  ;;  %v8120_v30 = vsel %vm1991_vm9, 2147483647, %v7864_v1  ;;  %6314 = vmatprep.subr.bf16.mxu1 %v7393_v2  ;;  %v1912_v6 = vshll.u32 %v1911_v46, 16 }
 0x56c   :  { %v2308_v16 = vshra.s32 %v8120_v30, 16 }
 0x56d   :  { %vm1990_vm10 = vcmp.eq.s32.totalorder %v7870_v8, %v1857_v38 }
 0x56e   :  { %v8126_v25 = vsel %vm1990_vm10, 2147483647, %v7870_v8  ;;  %5806 = vmatprep.mubr.msk.f32.mxu1 %vm1990_vm10, %v9800_v3  ;;  %v8129_v36 = vcvt.s32.f32 %v2308_v16  ;;  %6316 = vmatpush3.bf16.msra.mxu1 %v7393_v2  ;;  %v1883_v8 = vcvt.f32.s32 %v8009_v18 }
 0x56f   :  { %5807 = vmatmul.mubr.msk.f32.gmra.mrb[6].mxu1 %vm1991_vm9, %v9800_v3  ;;  %v2294_v1 = vshra.s32 %v8126_v25, 16 }
 0x570   :  { %2311 = vmin.xlane.f32.xlu0 %v8129_v36  ;;  %v1884_v21 = vshll.u32 %v1883_v8, 16 }
 0x571   :  { %v8135_v24 = vcvt.s32.f32 %v2294_v1 }
 0x573   :  { %2297 = vmin.xlane.f32.xlu1 %v8135_v24 }
 0x578   :  { %v1895_v61 = vpop.xlane.xlu0 %1894 }
 0x579   :  { %v1896_v17 = vcvt.f32.s32 %v1895_v61 }
 0x57b   :  { %v1899_v28 = vadd.s32 %v1898_v54, %v1896_v17  ;;  %v1881_v5 = vpop.xlane.xlu1 %1880  ;;  %v1939_v54 = vcvt.f32.s32 %v8029_v44 }
 0x57c   :  { %v1882_v27 = vcvt.f32.s32 %v1881_v5 }
 0x57d   :  { %vm1993_vm11 = vcmp.eq.s32.totalorder %v7887_v15, %v1899_v28 }
 0x57e   :  { %v1885_v12 = vadd.s32 %v1884_v21, %v1882_v27  ;;  %v8142_v43 = vsel %vm1993_vm11, 2147483647, %v7887_v15  ;;  %v1925_v15 = vcvt.f32.s32 %v8015_v37  ;;  %v1940_v27 = vshll.u32 %v1939_v54, 16 }
 0x57f   :  { %v2336_v52 = vshra.s32 %v8142_v43, 16 }
 0x580   :  { %vm1992_vm13 = vcmp.eq.s32.totalorder %v7892_v41, %v1885_v12  ;;  %v1926_v22 = vshll.u32 %v1925_v15, 16 }
 0x581   :  { %v8147_v4 = vsel %vm1992_vm13, 2147483647, %v7892_v41  ;;  %5809 = vmatprep.mubr.msk.f32.mxu1 %vm1992_vm13, %v9800_v3  ;;  %v8150_v18 = vcvt.s32.f32 %v2336_v52 }
 0x582   :  { %5810 = vmatmul.mubr.msk.f32.gmra.mrb[8].mxu1 %vm1993_vm11, %v9800_v3  ;;  %v2322_v34 = vshra.s32 %v8147_v4, 16 }
 0x583   :  { %2339 = vmin.xlane.f32.xlu0 %v8150_v18 }
 0x584   :  { %v8155_v7 = vcvt.s32.f32 %v2322_v34 }
 0x586   :  { %2325 = vmin.xlane.f32.xlu1 %v8155_v7 }
 0x58b   :  { %v1923_v41 = vpop.xlane.xlu0 %1922 }
 0x58c   :  { %v1924_v31 = vcvt.f32.s32 %v1923_v41 }
 0x58e   :  { %v1927_v19 = vadd.s32 %v1926_v22, %v1924_v31  ;;  %v1909_v48 = vpop.xlane.xlu1 %1908  ;;  %v1967_v22 = vcvt.f32.s32 %v8039_v55 }
 0x58f   :  { %v1910_v38 = vcvt.f32.s32 %v1909_v48 }
 0x590   :  { %vm1995_vm12 = vcmp.eq.s32.totalorder %v7907_v47, %v1927_v19 }
 0x591   :  { %v1913_v16 = vadd.s32 %v1912_v6, %v1910_v38  ;;  %v8162_v1 = vsel %vm1995_vm12, 2147483647, %v7907_v47  ;;  %v1953_v47 = vcvt.f32.s32 %v8025_v62  ;;  %v1968_v38 = vshll.u32 %v1967_v22, 16 }
 0x592   :  { %v2364_v14 = vshra.s32 %v8162_v1, 16 }
 0x593   :  { %vm1994_vm14 = vcmp.eq.s32.totalorder %v7912_v53, %v1913_v16  ;;  %v1954_v17 = vshll.u32 %v1953_v47, 16 }
 0x594   :  { %v8167_v37 = vsel %vm1994_vm14, 2147483647, %v7912_v53  ;;  %5812 = vmatprep.mubr.msk.f32.mxu1 %vm1994_vm14, %v9800_v3  ;;  %v8170_v0 = vcvt.s32.f32 %v2364_v14 }
 0x595   :  { %5813 = vmatmul.mubr.msk.f32.gmra.mrb[10].mxu1 %vm1995_vm12, %v9800_v3  ;;  %v2350_v8 = vshra.s32 %v8167_v37, 16 }
 0x596   :  { %2367 = vmin.xlane.f32.xlu0 %v8170_v0 }
 0x597   :  { %v8175_v61 = vcvt.s32.f32 %v2350_v8 }
 0x599   :  { %2353 = vmin.xlane.f32.xlu1 %v8175_v61 }
 0x59e   :  { %v1951_v53 = vpop.xlane.xlu0 %1950 }
 0x59f   :  { %v1952_v28 = vcvt.f32.s32 %v1951_v53 }
 0x5a1   :  { %v1955_v5 = vadd.s32 %v1954_v17, %v1952_v28  ;;  %v1937_v21 = vpop.xlane.xlu1 %1936  ;;  %v2223_v17 = vand.u32 65535, %v8055_v51 }
 0x5a2   :  { %v1938_v12 = vcvt.f32.s32 %v1937_v21 }
 0x5a3   :  { %vm1997_vm15 = vcmp.eq.s32.totalorder %v7927_v23, %v1955_v5  ;;  %v2237_v5 = vand.u32 65535, %v8067_v32 }
 0x5a4   :  { %v1941_v52 = vadd.s32 %v1940_v27, %v1938_v12  ;;  %v8182_v34 = vsel %vm1997_vm15, 2147483647, %v7927_v23  ;;  %v1981_v23 = vcvt.f32.s32 %v8035_v9  ;;  %v2225_v27 = vcvt.s32.f32 %v2223_v17 }
 0x5a5   :  { %v2392_v15 = vshra.s32 %v8182_v34, 16  ;;  %v2251_v12 = vand.u32 65535, %v8075_v50 }
 0x5a6   :  { %vm1996_vm0 = vcmp.eq.s32.totalorder %v7932_v60, %v1941_v52  ;;  %v1982_v31 = vshll.u32 %v1981_v23, 16  ;;  %v2239_v23 = vcvt.s32.f32 %v2237_v5  ;;  %v2335_v5 = vand.u32 65535, %v8142_v43 }
 0x5a7   :  { %v8187_v62 = vsel %vm1996_vm0, 2147483647, %v7932_v60  ;;  %5815 = vmatprep.mubr.msk.f32.mxu1 %vm1996_vm0, %v9800_v3  ;;  %v8190_v44 = vcvt.s32.f32 %v2392_v15 }
 0x5a8   :  { %5816 = vmatmul.mubr.msk.f32.gmra.mrb[12].mxu1 %vm1997_vm15, %v9800_v3  ;;  %v2378_v46 = vshra.s32 %v8187_v62, 16 }
 0x5a9   :  { %2395 = vmin.xlane.f32.xlu0 %v8190_v44 }
 0x5aa   :  { %v8195_v41 = vcvt.s32.f32 %v2378_v46 }
 0x5ac   :  { %2381 = vmin.xlane.f32.xlu1 %v8195_v41 }
 0x5b1   :  { %v1979_v60 = vpop.xlane.xlu0 %1978 }
 0x5b2   :  { %v1980_v19 = vcvt.f32.s32 %v1979_v60  ;;  %v2253_v60 = vcvt.s32.f32 %v2251_v12 }
 0x5b4   :  { %v1983_v48 = vadd.s32 %v1982_v31, %v1980_v19  ;;  %v1965_v6 = vpop.xlane.xlu1 %1964  ;;  %v2265_v19 = vand.u32 65535, %v8097_v26 }
 0x5b5   :  { %v1966_v16 = vcvt.f32.s32 %v1965_v6 }
 0x5b6   :  { %vm1999_vm1 = vcmp.eq.s32.totalorder %v7947_v63, %v1983_v48 }
 0x5b7   :  { %v1969_v14 = vadd.s32 %v1968_v38, %v1966_v16  ;;  %v8202_v8 = vsel %vm1999_vm1, 2147483647, %v7947_v63  ;;  %v2209_v63 = vand.u32 65535, %v8051_v57  ;;  %v2267_v16 = vcvt.s32.f32 %v2265_v19 }
 0x5b8   :  { %v2420_v47 = vshra.s32 %v8202_v8, 16 }
 0x5b9   :  { %vm1998_vm2 = vcmp.eq.s32.totalorder %v7952_v59, %v1969_v14  ;;  %v2211_v28 = vcvt.s32.f32 %v2209_v63  ;;  %v2307_v14 = vand.u32 65535, %v8120_v30 }
 0x5ba   :  { %v8207_v9 = vsel %vm1998_vm2, 2147483647, %v7952_v59  ;;  %5818 = vmatprep.mubr.msk.f32.mxu1 %vm1998_vm2, %v9800_v3  ;;  %v8210_v55 = vcvt.s32.f32 %v2420_v47  ;;  %v2293_v47 = vand.u32 65535, %v8126_v25 }
 0x5bb   :  { %5819 = vmatmul.mubr.msk.f32.gmra.mrb[14].mxu1 %vm1999_vm1, %v9800_v3  ;;  %v2406_v54 = vshra.s32 %v8207_v9, 16  ;;  %v2309_v63 = vcvt.s32.f32 %v2307_v14 }
 0x5bc   :  { %2423 = vmin.xlane.f32.xlu0 %v8210_v55 }
 0x5bd   :  { %v8215_v53 = vcvt.s32.f32 %v2406_v54 }
 0x5bf   :  { %2409 = vmin.xlane.f32.xlu1 %v8215_v53 }
 0x5e2   :  { %v8220_v59 = vpop.xlane.xlu1 %2213 }
 0x5e3   :  { %v8223_v21 = vpop.xlane.xlu0 %2227  ;;  %vm2215_vm3 = vcmp.eq.f32.partialorder %v8063_v20, %v8220_v59  ;;  %v2279_v20 = vand.u32 65535, %v8090_v39 }
 0x5e4   :  { %v2216_v52 = vsel %vm2215_vm3, %v2211_v28, inf  ;;  %vm2229_vm4 = vcmp.eq.f32.partialorder %v8071_v13, %v8223_v21  ;;  %v2295_v28 = vcvt.s32.f32 %v2293_v47 }
 0x5e5   :  { %2217 = vmin.xlane.f32.xlu1 %v2216_v52  ;;  %v2230_v15 = vsel %vm2229_vm4, %v2225_v27, inf  ;;  %v2281_v6 = vcvt.s32.f32 %v2279_v20  ;;  %v2321_v27 = vand.u32 65535, %v8147_v4  ;;  %v2337_v52 = vcvt.s32.f32 %v2335_v5 }
 0x5e6   :  { %v8230_v46 = vpop.xlane.xlu1 %2241  ;;  %2231 = vmin.xlane.f32.xlu0 %v2230_v15  ;;  %v2349_v20 = vand.u32 65535, %v8167_v37 }
 0x5e7   :  { %v8232_v22 = vpop.xlane.xlu0 %2255  ;;  %vm2243_vm5 = vcmp.eq.f32.partialorder %v8082_v58, %v8230_v46 }
 0x5e8   :  { %v2244_v31 = vsel %vm2243_vm5, %v2239_v23, inf  ;;  %vm2257_vm6 = vcmp.eq.f32.partialorder %v8085_v33, %v8232_v22  ;;  %v2323_v23 = vcvt.s32.f32 %v2321_v27 }
 0x5e9   :  { %2245 = vmin.xlane.f32.xlu1 %v2244_v31  ;;  %v2258_v13 = vsel %vm2257_vm6, %v2253_v60, inf  ;;  %v2363_v60 = vand.u32 65535, %v8162_v1 }
 0x5ea   :  { %2259 = vmin.xlane.f32.xlu0 %v2258_v13 }
 0x5eb   :  { %v8240_v48 = vpop.xlane.xlu0 %2283  ;;  %v2365_v13 = vcvt.s32.f32 %v2363_v60 }
 0x5ec   :  { %vm2285_vm7 = vcmp.eq.f32.partialorder %v8102_v10, %v8240_v48 }
 0x5ed   :  { %v8244_v38 = vpop.xlane.xlu1 %2269  ;;  %v2286_v58 = vsel %vm2285_vm7, %v2281_v6, inf  ;;  %v2351_v6 = vcvt.s32.f32 %v2349_v20  ;;  %v2248_v20 = vcvt.f32.s32 %v8230_v46 }
 0x5ee   :  { %2287 = vmin.xlane.f32.xlu0 %v2286_v58  ;;  %vm2271_vm8 = vcmp.eq.f32.partialorder %v8106_v40, %v8244_v38  ;;  %v2391_v58 = vand.u32 65535, %v8182_v34 }
 0x5ef   :  { %v2272_v33 = vsel %vm2271_vm8, %v2267_v16, inf  ;;  %v2377_v16 = vand.u32 65535, %v8187_v62 }
 0x5f0   :  { %2273 = vmin.xlane.f32.xlu1 %v2272_v33  ;;  %v2393_v14 = vcvt.s32.f32 %v2391_v58 }
 0x5fd   :  { %v8250_v54 = vpop.xlane.xlu0 %2311 }
 0x5fe   :  { %vm2313_vm9 = vcmp.eq.f32.partialorder %v8129_v36, %v8250_v54 }
 0x5ff   :  { %v2314_v10 = vsel %vm2313_vm9, %v2309_v63, inf  ;;  %v2379_v63 = vcvt.s32.f32 %v2377_v16 }
 0x600   :  { %v8254_v17 = vpop.xlane.xlu1 %2297  ;;  %2315 = vmin.xlane.f32.xlu0 %v2314_v10  ;;  %v2419_v10 = vand.u32 65535, %v8202_v8 }
 0x601   :  { %vm2299_vm10 = vcmp.eq.f32.partialorder %v8135_v24, %v8254_v17 }
 0x602   :  { %v2300_v40 = vsel %vm2299_vm10, %v2295_v28, inf  ;;  %v2405_v28 = vand.u32 65535, %v8207_v9  ;;  %v2421_v5 = vcvt.s32.f32 %v2419_v10 }
 0x603   :  { %2301 = vmin.xlane.f32.xlu1 %v2300_v40 }
 0x610   :  { %v8260_v12 = vpop.xlane.xlu0 %2339 }
 0x611   :  { %vm2341_vm11 = vcmp.eq.f32.partialorder %v8150_v18, %v8260_v12 }
 0x612   :  { %v2342_v36 = vsel %vm2341_vm11, %v2337_v52, inf  ;;  %v2407_v52 = vcvt.s32.f32 %v2405_v28  ;;  %v2276_v28 = vcvt.f32.s32 %v8244_v38 }
 0x613   :  { %v8264_v15 = vpop.xlane.xlu1 %2325  ;;  %2343 = vmin.xlane.f32.xlu0 %v2342_v36  ;;  %v2220_v36 = vcvt.f32.s32 %v8220_v59 }
 0x614   :  { %vm2327_vm13 = vcmp.eq.f32.partialorder %v8155_v7, %v8264_v15 }
 0x615   :  { %v2328_v24 = vsel %vm2327_vm13, %v2323_v23, inf  ;;  %v2234_v23 = vcvt.f32.s32 %v8223_v21  ;;  %v2221_v60 = vshll.u32 %v2220_v36, 16 }
 0x616   :  { %2329 = vmin.xlane.f32.xlu1 %v2328_v24 }
 0x623   :  { %v8270_v31 = vpop.xlane.xlu0 %2367 }
 0x624   :  { %vm2369_vm12 = vcmp.eq.f32.partialorder %v8170_v0, %v8270_v31 }
 0x625   :  { %v2370_v18 = vsel %vm2369_vm12, %v2365_v13, inf }
 0x626   :  { %v8274_v19 = vpop.xlane.xlu1 %2353  ;;  %2371 = vmin.xlane.f32.xlu0 %v2370_v18  ;;  %v2235_v18 = vshll.u32 %v2234_v23, 16 }
 0x627   :  { %vm2355_vm14 = vcmp.eq.f32.partialorder %v8175_v61, %v8274_v19 }
 0x628   :  { %v2356_v7 = vsel %vm2355_vm14, %v2351_v6, inf  ;;  %v2262_v6 = vcvt.f32.s32 %v8232_v22 }
 0x629   :  { %2357 = vmin.xlane.f32.xlu1 %v2356_v7 }
 0x62a   :  { %v2263_v21 = vshll.u32 %v2262_v6, 16 }
 0x636   :  { %v8280_v33 = vpop.xlane.xlu0 %2395 }
 0x637   :  { %vm2397_vm15 = vcmp.eq.f32.partialorder %v8190_v44, %v8280_v33 }
 0x638   :  { %v2398_v0 = vsel %vm2397_vm15, %v2393_v14, inf }
 0x639   :  { %v8284_v47 = vpop.xlane.xlu1 %2381  ;;  %2399 = vmin.xlane.f32.xlu0 %v2398_v0  ;;  %v2290_v0 = vcvt.f32.s32 %v8240_v48 }
 0x63a   :  { %vm2383_vm0 = vcmp.eq.f32.partialorder %v8195_v41, %v8284_v47 }
 0x63b   :  { %v2384_v61 = vsel %vm2383_vm0, %v2379_v63, inf }
 0x63c   :  { %2385 = vmin.xlane.f32.xlu1 %v2384_v61 }
 0x649   :  { %v8290_v40 = vpop.xlane.xlu0 %2423 }
 0x64a   :  { %vm2425_vm1 = vcmp.eq.f32.partialorder %v8210_v55, %v8290_v40 }
 0x64b   :  { %v2426_v44 = vsel %vm2425_vm1, %v2421_v5, inf }
 0x64c   :  { %v8294_v27 = vpop.xlane.xlu1 %2409  ;;  %2427 = vmin.xlane.f32.xlu0 %v2426_v44 }
 0x64d   :  { %vm2411_vm2 = vcmp.eq.f32.partialorder %v8215_v53, %v8294_v27  ;;  %v2249_v53 = vshll.u32 %v2248_v20, 16  ;;  %v2277_v20 = vshll.u32 %v2276_v28, 16 }
 0x64e   :  { %v2412_v41 = vsel %vm2411_vm2, %v2407_v52, inf  ;;  %v2291_v52 = vshll.u32 %v2290_v0, 16  ;;  %v2318_v0 = vcvt.f32.s32 %v8250_v54 }
 0x64f   :  { %2413 = vmin.xlane.f32.xlu1 %v2412_v41 }
 0x672   :  { %v2218_v24 = vpop.xlane.xlu1 %2217 }
 0x673   :  { %v2219_v13 = vcvt.f32.s32 %v2218_v24  ;;  %v2232_v55 = vpop.xlane.xlu0 %2231 }
 0x674   :  { %v2233_v7 = vcvt.f32.s32 %v2232_v55 }
 0x675   :  { %v2222_v58 = vadd.s32 %v2221_v60, %v2219_v13 }
 0x676   :  { %v2236_v16 = vadd.s32 %v2235_v18, %v2233_v7  ;;  %v2246_v14 = vpop.xlane.xlu1 %2245 }
 0x677   :  { %v2247_v63 = vcvt.f32.s32 %v2246_v14  ;;  %v2260_v59 = vpop.xlane.xlu0 %2259  ;;  %vm2433_vm3 = vcmp.eq.s32.totalorder %v8051_v57, %v2222_v58 }
 0x678   :  { %vm2434_vm4 = vcmp.eq.s32.totalorder %v8055_v51, %v2236_v16  ;;  %v2261_v46 = vcvt.f32.s32 %v2260_v59  ;;  %v8306_v61 = vsel %vm2433_vm3, 2147483647, %v8051_v57  ;;  %5853 = vmatprep.mubr.msk.f32.mxu1 %vm2433_vm3, %v9800_v3  ;;  %v2319_v59 = vshll.u32 %v2318_v0, 16 }
 0x679   :  { %v8310_v22 = vsel %vm2434_vm4, 2147483647, %v8055_v51  ;;  %v2250_v10 = vadd.s32 %v2249_v53, %v2247_v63  ;;  %5854 = vmatmul.mubr.msk.f32.vlgmr.msra.gmra.mrb[0].mxu1 %vm2434_vm4, %v9800_v3  ;;  %v2659_v48 = vshra.s32 %v8306_v61, 16  ;;  %v2304_v63 = vcvt.f32.s32 %v8254_v17 }
 0x67a   :  { %v2264_v5 = vadd.s32 %v2263_v21, %v2261_v46  ;;  %v2673_v44 = vshra.s32 %v8310_v22, 16 }
 0x67b   :  { %v2288_v41 = vpop.xlane.xlu0 %2287  ;;  %vm2435_vm5 = vcmp.eq.s32.totalorder %v8067_v32, %v2250_v10  ;;  %v8317_v57 = vcvt.s32.f32 %v2659_v48  ;;  %v2305_v48 = vshll.u32 %v2304_v63, 16 }
 0x67c   :  { %v2289_v36 = vcvt.f32.s32 %v2288_v41  ;;  %v8320_v51 = vsel %vm2435_vm5, 2147483647, %v8067_v32  ;;  %5856 = vmatprep.mubr.msk.f32.mxu1 %vm2435_vm5, %v9800_v3  ;;  %vm2436_vm6 = vcmp.eq.s32.totalorder %v8075_v50, %v2264_v5  ;;  %v8324_v23 = vcvt.s32.f32 %v2673_v44 }
 0x67d   :  { %2662 = vmin.xlane.f32.xlu1 %v8317_v57  ;;  %v2274_v38 = vpop.xlane.xlu1 %2273  ;;  %v8328_v24 = vsel %vm2436_vm6, 2147483647, %v8075_v50  ;;  %5857 = vmatmul.mubr.msk.f32.gmra.mrb[2].mxu1 %vm2436_vm6, %v9800_v3  ;;  %v2687_v60 = vshra.s32 %v8320_v51, 16 }
 0x67e   :  { %v2292_v13 = vadd.s32 %v2291_v52, %v2289_v36  ;;  %v2275_v32 = vcvt.f32.s32 %v2274_v38  ;;  %2676 = vmin.xlane.f32.xlu0 %v8324_v23  ;;  %v2701_v55 = vshra.s32 %v8328_v24, 16  ;;  %v2332_v38 = vcvt.f32.s32 %v8264_v15 }
 0x67f   :  { %v8334_v18 = vcvt.s32.f32 %v2687_v60 }
 0x680   :  { %v2278_v6 = vadd.s32 %v2277_v20, %v2275_v32  ;;  %v8336_v7 = vcvt.s32.f32 %v2701_v55  ;;  %vm2438_vm7 = vcmp.eq.s32.totalorder %v8090_v39, %v2292_v13  ;;  %v2333_v55 = vshll.u32 %v2332_v38, 16 }
 0x681   :  { %2690 = vmin.xlane.f32.xlu1 %v8334_v18  ;;  %v8341_v50 = vsel %vm2438_vm7, 2147483647, %v8090_v39 }
 0x682   :  { %2704 = vmin.xlane.f32.xlu0 %v8336_v7  ;;  %vm2437_vm8 = vcmp.eq.s32.totalorder %v8097_v26, %v2278_v6  ;;  %v2729_v58 = vshra.s32 %v8341_v50, 16 }
 0x683   :  { %v8347_v16 = vsel %vm2437_vm8, 2147483647, %v8097_v26  ;;  %5859 = vmatprep.mubr.msk.f32.mxu1 %vm2437_vm8, %v9800_v3 }
 0x684   :  { %5860 = vmatmul.mubr.msk.f32.gmra.mrb[4].mxu1 %vm2438_vm7, %v9800_v3  ;;  %v8351_v14 = vcvt.s32.f32 %v2729_v58  ;;  %v2715_v53 = vshra.s32 %v8347_v16, 16 }
 0x686   :  { %2732 = vmin.xlane.f32.xlu0 %v8351_v14  ;;  %v8355_v39 = vcvt.s32.f32 %v2715_v53 }
 0x688   :  { %2718 = vmin.xlane.f32.xlu1 %v8355_v39 }
 0x68d   :  { %v2316_v26 = vpop.xlane.xlu0 %2315 }
 0x68e   :  { %v2317_v21 = vcvt.f32.s32 %v2316_v26 }
 0x690   :  { %v2320_v46 = vadd.s32 %v2319_v59, %v2317_v21  ;;  %v2302_v10 = vpop.xlane.xlu1 %2301  ;;  %v2360_v59 = vcvt.f32.s32 %v8274_v19 }
 0x691   :  { %v2303_v28 = vcvt.f32.s32 %v2302_v10 }
 0x692   :  { %vm2440_vm9 = vcmp.eq.s32.totalorder %v8120_v30, %v2320_v46 }
 0x693   :  { %v2306_v5 = vadd.s32 %v2305_v48, %v2303_v28  ;;  %v8362_v44 = vsel %vm2440_vm9, 2147483647, %v8120_v30  ;;  %v2346_v30 = vcvt.f32.s32 %v8260_v12  ;;  %v2361_v28 = vshll.u32 %v2360_v59, 16 }
 0x694   :  { %v2757_v52 = vshra.s32 %v8362_v44, 16 }
 0x695   :  { %vm2439_vm10 = vcmp.eq.s32.totalorder %v8126_v25, %v2306_v5  ;;  %v2347_v60 = vshll.u32 %v2346_v30, 16 }
 0x696   :  { %v8367_v54 = vsel %vm2439_vm10, 2147483647, %v8126_v25  ;;  %5862 = vmatprep.mubr.msk.f32.mxu1 %vm2439_vm10, %v9800_v3  ;;  %v8370_v17 = vcvt.s32.f32 %v2757_v52 }
 0x697   :  { %5863 = vmatmul.mubr.msk.f32.gmra.mrb[6].mxu1 %vm2440_vm9, %v9800_v3  ;;  %v2743_v41 = vshra.s32 %v8367_v54, 16 }
 0x698   :  { %2760 = vmin.xlane.f32.xlu0 %v8370_v17 }
 0x699   :  { %v8375_v36 = vcvt.s32.f32 %v2743_v41 }
 0x69b   :  { %2746 = vmin.xlane.f32.xlu1 %v8375_v36 }
 0x6a0   :  { %v2344_v25 = vpop.xlane.xlu0 %2343 }
 0x6a1   :  { %v2345_v20 = vcvt.f32.s32 %v2344_v25 }
 0x6a3   :  { %v2348_v13 = vadd.s32 %v2347_v60, %v2345_v20  ;;  %v2330_v32 = vpop.xlane.xlu1 %2329  ;;  %v2388_v60 = vcvt.f32.s32 %v8284_v47 }
 0x6a4   :  { %v2331_v6 = vcvt.f32.s32 %v2330_v32 }
 0x6a5   :  { %vm2442_vm11 = vcmp.eq.s32.totalorder %v8142_v43, %v2348_v13 }
 0x6a6   :  { %v2334_v58 = vadd.s32 %v2333_v55, %v2331_v6  ;;  %v8382_v53 = vsel %vm2442_vm11, 2147483647, %v8142_v43  ;;  %v2374_v43 = vcvt.f32.s32 %v8270_v31  ;;  %v2389_v6 = vshll.u32 %v2388_v60, 16 }
 0x6a7   :  { %v2785_v0 = vshra.s32 %v8382_v53, 16 }
 0x6a8   :  { %vm2441_vm13 = vcmp.eq.s32.totalorder %v8147_v4, %v2334_v58  ;;  %v2375_v21 = vshll.u32 %v2374_v43, 16 }
 0x6a9   :  { %v8387_v12 = vsel %vm2441_vm13, 2147483647, %v8147_v4  ;;  %5865 = vmatprep.mubr.msk.f32.mxu1 %vm2441_vm13, %v9800_v3  ;;  %v8390_v15 = vcvt.s32.f32 %v2785_v0 }
 0x6aa   :  { %5866 = vmatmul.mubr.msk.f32.gmra.mrb[8].mxu1 %vm2442_vm11, %v9800_v3  ;;  %v2771_v63 = vshra.s32 %v8387_v12, 16 }
 0x6ab   :  { %2788 = vmin.xlane.f32.xlu0 %v8390_v15 }
 0x6ac   :  { %v8395_v26 = vcvt.s32.f32 %v2771_v63 }
 0x6ae   :  { %2774 = vmin.xlane.f32.xlu1 %v8395_v26 }
 0x6b3   :  { %v2372_v4 = vpop.xlane.xlu0 %2371 }
 0x6b4   :  { %v2373_v46 = vcvt.f32.s32 %v2372_v4 }
 0x6b6   :  { %v2376_v10 = vadd.s32 %v2375_v21, %v2373_v46  ;;  %v2358_v48 = vpop.xlane.xlu1 %2357  ;;  %v2416_v21 = vcvt.f32.s32 %v8294_v27 }
 0x6b7   :  { %v2359_v5 = vcvt.f32.s32 %v2358_v48 }
 0x6b8   :  { %vm2444_vm12 = vcmp.eq.s32.totalorder %v8162_v1, %v2376_v10 }
 0x6b9   :  { %v2362_v52 = vadd.s32 %v2361_v28, %v2359_v5  ;;  %v8402_v41 = vsel %vm2444_vm12, 2147483647, %v8162_v1  ;;  %v2402_v1 = vcvt.f32.s32 %v8280_v33  ;;  %v2417_v5 = vshll.u32 %v2416_v21, 16 }
 0x6ba   :  { %v2813_v30 = vshra.s32 %v8402_v41, 16 }
 0x6bb   :  { %vm2443_vm14 = vcmp.eq.s32.totalorder %v8167_v37, %v2362_v52  ;;  %v2403_v20 = vshll.u32 %v2402_v1, 16 }
 0x6bc   :  { %v8407_v31 = vsel %vm2443_vm14, 2147483647, %v8167_v37  ;;  %5868 = vmatprep.mubr.msk.f32.mxu1 %vm2443_vm14, %v9800_v3  ;;  %v8410_v19 = vcvt.s32.f32 %v2813_v30 }
 0x6bd   :  { %5869 = vmatmul.mubr.msk.f32.gmra.mrb[10].mxu1 %vm2444_vm12, %v9800_v3  ;;  %v2799_v38 = vshra.s32 %v8407_v31, 16 }
 0x6be   :  { %2816 = vmin.xlane.f32.xlu0 %v8410_v19 }
 0x6bf   :  { %v8415_v25 = vcvt.s32.f32 %v2799_v38 }
 0x6c1   :  { %2802 = vmin.xlane.f32.xlu1 %v8415_v25 }
 0x6c6   :  { %v2400_v37 = vpop.xlane.xlu0 %2399 }
 0x6c7   :  { %v2401_v13 = vcvt.f32.s32 %v2400_v37 }
 0x6c9   :  { %v2404_v32 = vadd.s32 %v2403_v20, %v2401_v13  ;;  %v2386_v55 = vpop.xlane.xlu1 %2385  ;;  %v2672_v20 = vand.u32 65535, %v8310_v22 }
 0x6ca   :  { %v2387_v58 = vcvt.f32.s32 %v2386_v55 }
 0x6cb   :  { %vm2446_vm15 = vcmp.eq.s32.totalorder %v8182_v34, %v2404_v32  ;;  %v2686_v32 = vand.u32 65535, %v8320_v51 }
 0x6cc   :  { %v2390_v0 = vadd.s32 %v2389_v6, %v2387_v58  ;;  %v8422_v63 = vsel %vm2446_vm15, 2147483647, %v8182_v34  ;;  %v2430_v34 = vcvt.f32.s32 %v8290_v40  ;;  %v2674_v6 = vcvt.s32.f32 %v2672_v20 }
 0x6cd   :  { %v2841_v43 = vshra.s32 %v8422_v63, 16  ;;  %v2700_v58 = vand.u32 65535, %v8328_v24 }
 0x6ce   :  { %vm2445_vm0 = vcmp.eq.s32.totalorder %v8187_v62, %v2390_v0  ;;  %v2431_v46 = vshll.u32 %v2430_v34, 16  ;;  %v2688_v34 = vcvt.s32.f32 %v2686_v32  ;;  %v2784_v32 = vand.u32 65535, %v8382_v53 }
 0x6cf   :  { %v8427_v33 = vsel %vm2445_vm0, 2147483647, %v8187_v62  ;;  %5871 = vmatprep.mubr.msk.f32.mxu1 %vm2445_vm0, %v9800_v3  ;;  %v8430_v47 = vcvt.s32.f32 %v2841_v43 }
 0x6d0   :  { %5872 = vmatmul.mubr.msk.f32.gmra.mrb[12].mxu1 %vm2446_vm15, %v9800_v3  ;;  %v2827_v59 = vshra.s32 %v8427_v33, 16 }
 0x6d1   :  { %2844 = vmin.xlane.f32.xlu0 %v8430_v47 }
 0x6d2   :  { %v8435_v4 = vcvt.s32.f32 %v2827_v59 }
 0x6d4   :  { %2830 = vmin.xlane.f32.xlu1 %v8435_v4 }
 0x6d9   :  { %v2428_v62 = vpop.xlane.xlu0 %2427 }
 0x6da   :  { %v2429_v10 = vcvt.f32.s32 %v2428_v62  ;;  %v2702_v62 = vcvt.s32.f32 %v2700_v58 }
 0x6dc   :  { %v2432_v48 = vadd.s32 %v2431_v46, %v2429_v10  ;;  %v2414_v28 = vpop.xlane.xlu1 %2413  ;;  %v2714_v10 = vand.u32 65535, %v8347_v16 }
 0x6dd   :  { %v2415_v52 = vcvt.f32.s32 %v2414_v28 }
 0x6de   :  { %vm2448_vm1 = vcmp.eq.s32.totalorder %v8202_v8, %v2432_v48 }
 0x6df   :  { %v2418_v30 = vadd.s32 %v2417_v5, %v2415_v52  ;;  %v8442_v38 = vsel %vm2448_vm1, 2147483647, %v8202_v8  ;;  %v2658_v8 = vand.u32 65535, %v8306_v61  ;;  %v2716_v52 = vcvt.s32.f32 %v2714_v10 }
 0x6e0   :  { %v2869_v1 = vshra.s32 %v8442_v38, 16 }
 0x6e1   :  { %vm2447_vm2 = vcmp.eq.s32.totalorder %v8207_v9, %v2418_v30  ;;  %v2660_v13 = vcvt.s32.f32 %v2658_v8  ;;  %v2756_v30 = vand.u32 65535, %v8362_v44 }
 0x6e2   :  { %v8447_v40 = vsel %vm2447_vm2, 2147483647, %v8207_v9  ;;  %5874 = vmatprep.mubr.msk.f32.mxu1 %vm2447_vm2, %v9800_v3  ;;  %v8450_v27 = vcvt.s32.f32 %v2869_v1  ;;  %v2742_v1 = vand.u32 65535, %v8367_v54 }
 0x6e3   :  { %5875 = vmatmul.mubr.msk.f32.gmra.mrb[14].mxu1 %vm2448_vm1, %v9800_v3  ;;  %v2855_v60 = vshra.s32 %v8447_v40, 16  ;;  %v2758_v8 = vcvt.s32.f32 %v2756_v30 }
 0x6e4   :  { %2872 = vmin.xlane.f32.xlu0 %v8450_v27 }
 0x6e5   :  { %v8455_v37 = vcvt.s32.f32 %v2855_v60 }
 0x6e7   :  { %2858 = vmin.xlane.f32.xlu1 %v8455_v37 }
 0x70a   :  { %v8460_v9 = vpop.xlane.xlu1 %2662 }
 0x70b   :  { %v8463_v55 = vpop.xlane.xlu0 %2676  ;;  %vm2664_vm3 = vcmp.eq.f32.partialorder %v8317_v57, %v8460_v9  ;;  %v2728_v57 = vand.u32 65535, %v8341_v50 }
 0x70c   :  { %v2665_v0 = vsel %vm2664_vm3, %v2660_v13, inf  ;;  %vm2678_vm4 = vcmp.eq.f32.partialorder %v8324_v23, %v8463_v55  ;;  %v2744_v13 = vcvt.s32.f32 %v2742_v1 }
 0x70d   :  { %2666 = vmin.xlane.f32.xlu1 %v2665_v0  ;;  %v2679_v43 = vsel %vm2678_vm4, %v2674_v6, inf  ;;  %v2730_v28 = vcvt.s32.f32 %v2728_v57  ;;  %v2770_v6 = vand.u32 65535, %v8387_v12  ;;  %v2786_v0 = vcvt.s32.f32 %v2784_v32 }
 0x70e   :  { %v8470_v59 = vpop.xlane.xlu1 %2690  ;;  %2680 = vmin.xlane.f32.xlu0 %v2679_v43  ;;  %v2798_v57 = vand.u32 65535, %v8407_v31 }
 0x70f   :  { %v8472_v21 = vpop.xlane.xlu0 %2704  ;;  %vm2692_vm5 = vcmp.eq.f32.partialorder %v8334_v18, %v8470_v59 }
 0x710   :  { %v2693_v46 = vsel %vm2692_vm5, %v2688_v34, inf  ;;  %vm2706_vm6 = vcmp.eq.f32.partialorder %v8336_v7, %v8472_v21  ;;  %v2772_v34 = vcvt.s32.f32 %v2770_v6 }
 0x711   :  { %2694 = vmin.xlane.f32.xlu1 %v2693_v46  ;;  %v2707_v23 = vsel %vm2706_vm6, %v2702_v62, inf  ;;  %v2812_v62 = vand.u32 65535, %v8402_v41 }
 0x712   :  { %2708 = vmin.xlane.f32.xlu0 %v2707_v23 }
 0x713   :  { %v8480_v48 = vpop.xlane.xlu0 %2732  ;;  %v2814_v23 = vcvt.s32.f32 %v2812_v62  ;;  %v2854_v62 = vand.u32 65535, %v8447_v40 }
 0x714   :  { %vm2734_vm7 = vcmp.eq.f32.partialorder %v8351_v14, %v8480_v48 }
 0x715   :  { %v8484_v5 = vpop.xlane.xlu1 %2718  ;;  %v2735_v18 = vsel %vm2734_vm7, %v2730_v28, inf }
 0x716   :  { %2736 = vmin.xlane.f32.xlu0 %v2735_v18  ;;  %vm2720_vm8 = vcmp.eq.f32.partialorder %v8355_v39, %v8484_v5 }
 0x717   :  { %v2721_v7 = vsel %vm2720_vm8, %v2716_v52, inf }
 0x718   :  { %2722 = vmin.xlane.f32.xlu1 %v2721_v7 }
 0x725   :  { %v8490_v60 = vpop.xlane.xlu0 %2760 }
 0x726   :  { %vm2762_vm9 = vcmp.eq.f32.partialorder %v8370_v17, %v8490_v60 }
 0x727   :  { %v2763_v14 = vsel %vm2762_vm9, %v2758_v8, inf }
 0x728   :  { %v8494_v20 = vpop.xlane.xlu1 %2746  ;;  %2764 = vmin.xlane.f32.xlu0 %v2763_v14  ;;  %v2826_v14 = vand.u32 65535, %v8427_v33 }
 0x729   :  { %vm2748_vm10 = vcmp.eq.f32.partialorder %v8375_v36, %v8494_v20 }
 0x72a   :  { %v2749_v39 = vsel %vm2748_vm10, %v2744_v13, inf  ;;  %v2828_v6 = vcvt.s32.f32 %v2826_v14 }
 0x72b   :  { %2750 = vmin.xlane.f32.xlu1 %v2749_v39 }
 0x738   :  { %v8500_v58 = vpop.xlane.xlu0 %2788 }
 0x739   :  { %vm2790_vm11 = vcmp.eq.f32.partialorder %v8390_v15, %v8500_v58 }
 0x73a   :  { %v2791_v17 = vsel %vm2790_vm11, %v2786_v0, inf }
 0x73b   :  { %v8504_v43 = vpop.xlane.xlu1 %2774  ;;  %2792 = vmin.xlane.f32.xlu0 %v2791_v17 }
 0x73c   :  { %vm2776_vm13 = vcmp.eq.f32.partialorder %v8395_v26, %v8504_v43  ;;  %v2800_v26 = vcvt.s32.f32 %v2798_v57 }
 0x73d   :  { %v2777_v36 = vsel %vm2776_vm13, %v2772_v34, inf }
 0x73e   :  { %2778 = vmin.xlane.f32.xlu1 %v2777_v36  ;;  %v2868_v36 = vand.u32 65535, %v8442_v38 }
 0x74b   :  { %v8510_v46 = vpop.xlane.xlu0 %2816 }
 0x74c   :  { %v8512_v10 = vpop.f32.mrb[0].mxu1  ;;  %vm2818_vm12 = vcmp.eq.f32.partialorder %v8410_v19, %v8510_v46  ;;  %v2840_v19 = vand.u32 65535, %v8422_v63 }
 0x74d   :  { %v8516_v15 = vpop.f32.mrb[1].mxu1  ;;  %v2819_v28 = vsel %vm2818_vm12, %v2814_v23, inf }
 0x74e   :  { %v8518_v18 = vpop.xlane.xlu1 %2802  ;;  %2820 = vmin.xlane.f32.xlu0 %v2819_v28  ;;  %v2842_v39 = vcvt.s32.f32 %v2840_v19 }
 0x74f   :  { %vm2804_vm14 = vcmp.eq.f32.partialorder %v8415_v25, %v8518_v18 }
 0x750   :  { %v8522_v52 = vpop.f32.mrb[2].mxu1  ;;  %v2805_v7 = vsel %vm2804_vm14, %v2800_v26, inf }
 0x751   :  { %2806 = vmin.xlane.f32.xlu1 %v2805_v7  ;;  %v8524_v30 = vpop.f32.mrb[3].mxu1 }
 0x757   :  { %v8526_v1 = vpop.f32.mrb[4].mxu1 }
 0x758   :  { %v8528_v8 = vpop.f32.mrb[5].mxu1 }
 0x75e   :  { %v8532_v13 = vpop.xlane.xlu0 %2844 }
 0x75f   :  { %vm2846_vm15 = vcmp.eq.f32.partialorder %v8430_v47, %v8532_v13  ;;  %v2870_v47 = vcvt.s32.f32 %v2868_v36  ;;  %v2697_v36 = vcvt.f32.s32 %v8470_v59 }
 0x760   :  { %v2847_v25 = vsel %vm2846_vm15, %v2842_v39, inf }
 0x761   :  { %v8536_v32 = vpop.xlane.xlu1 %2830  ;;  %2848 = vmin.xlane.f32.xlu0 %v2847_v25  ;;  %v2683_v25 = vcvt.f32.s32 %v8463_v55 }
 0x762   :  { %vm2832_vm0 = vcmp.eq.f32.partialorder %v8435_v4, %v8536_v32  ;;  %v2856_v4 = vcvt.s32.f32 %v2854_v62 }
 0x763   :  { %v2833_v0 = vsel %vm2832_vm0, %v2828_v6, inf }
 0x764   :  { %2834 = vmin.xlane.f32.xlu1 %v2833_v0 }
 0x76a   :  { %v8540_v17 = vpop.f32.mrb[6].mxu1 }
 0x76b   :  { %v8542_v34 = vpop.f32.mrb[7].mxu1 }
 0x76c   :  { %9853 = vst [vmem:[#allocation3_spill] sm:$0xff] %v8542_v34 }
 0x771   :  { %v8546_v57 = vpop.xlane.xlu0 %2872 }
 0x772   :  { %vm2874_vm1 = vcmp.eq.f32.partialorder %v8450_v27, %v8546_v57  ;;  %v2669_v27 = vcvt.f32.s32 %v8460_v9 }
 0x773   :  { %v2875_v23 = vsel %vm2874_vm1, %v2870_v47, inf  ;;  %v2684_v47 = vshll.u32 %v2683_v25, 16 }
 0x774   :  { %v8550_v28 = vpop.xlane.xlu1 %2858  ;;  %2876 = vmin.xlane.f32.xlu0 %v2875_v23  ;;  %v2670_v0 = vshll.u32 %v2669_v27, 16  ;;  %v2711_v23 = vcvt.f32.s32 %v8472_v21 }
 0x775   :  { %vm2860_vm2 = vcmp.eq.f32.partialorder %v8455_v37, %v8550_v28 }
 0x776   :  { %v2861_v26 = vsel %vm2860_vm2, %v2856_v4, inf  ;;  %v2712_v55 = vshll.u32 %v2711_v23, 16 }
 0x777   :  { %2862 = vmin.xlane.f32.xlu1 %v2861_v26 }
 0x77d   :  { %v8554_v7 = vpop.f32.mrb[8].mxu1 }
 0x77e   :  { %9854 = vst [vmem:[#allocation15_spill] sm:$0xff] %v8554_v7  ;;  %v8556_v19 = vpop.f32.mrb[9].mxu1 }
 0x77f   :  { %9855 = vst [vmem:[#allocation2_spill] sm:$0xff] %v8556_v19 }
 0x790   :  { %v8558_v14 = vpop.f32.mrb[10].mxu1 }
 0x791   :  { %9856 = vst [vmem:[#allocation14_spill] sm:$0xff] %v8558_v14  ;;  %v8560_v39 = vpop.f32.mrb[11].mxu1  ;;  %v2698_v14 = vshll.u32 %v2697_v36, 16 }
 0x792   :  { %9857 = vst [vmem:[#allocation5_spill] sm:$0xff] %v8560_v39  ;;  %v2739_v39 = vcvt.f32.s32 %v8480_v48 }
 0x79a   :  { %v2667_v6 = vpop.xlane.xlu1 %2666 }
 0x79b   :  { %v2668_v62 = vcvt.f32.s32 %v2667_v6  ;;  %v2681_v37 = vpop.xlane.xlu0 %2680  ;;  %v9858_v6 = vmov 1.0  }
 0x79c   :  { %v2682_v4 = vcvt.f32.s32 %v2681_v37 }
 0x79d   :  { %v2671_v26 = vadd.s32 %v2670_v0, %v2668_v62 }
 0x79e   :  { %v2685_v3 = vadd.s32 %v2684_v47, %v2682_v4  ;;  %v2695_v19 = vpop.xlane.xlu1 %2694 }
 0x79f   :  { %v2696_v7 = vcvt.f32.s32 %v2695_v19  ;;  %v2709_v9 = vpop.xlane.xlu0 %2708  ;;  %vm2882_vm3 = vcmp.eq.s32.totalorder %v8306_v61, %v2671_v26  ;;  %v2725_v19 = vcvt.f32.s32 %v8484_v5 }
 0x7a0   :  { %v2710_v27 = vcvt.f32.s32 %v2709_v9  ;;  %v8569_v59 = vsel %vm2882_vm3, 2147483647, %v8306_v61  ;;  %5909 = vmatprep.mubr.msk.f32.mxu0 %vm2882_vm3, %v9858_v6  ;;  %vm2883_vm4 = vcmp.eq.s32.totalorder %v8310_v22, %v2685_v3  ;;  %v2740_v61 = vshll.u32 %v2739_v39, 16 }
 0x7a1   :  { %v2699_v21 = vadd.s32 %v2698_v14, %v2696_v7  ;;  %v8574_v25 = vsel %vm2883_vm4, 2147483647, %v8310_v22  ;;  %5910 = vmatmul.mubr.msk.f32.vlgmr.msra.gmra.mrb[0].mxu0 %vm2883_vm4, %v9858_v6  ;;  %v3108_v48 = vshra.s32 %v8569_v59, 16  ;;  %v2726_v4 = vshll.u32 %v2725_v19, 16 }
 0x7a2   :  { %v2713_v0 = vadd.s32 %v2712_v55, %v2710_v27  ;;  %v3122_v36 = vshra.s32 %v8574_v25, 16  ;;  %6352 = vmatpush3.bf16.msra.mxu0 %v7282_v42 }
 0x7a3   :  { %v8581_v62 = vpop.f32.mrb[12].mxu1  ;;  %v2737_v37 = vpop.xlane.xlu0 %2736  ;;  %vm2884_vm5 = vcmp.eq.s32.totalorder %v8320_v51, %v2699_v21  ;;  %v8584_v3 = vcvt.s32.f32 %v3108_v48  ;;  %6354 = vmatprep.subr.bf16.mxu0 %v7287_v11 }
 0x7a4   :  { %9859 = vst [vmem:[#allocation17_spill] sm:$0xff] %v8581_v62  ;;  %v2738_v22 = vcvt.f32.s32 %v2737_v37  ;;  %v8587_v7 = vpop.f32.mrb[13].mxu1  ;;  %v8590_v5 = vsel %vm2884_vm5, 2147483647, %v8320_v51  ;;  %5912 = vmatprep.mubr.msk.f32.mxu0 %vm2884_vm5, %v9858_v6  ;;  %vm2885_vm6 = vcmp.eq.s32.totalorder %v8328_v24, %v2713_v0  ;;  %v8594_v14 = vcvt.s32.f32 %v3122_v36 }
 0x7a5   :  { %9860 = vst [vmem:[#allocation4_spill] sm:$0xff] %v8587_v7  ;;  %3111 = vmin.xlane.f32.xlu1 %v8584_v3  ;;  %v2723_v39 = vpop.xlane.xlu1 %2722  ;;  %v8598_v47 = vsel %vm2885_vm6, 2147483647, %v8328_v24  ;;  %5913 = vmatmul.mubr.msk.f32.gmra.mrb[2].mxu0 %vm2885_vm6, %v9858_v6  ;;  %v3136_v23 = vshra.s32 %v8590_v5, 16 }
 0x7a6   :  { %v2741_v26 = vadd.s32 %v2740_v61, %v2738_v22  ;;  %v2724_v51 = vcvt.f32.s32 %v2723_v39  ;;  %3125 = vmin.xlane.f32.xlu0 %v8594_v14  ;;  %v3150_v9 = vshra.s32 %v8598_v47, 16  ;;  %6356 = vmatpush3.bf16.msra.mxu0 %v7287_v11  ;;  %v2753_v61 = vcvt.f32.s32 %v8494_v20 }
 0x7a7   :  { %v8605_v55 = vcvt.s32.f32 %v3136_v23  ;;  %6358 = vmatprep.subr.bf16.mxu0 %v7300_v56 }
 0x7a8   :  { %v2727_v27 = vadd.s32 %v2726_v4, %v2724_v51  ;;  %v8608_v24 = vcvt.s32.f32 %v3150_v9  ;;  %vm2887_vm7 = vcmp.eq.s32.totalorder %v8341_v50, %v2741_v26 }
 0x7a9   :  { %3139 = vmin.xlane.f32.xlu1 %v8605_v55  ;;  %v8613_v21 = vsel %vm2887_vm7, 2147483647, %v8341_v50 }
 0x7aa   :  { %3153 = vmin.xlane.f32.xlu0 %v8608_v24  ;;  %vm2886_vm8 = vcmp.eq.s32.totalorder %v8347_v16, %v2727_v27  ;;  %v3178_v48 = vshra.s32 %v8613_v21, 16  ;;  %6360 = vmatpush3.bf16.msra.mxu0 %v7300_v56 }
 0x7ab   :  { %v8620_v19 = vsel %vm2886_vm8, 2147483647, %v8347_v16  ;;  %5915 = vmatprep.mubr.msk.f32.mxu0 %vm2886_vm8, %v9858_v6  ;;  %6362 = vmatprep.subr.bf16.mxu0 %v7312_v49  ;;  %v2767_v16 = vcvt.f32.s32 %v8490_v60  ;;  %v2754_v60 = vshll.u32 %v2753_v61, 16 }
 0x7ac   :  { %5916 = vmatmul.mubr.msk.f32.gmra.mrb[4].mxu0 %vm2887_vm7, %v9858_v6  ;;  %v8625_v0 = vcvt.s32.f32 %v3178_v48  ;;  %v3164_v50 = vshra.s32 %v8620_v19, 16 }
 0x7ad   :  { %v2768_v22 = vshll.u32 %v2767_v16, 16 }
 0x7ae   :  { %3181 = vmin.xlane.f32.xlu0 %v8625_v0  ;;  %v8629_v36 = vcvt.s32.f32 %v3164_v50  ;;  %6364 = vmatpush3.bf16.msra.mxu0 %v7312_v49 }
 0x7af   :  { %6366 = vmatprep.subr.bf16.mxu0 %v7324_v35 }
 0x7b0   :  { %3167 = vmin.xlane.f32.xlu1 %v8629_v36 }
 0x7b2   :  { %6368 = vmatpush3.bf16.msra.mxu0 %v7324_v35 }
 0x7b3   :  { %6370 = vmatprep.subr.bf16.mxu0 %v7338_v45 }
 0x7b5   :  { %v2765_v37 = vpop.xlane.xlu0 %2764 }
 0x7b6   :  { %v2766_v39 = vcvt.f32.s32 %v2765_v37  ;;  %v8638_v23 = vpop.f32.mrb[14].mxu1  ;;  %6372 = vmatpush3.bf16.msra.mxu0 %v7338_v45  ;;  %v2781_v37 = vcvt.f32.s32 %v8504_v43 }
 0x7b7   :  { %9861 = vst [vmem:[#allocation16_spill] sm:$0xff] %v8638_v23  ;;  %v8641_v4 = vpop.f32.mrb[15].mxu1  ;;  %6374 = vmatprep.subr.bf16.mxu0 %v7360_v29 }
 0x7b8   :  { %9862 = vst [vmem:[#allocation7_spill] sm:$0xff] %v8641_v4  ;;  %v2769_v26 = vadd.s32 %v2768_v22, %v2766_v39  ;;  %v2751_v51 = vpop.xlane.xlu1 %2750 }
 0x7b9   :  { %v2752_v9 = vcvt.f32.s32 %v2751_v51 }
 0x7ba   :  { %vm2889_vm9 = vcmp.eq.s32.totalorder %v8362_v44, %v2769_v26  ;;  %6376 = vmatpush3.bf16.msra.mxu0 %v7360_v29 }
 0x7bb   :  { %v2755_v20 = vadd.s32 %v2754_v60, %v2752_v9  ;;  %v8647_v27 = vsel %vm2889_vm9, 2147483647, %v8362_v44  ;;  %6378 = vmatprep.subr.bf16.mxu0 %v7393_v2  ;;  %v2782_v9 = vshll.u32 %v2781_v37, 16 }
 0x7bc   :  { %v3206_v48 = vshra.s32 %v8647_v27, 16 }
 0x7bd   :  { %vm2888_vm10 = vcmp.eq.s32.totalorder %v8367_v54, %v2755_v20 }
 0x7be   :  { %v8653_v50 = vsel %vm2888_vm10, 2147483647, %v8367_v54  ;;  %5918 = vmatprep.mubr.msk.f32.mxu0 %vm2888_vm10, %v9858_v6  ;;  %v8656_v16 = vcvt.s32.f32 %v3206_v48  ;;  %6380 = vmatpush3.bf16.msra.mxu0 %v7393_v2  ;;  %v2795_v54 = vcvt.f32.s32 %v8500_v58 }
 0x7bf   :  { %5919 = vmatmul.mubr.msk.f32.gmra.mrb[6].mxu0 %vm2889_vm9, %v9858_v6  ;;  %v3192_v44 = vshra.s32 %v8653_v50, 16  ;;  %6382 = vmatprep.subr.bf16.mxu0 %v7282_v42 }
 0x7c0   :  { %3209 = vmin.xlane.f32.xlu0 %v8656_v16  ;;  %v2796_v39 = vshll.u32 %v2795_v54, 16 }
 0x7c1   :  { %v8663_v61 = vcvt.s32.f32 %v3192_v44 }
 0x7c3   :  { %3195 = vmin.xlane.f32.xlu1 %v8663_v61 }
 0x7c8   :  { %v2793_v22 = vpop.xlane.xlu0 %2792 }
 0x7c9   :  { %v2794_v26 = vcvt.f32.s32 %v2793_v22  ;;  %v2809_v22 = vcvt.f32.s32 %v8518_v18 }
 0x7cb   :  { %v2797_v51 = vadd.s32 %v2796_v39, %v2794_v26  ;;  %v2779_v60 = vpop.xlane.xlu1 %2778 }
 0x7cc   :  { %v2780_v20 = vcvt.f32.s32 %v2779_v60 }
 0x7cd   :  { %vm2891_vm11 = vcmp.eq.s32.totalorder %v8382_v53, %v2797_v51 }
 0x7ce   :  { %v2783_v48 = vadd.s32 %v2782_v9, %v2780_v20  ;;  %v8670_v4 = vsel %vm2891_vm11, 2147483647, %v8382_v53  ;;  %v2823_v53 = vcvt.f32.s32 %v8510_v46  ;;  %v2810_v9 = vshll.u32 %v2809_v22, 16 }
 0x7cf   :  { %v3234_v44 = vshra.s32 %v8670_v4, 16 }
 0x7d0   :  { %vm2890_vm13 = vcmp.eq.s32.totalorder %v8387_v12, %v2783_v48  ;;  %v2824_v39 = vshll.u32 %v2823_v53, 16 }
 0x7d1   :  { %v8675_v58 = vsel %vm2890_vm13, 2147483647, %v8387_v12  ;;  %5921 = vmatprep.mubr.msk.f32.mxu0 %vm2890_vm13, %v9858_v6  ;;  %v8678_v43 = vcvt.s32.f32 %v3234_v44 }
 0x7d2   :  { %5922 = vmatmul.mubr.msk.f32.gmra.mrb[8].mxu0 %vm2891_vm11, %v9858_v6  ;;  %v3220_v54 = vshra.s32 %v8675_v58, 16 }
 0x7d3   :  { %3237 = vmin.xlane.f32.xlu0 %v8678_v43 }
 0x7d4   :  { %v8683_v37 = vcvt.s32.f32 %v3220_v54 }
 0x7d6   :  { %3223 = vmin.xlane.f32.xlu1 %v8683_v37 }
 0x7db   :  { %v2821_v12 = vpop.xlane.xlu0 %2820 }
 0x7dc   :  { %v2822_v26 = vcvt.f32.s32 %v2821_v12  ;;  %v2837_v12 = vcvt.f32.s32 %v8536_v32 }
 0x7de   :  { %v2825_v51 = vadd.s32 %v2824_v39, %v2822_v26  ;;  %v2807_v60 = vpop.xlane.xlu1 %2806 }
 0x7df   :  { %v2808_v20 = vcvt.f32.s32 %v2807_v60 }
 0x7e0   :  { %vm2893_vm12 = vcmp.eq.s32.totalorder %v8402_v41, %v2825_v51 }
 0x7e1   :  { %v2811_v48 = vadd.s32 %v2810_v9, %v2808_v20  ;;  %v8690_v44 = vsel %vm2893_vm12, 2147483647, %v8402_v41  ;;  %v2851_v41 = vcvt.f32.s32 %v8532_v13  ;;  %v2838_v9 = vshll.u32 %v2837_v12, 16 }
 0x7e2   :  { %v3262_v54 = vshra.s32 %v8690_v44, 16 }
 0x7e3   :  { %vm2892_vm14 = vcmp.eq.s32.totalorder %v8407_v31, %v2811_v48  ;;  %v2852_v39 = vshll.u32 %v2851_v41, 16 }
 0x7e4   :  { %v8695_v46 = vsel %vm2892_vm14, 2147483647, %v8407_v31  ;;  %5924 = vmatprep.mubr.msk.f32.mxu0 %vm2892_vm14, %v9858_v6  ;;  %v8698_v18 = vcvt.s32.f32 %v3262_v54 }
 0x7e5   :  { %5925 = vmatmul.mubr.msk.f32.gmra.mrb[10].mxu0 %vm2893_vm12, %v9858_v6  ;;  %v3248_v53 = vshra.s32 %v8695_v46, 16 }
 0x7e6   :  { %3265 = vmin.xlane.f32.xlu0 %v8698_v18 }
 0x7e7   :  { %v8703_v22 = vcvt.s32.f32 %v3248_v53 }
 0x7e9   :  { %3251 = vmin.xlane.f32.xlu1 %v8703_v22 }
 0x7ee   :  { %v2849_v31 = vpop.xlane.xlu0 %2848 }
 0x7ef   :  { %v2850_v26 = vcvt.f32.s32 %v2849_v31  ;;  %v2865_v31 = vcvt.f32.s32 %v8550_v28 }
 0x7f1   :  { %v2853_v51 = vadd.s32 %v2852_v39, %v2850_v26  ;;  %v2835_v60 = vpop.xlane.xlu1 %2834 }
 0x7f2   :  { %v2836_v20 = vcvt.f32.s32 %v2835_v60 }
 0x7f3   :  { %vm2895_vm15 = vcmp.eq.s32.totalorder %v8422_v63, %v2853_v51 }
 0x7f4   :  { %v2839_v48 = vadd.s32 %v2838_v9, %v2836_v20  ;;  %v8710_v54 = vsel %vm2895_vm15, 2147483647, %v8422_v63  ;;  %v2879_v63 = vcvt.f32.s32 %v8546_v57  ;;  %v2866_v9 = vshll.u32 %v2865_v31, 16 }
 0x7f5   :  { %v3290_v53 = vshra.s32 %v8710_v54, 16 }
 0x7f6   :  { %vm2894_vm0 = vcmp.eq.s32.totalorder %v8427_v33, %v2839_v48  ;;  %v2880_v39 = vshll.u32 %v2879_v63, 16 }
 0x7f7   :  { %v8715_v13 = vsel %vm2894_vm0, 2147483647, %v8427_v33  ;;  %5927 = vmatprep.mubr.msk.f32.mxu0 %vm2894_vm0, %v9858_v6  ;;  %v8718_v32 = vcvt.s32.f32 %v3290_v53 }
 0x7f8   :  { %5928 = vmatmul.mubr.msk.f32.gmra.mrb[12].mxu0 %vm2895_vm15, %v9858_v6  ;;  %v3276_v41 = vshra.s32 %v8715_v13, 16 }
 0x7f9   :  { %3293 = vmin.xlane.f32.xlu0 %v8718_v32 }
 0x7fa   :  { %v8723_v12 = vcvt.s32.f32 %v3276_v41 }
 0x7fc   :  { %3279 = vmin.xlane.f32.xlu1 %v8723_v12 }
 0x801   :  { %v2877_v33 = vpop.xlane.xlu0 %2876 }
 0x802   :  { %v2878_v26 = vcvt.f32.s32 %v2877_v33  ;;  %v3121_v33 = vand.u32 65535, %v8574_v25 }
 0x804   :  { %v2881_v51 = vadd.s32 %v2880_v39, %v2878_v26  ;;  %v2863_v60 = vpop.xlane.xlu1 %2862  ;;  %v3135_v26 = vand.u32 65535, %v8590_v5 }
 0x805   :  { %v2864_v20 = vcvt.f32.s32 %v2863_v60  ;;  %v3123_v60 = vcvt.s32.f32 %v3121_v33 }
 0x806   :  { %vm2897_vm1 = vcmp.eq.s32.totalorder %v8442_v38, %v2881_v51 }
 0x807   :  { %v2867_v48 = vadd.s32 %v2866_v9, %v2864_v20  ;;  %v8730_v53 = vsel %vm2897_vm1, 2147483647, %v8442_v38  ;;  %v3107_v38 = vand.u32 65535, %v8569_v59  ;;  %v3149_v9 = vand.u32 65535, %v8598_v47 }
 0x808   :  { %v3318_v41 = vshra.s32 %v8730_v53, 16 }
 0x809   :  { %vm2896_vm2 = vcmp.eq.s32.totalorder %v8447_v40, %v2867_v48  ;;  %v3109_v39 = vcvt.s32.f32 %v3107_v38  ;;  %v3151_v23 = vcvt.s32.f32 %v3149_v9 }
 0x80a   :  { %v8735_v57 = vsel %vm2896_vm2, 2147483647, %v8447_v40  ;;  %5930 = vmatprep.mubr.msk.f32.mxu0 %vm2896_vm2, %v9858_v6  ;;  %v8738_v28 = vcvt.s32.f32 %v3318_v41 }
 0x80b   :  { %5931 = vmatmul.mubr.msk.f32.gmra.mrb[14].mxu0 %vm2897_vm1, %v9858_v6  ;;  %v3304_v63 = vshra.s32 %v8735_v57, 16 }
 0x80c   :  { %3321 = vmin.xlane.f32.xlu0 %v8738_v28 }
 0x80d   :  { %v8743_v31 = vcvt.s32.f32 %v3304_v63  ;;  %v3137_v63 = vcvt.s32.f32 %v3135_v26 }
 0x80f   :  { %3307 = vmin.xlane.f32.xlu1 %v8743_v31 }
 0x832   :  { %v8748_v40 = vpop.xlane.xlu1 %3111 }
 0x833   :  { %v8751_v51 = vpop.xlane.xlu0 %3125  ;;  %vm3113_vm3 = vcmp.eq.f32.partialorder %v8584_v3, %v8748_v40  ;;  %v3177_v3 = vand.u32 65535, %v8613_v21 }
 0x834   :  { %v3114_v20 = vsel %vm3113_vm3, %v3109_v39, inf  ;;  %vm3127_vm4 = vcmp.eq.f32.partialorder %v8594_v14, %v8751_v51  ;;  %v3163_v39 = vand.u32 65535, %v8620_v19 }
 0x835   :  { %3115 = vmin.xlane.f32.xlu1 %v3114_v20  ;;  %v3128_v48 = vsel %vm3127_vm4, %v3123_v60, inf  ;;  %v3179_v26 = vcvt.s32.f32 %v3177_v3 }
 0x836   :  { %v8758_v41 = vpop.xlane.xlu1 %3139  ;;  %3129 = vmin.xlane.f32.xlu0 %v3128_v48  ;;  %v3165_v9 = vcvt.s32.f32 %v3163_v39  ;;  %v3191_v48 = vand.u32 65535, %v8653_v50  ;;  %v3233_v39 = vand.u32 65535, %v8670_v4 }
 0x837   :  { %v8760_v38 = vpop.xlane.xlu0 %3153  ;;  %vm3141_vm5 = vcmp.eq.f32.partialorder %v8605_v55, %v8758_v41 }
 0x838   :  { %v3142_v33 = vsel %vm3141_vm5, %v3137_v63, inf  ;;  %vm3155_vm6 = vcmp.eq.f32.partialorder %v8608_v24, %v8760_v38  ;;  %v3160_v7 = vcvt.f32.s32 %v8760_v38 }
 0x839   :  { %3143 = vmin.xlane.f32.xlu1 %v3142_v33  ;;  %v3156_v14 = vsel %vm3155_vm6, %v3151_v23, inf  ;;  %v3205_v23 = vand.u32 65535, %v8647_v27 }
 0x83a   :  { %3157 = vmin.xlane.f32.xlu0 %v3156_v14  ;;  %v3193_v14 = vcvt.s32.f32 %v3191_v48  ;;  %v3261_v48 = vand.u32 65535, %v8690_v44 }
 0x83b   :  { %v8768_v60 = vpop.xlane.xlu0 %3181  ;;  %v3207_v3 = vcvt.s32.f32 %v3205_v23 }
 0x83c   :  { %vm3183_vm7 = vcmp.eq.f32.partialorder %v8625_v0, %v8768_v60 }
 0x83d   :  { %v8772_v20 = vpop.xlane.xlu1 %3167  ;;  %v3184_v55 = vsel %vm3183_vm7, %v3179_v26, inf  ;;  %v3219_v26 = vand.u32 65535, %v8675_v58 }
 0x83e   :  { %3185 = vmin.xlane.f32.xlu0 %v3184_v55  ;;  %vm3169_vm8 = vcmp.eq.f32.partialorder %v8629_v36, %v8772_v20 }
 0x83f   :  { %v3170_v24 = vsel %vm3169_vm8, %v3165_v9, inf  ;;  %v3235_v9 = vcvt.s32.f32 %v3233_v39  ;;  %v3221_v23 = vcvt.s32.f32 %v3219_v26  ;;  %v3289_v26 = vand.u32 65535, %v8710_v54 }
 0x840   :  { %3171 = vmin.xlane.f32.xlu1 %v3170_v24 }
 0x84d   :  { %v8778_v63 = vpop.xlane.xlu0 %3209 }
 0x84e   :  { %vm3211_vm9 = vcmp.eq.f32.partialorder %v8656_v16, %v8778_v63 }
 0x84f   :  { %v3212_v0 = vsel %vm3211_vm9, %v3207_v3, inf  ;;  %v3247_v3 = vand.u32 65535, %v8695_v46 }
 0x850   :  { %v8782_v33 = vpop.xlane.xlu1 %3195  ;;  %3213 = vmin.xlane.f32.xlu0 %v3212_v0 }
 0x851   :  { %vm3197_vm10 = vcmp.eq.f32.partialorder %v8663_v61, %v8782_v33  ;;  %v3249_v39 = vcvt.s32.f32 %v3247_v3  ;;  %v3317_v3 = vand.u32 65535, %v8730_v53 }
 0x852   :  { %v3198_v36 = vsel %vm3197_vm10, %v3193_v14, inf  ;;  %v3263_v14 = vcvt.s32.f32 %v3261_v48 }
 0x853   :  { %3199 = vmin.xlane.f32.xlu1 %v3198_v36 }
 0x860   :  { %v8788_v55 = vpop.xlane.xlu0 %3237 }
 0x861   :  { %vm3239_vm11 = vcmp.eq.f32.partialorder %v8678_v43, %v8788_v55 }
 0x862   :  { %v3240_v16 = vsel %vm3239_vm11, %v3235_v9, inf  ;;  %v3275_v9 = vand.u32 65535, %v8715_v13 }
 0x863   :  { %v8792_v24 = vpop.xlane.xlu1 %3223  ;;  %3241 = vmin.xlane.f32.xlu0 %v3240_v16 }
 0x864   :  { %vm3225_vm13 = vcmp.eq.f32.partialorder %v8683_v37, %v8792_v24  ;;  %v3277_v48 = vcvt.s32.f32 %v3275_v9  ;;  %v3118_v9 = vcvt.f32.s32 %v8748_v40 }
 0x865   :  { %v3226_v61 = vsel %vm3225_vm13, %v3221_v23, inf  ;;  %v3291_v23 = vcvt.s32.f32 %v3289_v26 }
 0x866   :  { %3227 = vmin.xlane.f32.xlu1 %v3226_v61 }
 0x873   :  { %v8798_v0 = vpop.xlane.xlu0 %3265 }
 0x874   :  { %vm3267_vm12 = vcmp.eq.f32.partialorder %v8698_v18, %v8798_v0 }
 0x875   :  { %v3268_v43 = vsel %vm3267_vm12, %v3263_v14, inf  ;;  %v3303_v14 = vand.u32 65535, %v8735_v57 }
 0x876   :  { %v8802_v36 = vpop.xlane.xlu1 %3251  ;;  %3269 = vmin.xlane.f32.xlu0 %v3268_v43 }
 0x877   :  { %vm3253_vm14 = vcmp.eq.f32.partialorder %v8703_v22, %v8802_v36  ;;  %v3305_v26 = vcvt.s32.f32 %v3303_v14 }
 0x878   :  { %v3254_v37 = vsel %vm3253_vm14, %v3249_v39, inf  ;;  %v3319_v39 = vcvt.s32.f32 %v3317_v3 }
 0x879   :  { %3255 = vmin.xlane.f32.xlu1 %v3254_v37 }
 0x886   :  { %v8808_v16 = vpop.xlane.xlu0 %3293 }
 0x887   :  { %vm3295_vm15 = vcmp.eq.f32.partialorder %v8718_v32, %v8808_v16 }
 0x888   :  { %v3296_v18 = vsel %vm3295_vm15, %v3291_v23, inf  ;;  %v3132_v23 = vcvt.f32.s32 %v8751_v51  ;;  %v3161_v51 = vshll.u32 %v3160_v7, 16 }
 0x889   :  { %v8812_v61 = vpop.xlane.xlu1 %3279  ;;  %3297 = vmin.xlane.f32.xlu0 %v3296_v18 }
 0x88a   :  { %vm3281_vm0 = vcmp.eq.f32.partialorder %v8723_v12, %v8812_v61 }
 0x88b   :  { %v3282_v22 = vsel %vm3281_vm0, %v3277_v48, inf  ;;  %v3119_v48 = vshll.u32 %v3118_v9, 16 }
 0x88c   :  { %3283 = vmin.xlane.f32.xlu1 %v3282_v22  ;;  %v3146_v22 = vcvt.f32.s32 %v8758_v41 }
 0x899   :  { %v8818_v43 = vpop.xlane.xlu0 %3321 }
 0x89a   :  { %vm3323_vm1 = vcmp.eq.f32.partialorder %v8738_v28, %v8818_v43 }
 0x89b   :  { %v3324_v32 = vsel %vm3323_vm1, %v3319_v39, inf  ;;  %v3133_v39 = vshll.u32 %v3132_v23, 16 }
 0x89c   :  { %v8822_v37 = vpop.xlane.xlu1 %3307  ;;  %3325 = vmin.xlane.f32.xlu0 %v3324_v32 }
 0x89d   :  { %vm3309_vm2 = vcmp.eq.f32.partialorder %v8743_v31, %v8822_v37  ;;  %v3147_v31 = vshll.u32 %v3146_v22, 16 }
 0x89e   :  { %v3310_v12 = vsel %vm3309_vm2, %v3305_v26, inf  ;;  %v3188_v26 = vcvt.f32.s32 %v8768_v60  ;;  %v3174_v60 = vcvt.f32.s32 %v8772_v20 }
 0x89f   :  { %3311 = vmin.xlane.f32.xlu1 %v3310_v12 }
 0x8c2   :  { %v3116_v18 = vpop.xlane.xlu1 %3115 }
 0x8c3   :  { %v3117_v3 = vcvt.f32.s32 %v3116_v18  ;;  %v3130_v28 = vpop.xlane.xlu0 %3129 }
 0x8c4   :  { %v3131_v32 = vcvt.f32.s32 %v3130_v28 }
 0x8c5   :  { %v3120_v14 = vadd.s32 %v3119_v48, %v3117_v3 }
 0x8c6   :  { %v3134_v62 = vadd.s32 %v3133_v39, %v3131_v32  ;;  %v3144_v34 = vpop.xlane.xlu1 %3143  ;;  %v3175_v32 = vshll.u32 %v3174_v60, 16  ;;  %v3202_v60 = vcvt.f32.s32 %v8782_v33 }
 0x8c7   :  { %v3145_v12 = vcvt.f32.s32 %v3144_v34  ;;  %v3158_v40 = vpop.xlane.xlu0 %3157  ;;  %vm3331_vm3 = vcmp.eq.s32.totalorder %v8569_v59, %v3120_v14 }
 0x8c8   :  { %vm3332_vm4 = vcmp.eq.s32.totalorder %v8574_v25, %v3134_v62  ;;  %v3159_v41 = vcvt.f32.s32 %v3158_v40  ;;  %v8834_v9 = vsel %vm3331_vm3, 2147483647, %v8569_v59  ;;  %5965 = vmatprep.mubr.msk.f32.mxu0 %vm3331_vm3, %v9858_v6  ;;  %v3189_v62 = vshll.u32 %v3188_v26, 16 }
 0x8c9   :  { %v8838_v38 = vsel %vm3332_vm4, 2147483647, %v8574_v25  ;;  %v3148_v23 = vadd.s32 %v3147_v31, %v3145_v12  ;;  %5966 = vmatmul.mubr.msk.f32.vlgmr.msra.gmra.mrb[0].mxu0 %vm3332_vm4, %v9858_v6  ;;  %v3557_v34 = vshra.s32 %v8834_v9, 16 }
 0x8ca   :  { %v3162_v18 = vadd.s32 %v3161_v51, %v3159_v41  ;;  %v3571_v7 = vshra.s32 %v8838_v38, 16  ;;  %6384 = vmatpush3.bf16.msra.mxu0 %v7282_v42 }
 0x8cb   :  { %v3186_v59 = vpop.xlane.xlu0 %3185  ;;  %vm3333_vm5 = vcmp.eq.s32.totalorder %v8590_v5, %v3148_v23  ;;  %v8846_v48 = vcvt.s32.f32 %v3557_v34  ;;  %6386 = vmatprep.subr.bf16.mxu0 %v7287_v11 }
 0x8cc   :  { %v3187_v25 = vcvt.f32.s32 %v3186_v59  ;;  %v8850_v22 = vsel %vm3333_vm5, 2147483647, %v8590_v5  ;;  %5968 = vmatprep.mubr.msk.f32.mxu0 %vm3333_vm5, %v9858_v6  ;;  %vm3334_vm6 = vcmp.eq.s32.totalorder %v8598_v47, %v3162_v18  ;;  %v8854_v20 = vcvt.s32.f32 %v3571_v7 }
 0x8cd   :  { %3560 = vmin.xlane.f32.xlu1 %v8846_v48  ;;  %v3172_v3 = vpop.xlane.xlu1 %3171  ;;  %v8858_v28 = vsel %vm3334_vm6, 2147483647, %v8598_v47  ;;  %5969 = vmatmul.mubr.msk.f32.gmra.mrb[2].mxu0 %vm3334_vm6, %v9858_v6  ;;  %v3585_v39 = vshra.s32 %v8850_v22, 16 }
 0x8ce   :  { %v3190_v14 = vadd.s32 %v3189_v62, %v3187_v25  ;;  %v3173_v5 = vcvt.f32.s32 %v3172_v3  ;;  %3574 = vmin.xlane.f32.xlu0 %v8854_v20  ;;  %v3599_v31 = vshra.s32 %v8858_v28, 16  ;;  %6388 = vmatpush3.bf16.msra.mxu0 %v7287_v11  ;;  %v3203_v3 = vshll.u32 %v3202_v60, 16 }
 0x8cf   :  { %v8865_v26 = vcvt.s32.f32 %v3585_v39  ;;  %6390 = vmatprep.subr.bf16.mxu0 %v7300_v56 }
 0x8d0   :  { %v3176_v12 = vadd.s32 %v3175_v32, %v3173_v5  ;;  %v8868_v47 = vcvt.s32.f32 %v3599_v31  ;;  %vm3336_vm7 = vcmp.eq.s32.totalorder %v8613_v21, %v3190_v14 }
 0x8d1   :  { %3588 = vmin.xlane.f32.xlu1 %v8865_v26  ;;  %v8873_v40 = vsel %vm3336_vm7, 2147483647, %v8613_v21 }
 0x8d2   :  { %3602 = vmin.xlane.f32.xlu0 %v8868_v47  ;;  %vm3335_vm8 = vcmp.eq.s32.totalorder %v8620_v19, %v3176_v12  ;;  %v3627_v51 = vshra.s32 %v8873_v40, 16  ;;  %6392 = vmatpush3.bf16.msra.mxu0 %v7300_v56  ;;  %v3230_v12 = vcvt.f32.s32 %v8792_v24 }
 0x8d3   :  { %v8880_v41 = vsel %vm3335_vm8, 2147483647, %v8620_v19  ;;  %5971 = vmatprep.mubr.msk.f32.mxu0 %vm3335_vm8, %v9858_v6  ;;  %6394 = vmatprep.subr.bf16.mxu0 %v7312_v49  ;;  %v3216_v19 = vcvt.f32.s32 %v8778_v63 }
 0x8d4   :  { %5972 = vmatmul.mubr.msk.f32.gmra.mrb[4].mxu0 %vm3336_vm7, %v9858_v6  ;;  %v8885_v23 = vcvt.s32.f32 %v3627_v51  ;;  %v3613_v21 = vshra.s32 %v8880_v41, 16 }
 0x8d5   :  { %v3217_v7 = vshll.u32 %v3216_v19, 16 }
 0x8d6   :  { %3630 = vmin.xlane.f32.xlu0 %v8885_v23  ;;  %v8889_v34 = vcvt.s32.f32 %v3613_v21  ;;  %6396 = vmatpush3.bf16.msra.mxu0 %v7312_v49 }
 0x8d7   :  { %6398 = vmatprep.subr.bf16.mxu0 %v7324_v35 }
 0x8d8   :  { %3616 = vmin.xlane.f32.xlu1 %v8889_v34 }
 0x8da   :  { %6400 = vmatpush3.bf16.msra.mxu0 %v7324_v35 }
 0x8db   :  { %6402 = vmatprep.subr.bf16.mxu0 %v7338_v45 }
 0x8dd   :  { %v3214_v18 = vpop.xlane.xlu0 %3213 }
 0x8de   :  { %v3215_v62 = vcvt.f32.s32 %v3214_v18  ;;  %6404 = vmatpush3.bf16.msra.mxu0 %v7338_v45 }
 0x8df   :  { %6406 = vmatprep.subr.bf16.mxu0 %v7360_v29 }
 0x8e0   :  { %v3218_v59 = vadd.s32 %v3217_v7, %v3215_v62  ;;  %v3200_v25 = vpop.xlane.xlu1 %3199  ;;  %v3231_v7 = vshll.u32 %v3230_v12, 16 }
 0x8e1   :  { %v3201_v39 = vcvt.f32.s32 %v3200_v25 }
 0x8e2   :  { %vm3338_vm9 = vcmp.eq.s32.totalorder %v8647_v27, %v3218_v59  ;;  %6408 = vmatpush3.bf16.msra.mxu0 %v7360_v29 }
 0x8e3   :  { %v3204_v63 = vadd.s32 %v3203_v3, %v3201_v39  ;;  %v8903_v32 = vsel %vm3338_vm9, 2147483647, %v8647_v27  ;;  %6410 = vmatprep.subr.bf16.mxu0 %v7393_v2 }
 0x8e4   :  { %v3655_v33 = vshra.s32 %v8903_v32, 16 }
 0x8e5   :  { %vm3337_vm10 = vcmp.eq.s32.totalorder %v8653_v50, %v3204_v63 }
 0x8e6   :  { %v8909_v14 = vsel %vm3337_vm10, 2147483647, %v8653_v50  ;;  %5974 = vmatprep.mubr.msk.f32.mxu0 %vm3337_vm10, %v9858_v6  ;;  %v8912_v5 = vcvt.s32.f32 %v3655_v33  ;;  %6412 = vmatpush3.bf16.msra.mxu0 %v7393_v2  ;;  %v3244_v50 = vcvt.f32.s32 %v8788_v55  ;;  %v3258_v33 = vcvt.f32.s32 %v8802_v36 }
 0x8e7   :  { %5975 = vmatmul.mubr.msk.f32.gmra.mrb[6].mxu0 %vm3338_vm9, %v9858_v6  ;;  %v3641_v27 = vshra.s32 %v8909_v14, 16  ;;  %6414 = vmatprep.subr.bf16.mxu0 %v7282_v42 }
 0x8e8   :  { %3658 = vmin.xlane.f32.xlu0 %v8912_v5  ;;  %v3245_v21 = vshll.u32 %v3244_v50, 16 }
 0x8e9   :  { %v8919_v31 = vcvt.s32.f32 %v3641_v27 }
 0x8eb   :  { %3644 = vmin.xlane.f32.xlu1 %v8919_v31 }
 0x8f0   :  { %v3242_v51 = vpop.xlane.xlu0 %3241 }
 0x8f1   :  { %v3243_v19 = vcvt.f32.s32 %v3242_v51 }
 0x8f3   :  { %v3246_v60 = vadd.s32 %v3245_v21, %v3243_v19  ;;  %v3228_v18 = vpop.xlane.xlu1 %3227  ;;  %v3259_v21 = vshll.u32 %v3258_v33, 16 }
 0x8f4   :  { %v3229_v62 = vcvt.f32.s32 %v3228_v18 }
 0x8f5   :  { %vm3340_vm11 = vcmp.eq.s32.totalorder %v8670_v4, %v3246_v60 }
 0x8f6   :  { %v3232_v59 = vadd.s32 %v3231_v7, %v3229_v62  ;;  %v8926_v25 = vsel %vm3340_vm11, 2147483647, %v8670_v4  ;;  %v3272_v4 = vcvt.f32.s32 %v8798_v0 }
 0x8f7   :  { %v3683_v3 = vshra.s32 %v8926_v25, 16 }
 0x8f8   :  { %vm3339_vm13 = vcmp.eq.s32.totalorder %v8675_v58, %v3232_v59  ;;  %v3273_v27 = vshll.u32 %v3272_v4, 16 }
 0x8f9   :  { %v8931_v55 = vsel %vm3339_vm13, 2147483647, %v8675_v58  ;;  %5977 = vmatprep.mubr.msk.f32.mxu0 %vm3339_vm13, %v9858_v6  ;;  %v8934_v24 = vcvt.s32.f32 %v3683_v3  ;;  %v3286_v3 = vcvt.f32.s32 %v8812_v61 }
 0x8fa   :  { %5978 = vmatmul.mubr.msk.f32.gmra.mrb[8].mxu0 %vm3340_vm11, %v9858_v6  ;;  %v3669_v39 = vshra.s32 %v8931_v55, 16 }
 0x8fb   :  { %3686 = vmin.xlane.f32.xlu0 %v8934_v24 }
 0x8fc   :  { %v8939_v63 = vcvt.s32.f32 %v3669_v39 }
 0x8fe   :  { %3672 = vmin.xlane.f32.xlu1 %v8939_v63 }
 0x903   :  { %v3270_v58 = vpop.xlane.xlu0 %3269 }
 0x904   :  { %v3271_v50 = vcvt.f32.s32 %v3270_v58 }
 0x906   :  { %v3274_v12 = vadd.s32 %v3273_v27, %v3271_v50  ;;  %v3256_v51 = vpop.xlane.xlu1 %3255  ;;  %v3287_v27 = vshll.u32 %v3286_v3, 16 }
 0x907   :  { %v3257_v19 = vcvt.f32.s32 %v3256_v51 }
 0x908   :  { %vm3342_vm12 = vcmp.eq.s32.totalorder %v8690_v44, %v3274_v12 }
 0x909   :  { %v3260_v60 = vadd.s32 %v3259_v21, %v3257_v19  ;;  %v8946_v18 = vsel %vm3342_vm12, 2147483647, %v8690_v44  ;;  %v3300_v44 = vcvt.f32.s32 %v8808_v16 }
 0x90a   :  { %v3711_v7 = vshra.s32 %v8946_v18, 16 }
 0x90b   :  { %vm3341_vm14 = vcmp.eq.s32.totalorder %v8695_v46, %v3260_v60  ;;  %v3301_v39 = vshll.u32 %v3300_v44, 16 }
 0x90c   :  { %v8951_v0 = vsel %vm3341_vm14, 2147483647, %v8695_v46  ;;  %5980 = vmatprep.mubr.msk.f32.mxu0 %vm3341_vm14, %v9858_v6  ;;  %v8954_v36 = vcvt.s32.f32 %v3711_v7  ;;  %v3314_v7 = vcvt.f32.s32 %v8822_v37 }
 0x90d   :  { %5981 = vmatmul.mubr.msk.f32.gmra.mrb[10].mxu0 %vm3342_vm12, %v9858_v6  ;;  %v3697_v62 = vshra.s32 %v8951_v0, 16 }
 0x90e   :  { %3714 = vmin.xlane.f32.xlu0 %v8954_v36 }
 0x90f   :  { %v8959_v59 = vcvt.s32.f32 %v3697_v62 }
 0x911   :  { %3700 = vmin.xlane.f32.xlu1 %v8959_v59 }
 0x916   :  { %v3298_v46 = vpop.xlane.xlu0 %3297 }
 0x917   :  { %v3299_v4 = vcvt.f32.s32 %v3298_v46 }
 0x919   :  { %v3302_v33 = vadd.s32 %v3301_v39, %v3299_v4  ;;  %v3284_v58 = vpop.xlane.xlu1 %3283  ;;  %v3315_v39 = vshll.u32 %v3314_v7, 16 }
 0x91a   :  { %v3285_v50 = vcvt.f32.s32 %v3284_v58 }
 0x91b   :  { %vm3344_vm15 = vcmp.eq.s32.totalorder %v8710_v54, %v3302_v33 }
 0x91c   :  { %v3288_v12 = vadd.s32 %v3287_v27, %v3285_v50  ;;  %v8966_v51 = vsel %vm3344_vm15, 2147483647, %v8710_v54  ;;  %v3328_v54 = vcvt.f32.s32 %v8818_v43 }
 0x91d   :  { %v3739_v21 = vshra.s32 %v8966_v51, 16 }
 0x91e   :  { %vm3343_vm0 = vcmp.eq.s32.totalorder %v8715_v13, %v3288_v12  ;;  %v3329_v62 = vshll.u32 %v3328_v54, 16  ;;  %v3584_v54 = vand.u32 65535, %v8850_v22 }
 0x91f   :  { %v8971_v16 = vsel %vm3343_vm0, 2147483647, %v8715_v13  ;;  %5983 = vmatprep.mubr.msk.f32.mxu0 %vm3343_vm0, %v9858_v6  ;;  %v8974_v61 = vcvt.s32.f32 %v3739_v21  ;;  %v3570_v21 = vand.u32 65535, %v8838_v38 }
 0x920   :  { %5984 = vmatmul.mubr.msk.f32.gmra.mrb[12].mxu0 %vm3344_vm15, %v9858_v6  ;;  %v3725_v19 = vshra.s32 %v8971_v16, 16 }
 0x921   :  { %3742 = vmin.xlane.f32.xlu0 %v8974_v61 }
 0x922   :  { %v8979_v60 = vcvt.s32.f32 %v3725_v19 }
 0x924   :  { %3728 = vmin.xlane.f32.xlu1 %v8979_v60 }
 0x929   :  { %v3326_v13 = vpop.xlane.xlu0 %3325 }
 0x92a   :  { %v3327_v44 = vcvt.f32.s32 %v3326_v13  ;;  %v3572_v13 = vcvt.s32.f32 %v3570_v21 }
 0x92c   :  { %v3330_v3 = vadd.s32 %v3329_v62, %v3327_v44  ;;  %v3312_v46 = vpop.xlane.xlu1 %3311  ;;  %v3598_v62 = vand.u32 65535, %v8858_v28 }
 0x92d   :  { %v3313_v4 = vcvt.f32.s32 %v3312_v46 }
 0x92e   :  { %vm3346_vm1 = vcmp.eq.s32.totalorder %v8730_v53, %v3330_v3 }
 0x92f   :  { %v3316_v33 = vadd.s32 %v3315_v39, %v3313_v4  ;;  %v8986_v58 = vsel %vm3346_vm1, 2147483647, %v8730_v53  ;;  %v3556_v53 = vand.u32 65535, %v8834_v9  ;;  %v3586_v39 = vcvt.s32.f32 %v3584_v54 }
 0x930   :  { %v3767_v27 = vshra.s32 %v8986_v58, 16 }
 0x931   :  { %vm3345_vm2 = vcmp.eq.s32.totalorder %v8735_v57, %v3316_v33  ;;  %v3558_v19 = vcvt.s32.f32 %v3556_v53  ;;  %v3626_v33 = vand.u32 65535, %v8873_v40 }
 0x932   :  { %v8991_v43 = vsel %vm3345_vm2, 2147483647, %v8735_v57  ;;  %5986 = vmatprep.mubr.msk.f32.mxu0 %vm3345_vm2, %v9858_v6  ;;  %v8994_v37 = vcvt.s32.f32 %v3767_v27 }
 0x933   :  { %5987 = vmatmul.mubr.msk.f32.gmra.mrb[14].mxu0 %vm3346_vm1, %v9858_v6  ;;  %v3753_v50 = vshra.s32 %v8991_v43, 16  ;;  %v3628_v21 = vcvt.s32.f32 %v3626_v33  ;;  %v3682_v33 = vand.u32 65535, %v8926_v25 }
 0x934   :  { %3770 = vmin.xlane.f32.xlu0 %v8994_v37 }
 0x935   :  { %v8999_v12 = vcvt.s32.f32 %v3753_v50  ;;  %v3612_v50 = vand.u32 65535, %v8880_v41 }
 0x937   :  { %3756 = vmin.xlane.f32.xlu1 %v8999_v12  ;;  %v3614_v54 = vcvt.s32.f32 %v3612_v50  ;;  %v3684_v50 = vcvt.s32.f32 %v3682_v33 }
 0x95a   :  { %v9004_v57 = vpop.xlane.xlu1 %3560 }
 0x95b   :  { %vm3562_vm3 = vcmp.eq.f32.partialorder %v8846_v48, %v9004_v57  ;;  %v9009_v7 = vpop.xlane.xlu0 %3574  ;;  %v3600_v48 = vcvt.s32.f32 %v3598_v62  ;;  %v3640_v62 = vand.u32 65535, %v8909_v14 }
 0x95c   :  { %vm3576_vm4 = vcmp.eq.f32.partialorder %v8854_v20, %v9009_v7  ;;  %v3563_v44 = vsel %vm3562_vm3, %v3558_v19, inf }
 0x95d   :  { %3564 = vmin.xlane.f32.xlu1 %v3563_v44  ;;  %v3577_v3 = vsel %vm3576_vm4, %v3572_v13, inf  ;;  %v3654_v13 = vand.u32 65535, %v8903_v32 }
 0x95e   :  { %v9014_v46 = vpop.xlane.xlu1 %3588  ;;  %3578 = vmin.xlane.f32.xlu0 %v3577_v3 }
 0x95f   :  { %vm3590_vm5 = vcmp.eq.f32.partialorder %v8865_v26, %v9014_v46  ;;  %v9018_v4 = vpop.xlane.xlu0 %3602  ;;  %v3656_v3 = vcvt.s32.f32 %v3654_v13 }
 0x960   :  { %vm3604_vm6 = vcmp.eq.f32.partialorder %v8868_v47, %v9018_v4  ;;  %v3591_v27 = vsel %vm3590_vm5, %v3586_v39, inf }
 0x961   :  { %3592 = vmin.xlane.f32.xlu1 %v3591_v27  ;;  %v3605_v20 = vsel %vm3604_vm6, %v3600_v48, inf  ;;  %v3642_v48 = vcvt.s32.f32 %v3640_v62  ;;  %v3668_v27 = vand.u32 65535, %v8931_v55 }
 0x962   :  { %3606 = vmin.xlane.f32.xlu0 %v3605_v20 }
 0x963   :  { %v9024_v53 = vpop.xlane.xlu0 %3630 }
 0x964   :  { %vm3632_vm7 = vcmp.eq.f32.partialorder %v8885_v23, %v9024_v53 }
 0x965   :  { %v9028_v26 = vpop.xlane.xlu1 %3616  ;;  %v3633_v19 = vsel %vm3632_vm7, %v3628_v21, inf }
 0x966   :  { %vm3618_vm8 = vcmp.eq.f32.partialorder %v8889_v34, %v9028_v26  ;;  %3634 = vmin.xlane.f32.xlu0 %v3633_v19  ;;  %v3670_v19 = vcvt.s32.f32 %v3668_v27 }
 0x967   :  { %v3619_v47 = vsel %vm3618_vm8, %v3614_v54, inf  ;;  %v3710_v54 = vand.u32 65535, %v8946_v18 }
 0x968   :  { %3620 = vmin.xlane.f32.xlu1 %v3619_v47  ;;  %v3696_v47 = vand.u32 65535, %v8951_v0 }
 0x969   :  { %v3712_v62 = vcvt.s32.f32 %v3710_v54 }
 0x975   :  { %v9034_v44 = vpop.xlane.xlu0 %3658 }
 0x976   :  { %vm3660_vm9 = vcmp.eq.f32.partialorder %v8912_v5, %v9034_v44 }
 0x977   :  { %v3661_v23 = vsel %vm3660_vm9, %v3656_v3, inf }
 0x978   :  { %v9038_v39 = vpop.xlane.xlu1 %3644  ;;  %3662 = vmin.xlane.f32.xlu0 %v3661_v23  ;;  %v3698_v23 = vcvt.s32.f32 %v3696_v47 }
 0x979   :  { %vm3646_vm10 = vcmp.eq.f32.partialorder %v8919_v31, %v9038_v39 }
 0x97a   :  { %v3647_v34 = vsel %vm3646_vm10, %v3642_v48, inf  ;;  %v3738_v48 = vand.u32 65535, %v8966_v51 }
 0x97b   :  { %3648 = vmin.xlane.f32.xlu1 %v3647_v34  ;;  %v3724_v34 = vand.u32 65535, %v8971_v16 }
 0x97c   :  { %v3740_v27 = vcvt.s32.f32 %v3738_v48 }
 0x988   :  { %v9044_v20 = vpop.xlane.xlu0 %3686 }
 0x989   :  { %vm3688_vm11 = vcmp.eq.f32.partialorder %v8934_v24, %v9044_v20 }
 0x98a   :  { %v3689_v5 = vsel %vm3688_vm11, %v3684_v50, inf }
 0x98b   :  { %v9048_v21 = vpop.xlane.xlu1 %3672  ;;  %3690 = vmin.xlane.f32.xlu0 %v3689_v5  ;;  %v3726_v5 = vcvt.s32.f32 %v3724_v34 }
 0x98c   :  { %vm3674_vm13 = vcmp.eq.f32.partialorder %v8939_v63, %v9048_v21 }
 0x98d   :  { %v3675_v31 = vsel %vm3674_vm13, %v3670_v19, inf  ;;  %v3766_v19 = vand.u32 65535, %v8986_v58 }
 0x98e   :  { %3676 = vmin.xlane.f32.xlu1 %v3675_v31  ;;  %v3752_v31 = vand.u32 65535, %v8991_v43 }
 0x98f   :  { %v3768_v47 = vcvt.s32.f32 %v3766_v19 }
 0x99b   :  { %v9054_v13 = vpop.xlane.xlu0 %3714 }
 0x99c   :  { %vm3716_vm12 = vcmp.eq.f32.partialorder %v8954_v36, %v9054_v13 }
 0x99d   :  { %v3717_v24 = vsel %vm3716_vm12, %v3712_v62, inf }
 0x99e   :  { %v9058_v3 = vpop.xlane.xlu1 %3700  ;;  %3718 = vmin.xlane.f32.xlu0 %v3717_v24  ;;  %v3754_v24 = vcvt.s32.f32 %v3752_v31 }
 0x99f   :  { %vm3702_vm14 = vcmp.eq.f32.partialorder %v8959_v59, %v9058_v3 }
 0x9a0   :  { %v3703_v63 = vsel %vm3702_vm14, %v3698_v23, inf  ;;  %v3567_v23 = vcvt.f32.s32 %v9004_v57 }
 0x9a1   :  { %3704 = vmin.xlane.f32.xlu1 %v3703_v63  ;;  %v3581_v63 = vcvt.f32.s32 %v9009_v7 }
 0x9a2   :  { %v3568_v34 = vshll.u32 %v3567_v23, 16 }
 0x9ae   :  { %v9064_v33 = vpop.xlane.xlu0 %3742 }
 0x9af   :  { %vm3744_vm15 = vcmp.eq.f32.partialorder %v8974_v61, %v9064_v33 }
 0x9b0   :  { %v3745_v36 = vsel %vm3744_vm15, %v3740_v27, inf  ;;  %v3595_v27 = vcvt.f32.s32 %v9014_v46 }
 0x9b1   :  { %v9068_v50 = vpop.xlane.xlu1 %3728  ;;  %3746 = vmin.xlane.f32.xlu0 %v3745_v36 }
 0x9b2   :  { %vm3730_vm0 = vcmp.eq.f32.partialorder %v8979_v60, %v9068_v50 }
 0x9b3   :  { %v3731_v59 = vsel %vm3730_vm0, %v3726_v5, inf  ;;  %v3582_v5 = vshll.u32 %v3581_v63, 16 }
 0x9b4   :  { %3732 = vmin.xlane.f32.xlu1 %v3731_v59  ;;  %v3609_v59 = vcvt.f32.s32 %v9018_v4 }
 0x9b6   :  { %v3610_v7 = vshll.u32 %v3609_v59, 16 }
 0x9c1   :  { %v9074_v54 = vpop.xlane.xlu0 %3770 }
 0x9c2   :  { %vm3772_vm1 = vcmp.eq.f32.partialorder %v8994_v37, %v9074_v54 }
 0x9c3   :  { %v3773_v61 = vsel %vm3772_vm1, %v3768_v47, inf }
 0x9c4   :  { %v9078_v62 = vpop.xlane.xlu1 %3756  ;;  %3774 = vmin.xlane.f32.xlu0 %v3773_v61 }
 0x9c5   :  { %vm3758_vm2 = vcmp.eq.f32.partialorder %v8999_v12, %v9078_v62  ;;  %v3596_v12 = vshll.u32 %v3595_v27, 16 }
 0x9c6   :  { %v3759_v60 = vsel %vm3758_vm2, %v3754_v24, inf  ;;  %v3637_v24 = vcvt.f32.s32 %v9024_v53 }
 0x9c7   :  { %3760 = vmin.xlane.f32.xlu1 %v3759_v60 }
 0x9ea   :  { %v3565_v48 = vpop.xlane.xlu1 %3564 }
 0x9eb   :  { %v3566_v36 = vcvt.f32.s32 %v3565_v48  ;;  %v3579_v37 = vpop.xlane.xlu0 %3578  ;;  %v3623_v48 = vcvt.f32.s32 %v9028_v26 }
 0x9ec   :  { %v3580_v19 = vcvt.f32.s32 %v3579_v37 }
 0x9ed   :  { %v3569_v31 = vadd.s32 %v3568_v34, %v3566_v36  ;;  %v3638_v36 = vshll.u32 %v3637_v24, 16 }
 0x9ee   :  { %v3583_v47 = vadd.s32 %v3582_v5, %v3580_v19  ;;  %v3593_v61 = vpop.xlane.xlu1 %3592 }
 0x9ef   :  { %v3594_v60 = vcvt.f32.s32 %v3593_v61  ;;  %v3607_v57 = vpop.xlane.xlu0 %3606  ;;  %vm3780_vm3 = vcmp.eq.s32.totalorder %v8834_v9, %v3569_v31 }
 0x9f0   :  { %vm3781_vm4 = vcmp.eq.s32.totalorder %v8838_v38, %v3583_v47  ;;  %v3608_v46 = vcvt.f32.s32 %v3607_v57  ;;  %v9090_v23 = vsel %vm3780_vm3, 2147483647, %v8834_v9  ;;  %6021 = vmatprep.mubr.msk.f32.mxu0 %vm3780_vm3, %v9858_v6  ;;  %v3624_v47 = vshll.u32 %v3623_v48, 16 }
 0x9f1   :  { %v9094_v4 = vsel %vm3781_vm4, 2147483647, %v8838_v38  ;;  %v3597_v63 = vadd.s32 %v3596_v12, %v3594_v60  ;;  %6022 = vmatmul.mubr.msk.f32.vlgmr.msra.gmra.mrb[0].mxu0 %vm3781_vm4, %v9858_v6  ;;  %v4006_v53 = vshra.s32 %v9090_v23, 16  ;;  %v3651_v48 = vcvt.f32.s32 %v9038_v39 }
 0x9f2   :  { %v3611_v34 = vadd.s32 %v3610_v7, %v3608_v46  ;;  %v4020_v27 = vshra.s32 %v9094_v4, 16  ;;  %6416 = vmatpush3.bf16.msra.mxu0 %v7282_v42 }
 0x9f3   :  { %v3635_v9 = vpop.xlane.xlu0 %3634  ;;  %vm3782_vm5 = vcmp.eq.s32.totalorder %v8850_v22, %v3597_v63  ;;  %v9102_v37 = vcvt.s32.f32 %v4006_v53  ;;  %6418 = vmatprep.subr.bf16.mxu0 %v7287_v11 }
 0x9f4   :  { %v3636_v38 = vcvt.f32.s32 %v3635_v9  ;;  %v9106_v5 = vsel %vm3782_vm5, 2147483647, %v8850_v22  ;;  %6024 = vmatprep.mubr.msk.f32.mxu0 %vm3782_vm5, %v9858_v6  ;;  %vm3783_vm6 = vcmp.eq.s32.totalorder %v8858_v28, %v3611_v34  ;;  %v9110_v26 = vcvt.s32.f32 %v4020_v27 }
 0x9f5   :  { %4009 = vmin.xlane.f32.xlu1 %v9102_v37  ;;  %v3621_v59 = vpop.xlane.xlu1 %3620  ;;  %v9114_v19 = vsel %vm3783_vm6, 2147483647, %v8858_v28  ;;  %6025 = vmatmul.mubr.msk.f32.gmra.mrb[2].mxu0 %vm3783_vm6, %v9858_v6  ;;  %v4034_v31 = vshra.s32 %v9106_v5, 16 }
 0x9f6   :  { %v3639_v61 = vadd.s32 %v3638_v36, %v3636_v38  ;;  %v3622_v22 = vcvt.f32.s32 %v3621_v59  ;;  %4023 = vmin.xlane.f32.xlu0 %v9110_v26  ;;  %v4048_v12 = vshra.s32 %v9114_v19, 16  ;;  %6420 = vmatpush3.bf16.msra.mxu0 %v7287_v11  ;;  %v3652_v59 = vshll.u32 %v3651_v48, 16 }
 0x9f7   :  { %v9121_v24 = vcvt.s32.f32 %v4034_v31  ;;  %6422 = vmatprep.subr.bf16.mxu0 %v7300_v56 }
 0x9f8   :  { %v3625_v60 = vadd.s32 %v3624_v47, %v3622_v22  ;;  %v9124_v28 = vcvt.s32.f32 %v4048_v12  ;;  %vm3785_vm7 = vcmp.eq.s32.totalorder %v8873_v40, %v3639_v61 }
 0x9f9   :  { %4037 = vmin.xlane.f32.xlu1 %v9121_v24  ;;  %v9129_v57 = vsel %vm3785_vm7, 2147483647, %v8873_v40 }
 0x9fa   :  { %4051 = vmin.xlane.f32.xlu0 %v9124_v28  ;;  %vm3784_vm8 = vcmp.eq.s32.totalorder %v8880_v41, %v3625_v60  ;;  %v4076_v7 = vshra.s32 %v9129_v57, 16  ;;  %6424 = vmatpush3.bf16.msra.mxu0 %v7300_v56  ;;  %v3679_v60 = vcvt.f32.s32 %v9048_v21 }
 0x9fb   :  { %v9136_v46 = vsel %vm3784_vm8, 2147483647, %v8880_v41  ;;  %6027 = vmatprep.mubr.msk.f32.mxu0 %vm3784_vm8, %v9858_v6  ;;  %6426 = vmatprep.subr.bf16.mxu0 %v7312_v49  ;;  %v3665_v41 = vcvt.f32.s32 %v9034_v44 }
 0x9fc   :  { %6028 = vmatmul.mubr.msk.f32.gmra.mrb[4].mxu0 %vm3785_vm7, %v9858_v6  ;;  %v9141_v63 = vcvt.s32.f32 %v4076_v7  ;;  %v4062_v40 = vshra.s32 %v9136_v46, 16 }
 0x9fd   :  { %v3666_v27 = vshll.u32 %v3665_v41, 16 }
 0x9fe   :  { %4079 = vmin.xlane.f32.xlu0 %v9141_v63  ;;  %v9145_v53 = vcvt.s32.f32 %v4062_v40  ;;  %6428 = vmatpush3.bf16.msra.mxu0 %v7312_v49 }
 0x9ff   :  { %6430 = vmatprep.subr.bf16.mxu0 %v7324_v35 }
 0xa00   :  { %4065 = vmin.xlane.f32.xlu1 %v9145_v53 }
 0xa02   :  { %6432 = vmatpush3.bf16.msra.mxu0 %v7324_v35 }
 0xa03   :  { %6434 = vmatprep.subr.bf16.mxu0 %v7338_v45 }
 0xa05   :  { %v3663_v34 = vpop.xlane.xlu0 %3662 }
 0xa06   :  { %v3664_v36 = vcvt.f32.s32 %v3663_v34  ;;  %6436 = vmatpush3.bf16.msra.mxu0 %v7338_v45 }
 0xa07   :  { %6438 = vmatprep.subr.bf16.mxu0 %v7360_v29 }
 0xa08   :  { %v3667_v9 = vadd.s32 %v3666_v27, %v3664_v36  ;;  %v3649_v38 = vpop.xlane.xlu1 %3648  ;;  %v3680_v27 = vshll.u32 %v3679_v60, 16 }
 0xa09   :  { %v3650_v31 = vcvt.f32.s32 %v3649_v38 }
 0xa0a   :  { %vm3787_vm9 = vcmp.eq.s32.totalorder %v8903_v32, %v3667_v9  ;;  %6440 = vmatpush3.bf16.msra.mxu0 %v7360_v29 }
 0xa0b   :  { %v3653_v44 = vadd.s32 %v3652_v59, %v3650_v31  ;;  %v9159_v47 = vsel %vm3787_vm9, 2147483647, %v8903_v32  ;;  %6442 = vmatprep.subr.bf16.mxu0 %v7393_v2 }
 0xa0c   :  { %v4104_v39 = vshra.s32 %v9159_v47, 16 }
 0xa0d   :  { %vm3786_vm10 = vcmp.eq.s32.totalorder %v8909_v14, %v3653_v44 }
 0xa0e   :  { %v9165_v61 = vsel %vm3786_vm10, 2147483647, %v8909_v14  ;;  %6030 = vmatprep.mubr.msk.f32.mxu0 %vm3786_vm10, %v9858_v6  ;;  %v9168_v22 = vcvt.s32.f32 %v4104_v39  ;;  %6444 = vmatpush3.bf16.msra.mxu0 %v7393_v2  ;;  %v3693_v14 = vcvt.f32.s32 %v9044_v20  ;;  %v3707_v39 = vcvt.f32.s32 %v9058_v3 }
 0xa0f   :  { %6031 = vmatmul.mubr.msk.f32.gmra.mrb[6].mxu0 %vm3787_vm9, %v9858_v6  ;;  %v4090_v32 = vshra.s32 %v9165_v61, 16  ;;  %6446 = vmatprep.subr.bf16.mxu0 %v7282_v42 }
 0xa10   :  { %4107 = vmin.xlane.f32.xlu0 %v9168_v22  ;;  %v3694_v40 = vshll.u32 %v3693_v14, 16 }
 0xa11   :  { %v9175_v12 = vcvt.s32.f32 %v4090_v32 }
 0xa13   :  { %4093 = vmin.xlane.f32.xlu1 %v9175_v12 }
 0xa18   :  { %v3691_v7 = vpop.xlane.xlu0 %3690 }
 0xa19   :  { %v3692_v41 = vcvt.f32.s32 %v3691_v7 }
 0xa1b   :  { %v3695_v48 = vadd.s32 %v3694_v40, %v3692_v41  ;;  %v3677_v34 = vpop.xlane.xlu1 %3676  ;;  %v3708_v40 = vshll.u32 %v3707_v39, 16 }
 0xa1c   :  { %v3678_v36 = vcvt.f32.s32 %v3677_v34 }
 0xa1d   :  { %vm3789_vm11 = vcmp.eq.s32.totalorder %v8926_v25, %v3695_v48 }
 0xa1e   :  { %v3681_v9 = vadd.s32 %v3680_v27, %v3678_v36  ;;  %v9182_v38 = vsel %vm3789_vm11, 2147483647, %v8926_v25  ;;  %v3721_v25 = vcvt.f32.s32 %v9054_v13 }
 0xa1f   :  { %v4132_v59 = vshra.s32 %v9182_v38, 16 }
 0xa20   :  { %vm3788_vm13 = vcmp.eq.s32.totalorder %v8931_v55, %v3681_v9  ;;  %v3722_v32 = vshll.u32 %v3721_v25, 16 }
 0xa21   :  { %v9187_v20 = vsel %vm3788_vm13, 2147483647, %v8931_v55  ;;  %6033 = vmatprep.mubr.msk.f32.mxu0 %vm3788_vm13, %v9858_v6  ;;  %v9190_v21 = vcvt.s32.f32 %v4132_v59  ;;  %v3735_v59 = vcvt.f32.s32 %v9068_v50 }
 0xa22   :  { %6034 = vmatmul.mubr.msk.f32.gmra.mrb[8].mxu0 %vm3789_vm11, %v9858_v6  ;;  %v4118_v31 = vshra.s32 %v9187_v20, 16 }
 0xa23   :  { %4135 = vmin.xlane.f32.xlu0 %v9190_v21 }
 0xa24   :  { %v9195_v44 = vcvt.s32.f32 %v4118_v31 }
 0xa26   :  { %4121 = vmin.xlane.f32.xlu1 %v9195_v44 }
 0xa2b   :  { %v3719_v55 = vpop.xlane.xlu0 %3718 }
 0xa2c   :  { %v3720_v14 = vcvt.f32.s32 %v3719_v55 }
 0xa2e   :  { %v3723_v60 = vadd.s32 %v3722_v32, %v3720_v14  ;;  %v3705_v7 = vpop.xlane.xlu1 %3704  ;;  %v3736_v32 = vshll.u32 %v3735_v59, 16 }
 0xa2f   :  { %v3706_v41 = vcvt.f32.s32 %v3705_v7 }
 0xa30   :  { %vm3791_vm12 = vcmp.eq.s32.totalorder %v8946_v18, %v3723_v60 }
 0xa31   :  { %v3709_v48 = vadd.s32 %v3708_v40, %v3706_v41  ;;  %v9202_v34 = vsel %vm3791_vm12, 2147483647, %v8946_v18  ;;  %v3749_v18 = vcvt.f32.s32 %v9064_v33 }
 0xa32   :  { %v4160_v27 = vshra.s32 %v9202_v34, 16 }
 0xa33   :  { %vm3790_vm14 = vcmp.eq.s32.totalorder %v8951_v0, %v3709_v48  ;;  %v3750_v31 = vshll.u32 %v3749_v18, 16 }
 0xa34   :  { %v9207_v13 = vsel %vm3790_vm14, 2147483647, %v8951_v0  ;;  %6036 = vmatprep.mubr.msk.f32.mxu0 %vm3790_vm14, %v9858_v6  ;;  %v9210_v3 = vcvt.s32.f32 %v4160_v27  ;;  %v3763_v27 = vcvt.f32.s32 %v9078_v62 }
 0xa35   :  { %6037 = vmatmul.mubr.msk.f32.gmra.mrb[10].mxu0 %vm3791_vm12, %v9858_v6  ;;  %v4146_v36 = vshra.s32 %v9207_v13, 16 }
 0xa36   :  { %4163 = vmin.xlane.f32.xlu0 %v9210_v3 }
 0xa37   :  { %v9215_v9 = vcvt.s32.f32 %v4146_v36 }
 0xa39   :  { %4149 = vmin.xlane.f32.xlu1 %v9215_v9 }
 0xa3e   :  { %v3747_v0 = vpop.xlane.xlu0 %3746 }
 0xa3f   :  { %v3748_v25 = vcvt.f32.s32 %v3747_v0 }
 0xa41   :  { %v3751_v39 = vadd.s32 %v3750_v31, %v3748_v25  ;;  %v3733_v55 = vpop.xlane.xlu1 %3732  ;;  %v3764_v31 = vshll.u32 %v3763_v27, 16 }
 0xa42   :  { %v3734_v14 = vcvt.f32.s32 %v3733_v55 }
 0xa43   :  { %vm3793_vm15 = vcmp.eq.s32.totalorder %v8966_v51, %v3751_v39 }
 0xa44   :  { %v3737_v60 = vadd.s32 %v3736_v32, %v3734_v14  ;;  %v9222_v7 = vsel %vm3793_vm15, 2147483647, %v8966_v51  ;;  %v3777_v51 = vcvt.f32.s32 %v9074_v54 }
 0xa45   :  { %v4188_v40 = vshra.s32 %v9222_v7, 16 }
 0xa46   :  { %vm3792_vm0 = vcmp.eq.s32.totalorder %v8971_v16, %v3737_v60  ;;  %v3778_v36 = vshll.u32 %v3777_v51, 16  ;;  %v4033_v51 = vand.u32 65535, %v9106_v5 }
 0xa47   :  { %v9227_v33 = vsel %vm3792_vm0, 2147483647, %v8971_v16  ;;  %6039 = vmatprep.mubr.msk.f32.mxu0 %vm3792_vm0, %v9858_v6  ;;  %v9230_v50 = vcvt.s32.f32 %v4188_v40  ;;  %v4019_v40 = vand.u32 65535, %v9094_v4 }
 0xa48   :  { %6040 = vmatmul.mubr.msk.f32.gmra.mrb[12].mxu0 %vm3793_vm15, %v9858_v6  ;;  %v4174_v41 = vshra.s32 %v9227_v33, 16 }
 0xa49   :  { %4191 = vmin.xlane.f32.xlu0 %v9230_v50 }
 0xa4a   :  { %v9235_v48 = vcvt.s32.f32 %v4174_v41 }
 0xa4c   :  { %4177 = vmin.xlane.f32.xlu1 %v9235_v48 }
 0xa51   :  { %v3775_v16 = vpop.xlane.xlu0 %3774 }
 0xa52   :  { %v3776_v18 = vcvt.f32.s32 %v3775_v16  ;;  %v4021_v16 = vcvt.s32.f32 %v4019_v40 }
 0xa54   :  { %v3779_v59 = vadd.s32 %v3778_v36, %v3776_v18  ;;  %v3761_v0 = vpop.xlane.xlu1 %3760  ;;  %v4047_v36 = vand.u32 65535, %v9114_v19 }
 0xa55   :  { %v3762_v25 = vcvt.f32.s32 %v3761_v0 }
 0xa56   :  { %vm3795_vm1 = vcmp.eq.s32.totalorder %v8986_v58, %v3779_v59 }
 0xa57   :  { %v3765_v39 = vadd.s32 %v3764_v31, %v3762_v25  ;;  %v9242_v55 = vsel %vm3795_vm1, 2147483647, %v8986_v58  ;;  %v4005_v58 = vand.u32 65535, %v9090_v23  ;;  %v4035_v31 = vcvt.s32.f32 %v4033_v51 }
 0xa58   :  { %v4216_v32 = vshra.s32 %v9242_v55, 16 }
 0xa59   :  { %vm3794_vm2 = vcmp.eq.s32.totalorder %v8991_v43, %v3765_v39  ;;  %v4007_v41 = vcvt.s32.f32 %v4005_v58  ;;  %v4075_v39 = vand.u32 65535, %v9129_v57 }
 0xa5a   :  { %v9247_v54 = vsel %vm3794_vm2, 2147483647, %v8991_v43  ;;  %6042 = vmatprep.mubr.msk.f32.mxu0 %vm3794_vm2, %v9858_v6  ;;  %v9250_v62 = vcvt.s32.f32 %v4216_v32 }
 0xa5b   :  { %6043 = vmatmul.mubr.msk.f32.gmra.mrb[14].mxu0 %vm3795_vm1, %v9858_v6  ;;  %v4202_v14 = vshra.s32 %v9247_v54, 16  ;;  %v4077_v40 = vcvt.s32.f32 %v4075_v39  ;;  %v4131_v39 = vand.u32 65535, %v9182_v38 }
 0xa5c   :  { %4219 = vmin.xlane.f32.xlu0 %v9250_v62 }
 0xa5d   :  { %v9255_v60 = vcvt.s32.f32 %v4202_v14  ;;  %v4061_v14 = vand.u32 65535, %v9136_v46 }
 0xa5f   :  { %4205 = vmin.xlane.f32.xlu1 %v9255_v60  ;;  %v4063_v51 = vcvt.s32.f32 %v4061_v14  ;;  %v4133_v14 = vcvt.s32.f32 %v4131_v39 }
 0xa82   :  { %v9260_v43 = vpop.xlane.xlu1 %4009 }
 0xa83   :  { %vm4011_vm3 = vcmp.eq.f32.partialorder %v9102_v37, %v9260_v43  ;;  %v9265_v27 = vpop.xlane.xlu0 %4023  ;;  %v4049_v37 = vcvt.s32.f32 %v4047_v36  ;;  %v4089_v36 = vand.u32 65535, %v9165_v61 }
 0xa84   :  { %vm4025_vm4 = vcmp.eq.f32.partialorder %v9110_v26, %v9265_v27  ;;  %v4012_v18 = vsel %vm4011_vm3, %v4007_v41, inf }
 0xa85   :  { %4013 = vmin.xlane.f32.xlu1 %v4012_v18  ;;  %v4026_v59 = vsel %vm4025_vm4, %v4021_v16, inf  ;;  %v4103_v16 = vand.u32 65535, %v9159_v47 }
 0xa86   :  { %v9270_v0 = vpop.xlane.xlu1 %4037  ;;  %4027 = vmin.xlane.f32.xlu0 %v4026_v59 }
 0xa87   :  { %vm4039_vm5 = vcmp.eq.f32.partialorder %v9121_v24, %v9270_v0  ;;  %v9274_v25 = vpop.xlane.xlu0 %4051  ;;  %v4105_v59 = vcvt.s32.f32 %v4103_v16 }
 0xa88   :  { %vm4053_vm6 = vcmp.eq.f32.partialorder %v9124_v28, %v9274_v25  ;;  %v4040_v32 = vsel %vm4039_vm5, %v4035_v31, inf }
 0xa89   :  { %4041 = vmin.xlane.f32.xlu1 %v4040_v32  ;;  %v4054_v26 = vsel %vm4053_vm6, %v4049_v37, inf  ;;  %v4091_v37 = vcvt.s32.f32 %v4089_v36  ;;  %v4117_v32 = vand.u32 65535, %v9187_v20 }
 0xa8a   :  { %4055 = vmin.xlane.f32.xlu0 %v4054_v26 }
 0xa8b   :  { %v9280_v58 = vpop.xlane.xlu0 %4079 }
 0xa8c   :  { %vm4081_vm7 = vcmp.eq.f32.partialorder %v9141_v63, %v9280_v58 }
 0xa8d   :  { %v9284_v24 = vpop.xlane.xlu1 %4065  ;;  %v4082_v41 = vsel %vm4081_vm7, %v4077_v40, inf }
 0xa8e   :  { %vm4067_vm8 = vcmp.eq.f32.partialorder %v9145_v53, %v9284_v24  ;;  %4083 = vmin.xlane.f32.xlu0 %v4082_v41  ;;  %v4119_v41 = vcvt.s32.f32 %v4117_v32 }
 0xa8f   :  { %v4068_v28 = vsel %vm4067_vm8, %v4063_v51, inf  ;;  %v4159_v51 = vand.u32 65535, %v9202_v34 }
 0xa90   :  { %4069 = vmin.xlane.f32.xlu1 %v4068_v28  ;;  %v4145_v28 = vand.u32 65535, %v9207_v13 }
 0xa91   :  { %v4161_v36 = vcvt.s32.f32 %v4159_v51 }
 0xa9d   :  { %v9290_v18 = vpop.xlane.xlu0 %4107 }
 0xa9e   :  { %vm4109_vm9 = vcmp.eq.f32.partialorder %v9168_v22, %v9290_v18 }
 0xa9f   :  { %v4110_v63 = vsel %vm4109_vm9, %v4105_v59, inf }
 0xaa0   :  { %v9294_v31 = vpop.xlane.xlu1 %4093  ;;  %4111 = vmin.xlane.f32.xlu0 %v4110_v63  ;;  %v4147_v63 = vcvt.s32.f32 %v4145_v28 }
 0xaa1   :  { %vm4095_vm10 = vcmp.eq.f32.partialorder %v9175_v12, %v9294_v31 }
 0xaa2   :  { %v4096_v53 = vsel %vm4095_vm10, %v4091_v37, inf  ;;  %v4187_v37 = vand.u32 65535, %v9222_v7 }
 0xaa3   :  { %4097 = vmin.xlane.f32.xlu1 %v4096_v53  ;;  %v4173_v53 = vand.u32 65535, %v9227_v33 }
 0xaa4   :  { %v4189_v32 = vcvt.s32.f32 %v4187_v37 }
 0xab0   :  { %v9300_v26 = vpop.xlane.xlu0 %4135 }
 0xab1   :  { %vm4137_vm11 = vcmp.eq.f32.partialorder %v9190_v21, %v9300_v26 }
 0xab2   :  { %v4138_v22 = vsel %vm4137_vm11, %v4133_v14, inf }
 0xab3   :  { %v9304_v40 = vpop.xlane.xlu1 %4121  ;;  %4139 = vmin.xlane.f32.xlu0 %v4138_v22  ;;  %v4175_v22 = vcvt.s32.f32 %v4173_v53 }
 0xab4   :  { %vm4123_vm13 = vcmp.eq.f32.partialorder %v9195_v44, %v9304_v40 }
 0xab5   :  { %v4124_v12 = vsel %vm4123_vm13, %v4119_v41, inf  ;;  %v4215_v41 = vand.u32 65535, %v9242_v55 }
 0xab6   :  { %4125 = vmin.xlane.f32.xlu1 %v4124_v12  ;;  %v4201_v12 = vand.u32 65535, %v9247_v54 }
 0xab7   :  { %v4217_v28 = vcvt.s32.f32 %v4215_v41 }
 0xac3   :  { %v9310_v16 = vpop.xlane.xlu0 %4163 }
 0xac4   :  { %vm4165_vm12 = vcmp.eq.f32.partialorder %v9210_v3, %v9310_v16 }
 0xac5   :  { %v4166_v21 = vsel %vm4165_vm12, %v4161_v36, inf }
 0xac6   :  { %v9314_v59 = vpop.xlane.xlu1 %4149  ;;  %4167 = vmin.xlane.f32.xlu0 %v4166_v21  ;;  %v4203_v21 = vcvt.s32.f32 %v4201_v12 }
 0xac7   :  { %vm4151_vm14 = vcmp.eq.f32.partialorder %v9215_v9, %v9314_v59 }
 0xac8   :  { %v4152_v44 = vsel %vm4151_vm14, %v4147_v63, inf  ;;  %v4016_v63 = vcvt.f32.s32 %v9260_v43 }
 0xac9   :  { %4153 = vmin.xlane.f32.xlu1 %v4152_v44  ;;  %v4030_v44 = vcvt.f32.s32 %v9265_v27 }
 0xaca   :  { %v4017_v53 = vshll.u32 %v4016_v63, 16 }
 0xad6   :  { %v9320_v39 = vpop.xlane.xlu0 %4191 }
 0xad7   :  { %vm4193_vm15 = vcmp.eq.f32.partialorder %v9230_v50, %v9320_v39 }
 0xad8   :  { %v4194_v3 = vsel %vm4193_vm15, %v4189_v32, inf  ;;  %v4044_v32 = vcvt.f32.s32 %v9270_v0 }
 0xad9   :  { %v9324_v14 = vpop.xlane.xlu1 %4177  ;;  %4195 = vmin.xlane.f32.xlu0 %v4194_v3 }
 0xada   :  { %vm4179_vm0 = vcmp.eq.f32.partialorder %v9235_v48, %v9324_v14 }
 0xadb   :  { %v4180_v9 = vsel %vm4179_vm0, %v4175_v22, inf  ;;  %v4031_v22 = vshll.u32 %v4030_v44, 16 }
 0xadc   :  { %4181 = vmin.xlane.f32.xlu1 %v4180_v9  ;;  %v4058_v9 = vcvt.f32.s32 %v9274_v25 }
 0xade   :  { %v4059_v27 = vshll.u32 %v4058_v9, 16 }
 0xae9   :  { %v9330_v51 = vpop.xlane.xlu0 %4219 }
 0xaea   :  { %vm4221_vm1 = vcmp.eq.f32.partialorder %v9250_v62, %v9330_v51 }
 0xaeb   :  { %v4222_v50 = vsel %vm4221_vm1, %v4217_v28, inf }
 0xaec   :  { %v9334_v36 = vpop.xlane.xlu1 %4205  ;;  %4223 = vmin.xlane.f32.xlu0 %v4222_v50 }
 0xaed   :  { %vm4207_vm2 = vcmp.eq.f32.partialorder %v9255_v60, %v9334_v36  ;;  %v4045_v60 = vshll.u32 %v4044_v32, 16 }
 0xaee   :  { %v4208_v48 = vsel %vm4207_vm2, %v4203_v21, inf  ;;  %v4086_v21 = vcvt.f32.s32 %v9280_v58 }
 0xaef   :  { %4209 = vmin.xlane.f32.xlu1 %v4208_v48 }
 0xb12   :  { %v4014_v37 = vpop.xlane.xlu1 %4013 }
 0xb13   :  { %v4015_v3 = vcvt.f32.s32 %v4014_v37  ;;  %v4028_v62 = vpop.xlane.xlu0 %4027  ;;  %v4072_v37 = vcvt.f32.s32 %v9284_v24 }
 0xb14   :  { %v4029_v41 = vcvt.f32.s32 %v4028_v62 }
 0xb15   :  { %v4018_v12 = vadd.s32 %v4017_v53, %v4015_v3  ;;  %v4087_v3 = vshll.u32 %v4086_v21, 16 }
 0xb16   :  { %v4032_v28 = vadd.s32 %v4031_v22, %v4029_v41  ;;  %v4042_v50 = vpop.xlane.xlu1 %4041 }
 0xb17   :  { %v4043_v48 = vcvt.f32.s32 %v4042_v50  ;;  %v4056_v43 = vpop.xlane.xlu0 %4055  ;;  %vm4229_vm3 = vcmp.eq.s32.totalorder %v9090_v23, %v4018_v12  ;;  %v4073_v12 = vshll.u32 %v4072_v37, 16 }
 0xb18   :  { %vm4230_vm4 = vcmp.eq.s32.totalorder %v9094_v4, %v4032_v28  ;;  %v4057_v0 = vcvt.f32.s32 %v4056_v43  ;;  %v9346_v63 = vsel %vm4229_vm3, 2147483647, %v9090_v23  ;;  %6077 = vmatprep.mubr.msk.f32.mxu0 %vm4229_vm3, %v9858_v6 }
 0xb19   :  { %v9350_v25 = vsel %vm4230_vm4, 2147483647, %v9094_v4  ;;  %v4046_v44 = vadd.s32 %v4045_v60, %v4043_v48  ;;  %6078 = vmatmul.mubr.msk.f32.vlgmr.msra.gmra.mrb[0].mxu0 %vm4230_vm4, %v9858_v6  ;;  %v4455_v58 = vshra.s32 %v9346_v63, 16 }
 0xb1a   :  { %v4060_v53 = vadd.s32 %v4059_v27, %v4057_v0  ;;  %v4469_v32 = vshra.s32 %v9350_v25, 16  ;;  %6448 = vmatpush3.bf16.msra.mxu0 %v7282_v42 }
 0xb1b   :  { %v4084_v23 = vpop.xlane.xlu0 %4083  ;;  %vm4231_vm5 = vcmp.eq.s32.totalorder %v9106_v5, %v4046_v44  ;;  %v9358_v62 = vcvt.s32.f32 %v4455_v58  ;;  %6450 = vmatprep.subr.bf16.mxu0 %v7287_v11 }
 0xb1c   :  { %v4085_v4 = vcvt.f32.s32 %v4084_v23  ;;  %v9362_v22 = vsel %vm4231_vm5, 2147483647, %v9106_v5  ;;  %6080 = vmatprep.mubr.msk.f32.mxu0 %vm4231_vm5, %v9858_v6  ;;  %vm4232_vm6 = vcmp.eq.s32.totalorder %v9114_v19, %v4060_v53  ;;  %v9366_v24 = vcvt.s32.f32 %v4469_v32 }
 0xb1d   :  { %4458 = vmin.xlane.f32.xlu1 %v9358_v62  ;;  %v4070_v42 = vpop.xlane.xlu1 %4069  ;;  %v9370_v9 = vsel %vm4232_vm6, 2147483647, %v9114_v19  ;;  %6081 = vmatmul.mubr.msk.f32.gmra.mrb[2].mxu0 %vm4232_vm6, %v9858_v6  ;;  %v4483_v41 = vshra.s32 %v9362_v22, 16 }
 0xb1e   :  { %v4088_v28 = vadd.s32 %v4087_v3, %v4085_v4  ;;  %v4071_v5 = vcvt.f32.s32 %v4070_v42  ;;  %4472 = vmin.xlane.f32.xlu0 %v9366_v24  ;;  %v4497_v50 = vshra.s32 %v9370_v9, 16  ;;  %6452 = vmatpush3.bf16.msra.mxu0 %v7287_v11  ;;  %v4142_v4 = vcvt.f32.s32 %v9300_v26 }
 0xb1f   :  { %v9377_v60 = vcvt.s32.f32 %v4483_v41  ;;  %6454 = vmatprep.subr.bf16.mxu0 %v7300_v56 }
 0xb20   :  { %v4074_v21 = vadd.s32 %v4073_v12, %v4071_v5  ;;  %v9380_v19 = vcvt.s32.f32 %v4497_v50  ;;  %vm4234_vm7 = vcmp.eq.s32.totalorder %v9129_v57, %v4088_v28  ;;  %v4143_v41 = vshll.u32 %v4142_v4, 16 }
 0xb21   :  { %4486 = vmin.xlane.f32.xlu1 %v9377_v60  ;;  %v9385_v48 = vsel %vm4234_vm7, 2147483647, %v9129_v57 }
 0xb22   :  { %4500 = vmin.xlane.f32.xlu0 %v9380_v19  ;;  %vm4233_vm8 = vcmp.eq.s32.totalorder %v9136_v46, %v4074_v21  ;;  %v4525_v11 = vshra.s32 %v9385_v48, 16  ;;  %6456 = vmatpush3.bf16.msra.mxu0 %v7300_v56  ;;  %v4114_v56 = vcvt.f32.s32 %v9290_v18 }
 0xb23   :  { %v9392_v43 = vsel %vm4233_vm8, 2147483647, %v9136_v46  ;;  %6083 = vmatprep.mubr.msk.f32.mxu0 %vm4233_vm8, %v9858_v6  ;;  %6458 = vmatprep.subr.bf16.mxu0 %v7312_v49  ;;  %v4100_v46 = vcvt.f32.s32 %v9294_v31 }
 0xb24   :  { %6084 = vmatmul.mubr.msk.f32.gmra.mrb[4].mxu0 %vm4234_vm7, %v9858_v6  ;;  %v9397_v27 = vcvt.s32.f32 %v4525_v11  ;;  %v4511_v57 = vshra.s32 %v9392_v43, 16  ;;  %v4115_v58 = vshll.u32 %v4114_v56, 16 }
 0xb25   :  { %v4101_v32 = vshll.u32 %v4100_v46, 16 }
 0xb26   :  { %4528 = vmin.xlane.f32.xlu0 %v9397_v27  ;;  %v9401_v0 = vcvt.s32.f32 %v4511_v57  ;;  %6460 = vmatpush3.bf16.msra.mxu0 %v7312_v49 }
 0xb27   :  { %6462 = vmatprep.subr.bf16.mxu0 %v7324_v35 }
 0xb28   :  { %4514 = vmin.xlane.f32.xlu1 %v9401_v0 }
 0xb2a   :  { %6464 = vmatpush3.bf16.msra.mxu0 %v7324_v35 }
 0xb2b   :  { %6466 = vmatprep.subr.bf16.mxu0 %v7338_v45 }
 0xb2d   :  { %v4112_v44 = vpop.xlane.xlu0 %4111 }
 0xb2e   :  { %v4113_v37 = vcvt.f32.s32 %v4112_v44  ;;  %6468 = vmatpush3.bf16.msra.mxu0 %v7338_v45  ;;  %v4156_v44 = vcvt.f32.s32 %v9314_v59 }
 0xb2f   :  { %6470 = vmatprep.subr.bf16.mxu0 %v7360_v29 }
 0xb30   :  { %v4116_v49 = vadd.s32 %v4115_v58, %v4113_v37  ;;  %v4098_v53 = vpop.xlane.xlu1 %4097 }
 0xb31   :  { %v4099_v3 = vcvt.f32.s32 %v4098_v53 }
 0xb32   :  { %vm4236_vm9 = vcmp.eq.s32.totalorder %v9159_v47, %v4116_v49  ;;  %6472 = vmatpush3.bf16.msra.mxu0 %v7360_v29 }
 0xb33   :  { %v4102_v35 = vadd.s32 %v4101_v32, %v4099_v3  ;;  %v9415_v18 = vsel %vm4236_vm9, 2147483647, %v9159_v47  ;;  %6474 = vmatprep.subr.bf16.mxu0 %v7393_v2  ;;  %v4157_v32 = vshll.u32 %v4156_v44, 16 }
 0xb34   :  { %v4553_v31 = vshra.s32 %v9415_v18, 16 }
 0xb35   :  { %vm4235_vm10 = vcmp.eq.s32.totalorder %v9165_v61, %v4102_v35 }
 0xb36   :  { %v9421_v45 = vsel %vm4235_vm10, 2147483647, %v9165_v61  ;;  %6086 = vmatprep.mubr.msk.f32.mxu0 %vm4235_vm10, %v9858_v6  ;;  %v9424_v23 = vcvt.s32.f32 %v4553_v31  ;;  %6476 = vmatpush3.bf16.msra.mxu0 %v7393_v2  ;;  %v4128_v61 = vcvt.f32.s32 %v9304_v40 }
 0xb37   :  { %6087 = vmatmul.mubr.msk.f32.gmra.mrb[6].mxu0 %vm4236_vm9, %v9858_v6  ;;  %v4539_v29 = vshra.s32 %v9421_v45, 16 }
 0xb38   :  { %4556 = vmin.xlane.f32.xlu0 %v9424_v23  ;;  %v4129_v2 = vshll.u32 %v4128_v61, 16 }
 0xb39   :  { %v9430_v47 = vcvt.s32.f32 %v4539_v29 }
 0xb3b   :  { %4542 = vmin.xlane.f32.xlu1 %v9430_v47 }
 0xb40   :  { %v4140_v42 = vpop.xlane.xlu0 %4139 }
 0xb41   :  { %v4141_v12 = vcvt.f32.s32 %v4140_v42  ;;  %v4184_v42 = vcvt.f32.s32 %v9324_v14 }
 0xb43   :  { %v4144_v28 = vadd.s32 %v4143_v41, %v4141_v12  ;;  %v4126_v5 = vpop.xlane.xlu1 %4125 }
 0xb44   :  { %v4127_v50 = vcvt.f32.s32 %v4126_v5 }
 0xb45   :  { %vm4238_vm11 = vcmp.eq.s32.totalorder %v9182_v38, %v4144_v28 }
 0xb46   :  { %v4130_v21 = vadd.s32 %v4129_v2, %v4127_v50  ;;  %v9437_v11 = vsel %vm4238_vm11, 2147483647, %v9182_v38  ;;  %v4170_v38 = vcvt.f32.s32 %v9310_v16  ;;  %v4185_v2 = vshll.u32 %v4184_v42, 16 }
 0xb47   :  { %v4581_v57 = vshra.s32 %v9437_v11, 16 }
 0xb48   :  { %vm4237_vm13 = vcmp.eq.s32.totalorder %v9187_v20, %v4130_v21  ;;  %v4171_v58 = vshll.u32 %v4170_v38, 16 }
 0xb49   :  { %v9442_v26 = vsel %vm4237_vm13, 2147483647, %v9187_v20  ;;  %6089 = vmatprep.mubr.msk.f32.mxu0 %vm4237_vm13, %v9858_v6  ;;  %v9445_v40 = vcvt.s32.f32 %v4581_v57 }
 0xb4a   :  { %6090 = vmatmul.mubr.msk.f32.gmra.mrb[8].mxu0 %vm4238_vm11, %v9858_v6  ;;  %v4567_v56 = vshra.s32 %v9442_v26, 16 }
 0xb4b   :  { %4584 = vmin.xlane.f32.xlu0 %v9445_v40 }
 0xb4c   :  { %v9450_v46 = vcvt.s32.f32 %v4567_v56 }
 0xb4e   :  { %4570 = vmin.xlane.f32.xlu1 %v9450_v46 }
 0xb53   :  { %v4168_v20 = vpop.xlane.xlu0 %4167 }
 0xb54   :  { %v4169_v37 = vcvt.f32.s32 %v4168_v20  ;;  %v4212_v20 = vcvt.f32.s32 %v9334_v36 }
 0xb56   :  { %v4172_v49 = vadd.s32 %v4171_v58, %v4169_v37  ;;  %v4154_v53 = vpop.xlane.xlu1 %4153 }
 0xb57   :  { %v4155_v3 = vcvt.f32.s32 %v4154_v53 }
 0xb58   :  { %vm4240_vm12 = vcmp.eq.s32.totalorder %v9202_v34, %v4172_v49 }
 0xb59   :  { %v4158_v35 = vadd.s32 %v4157_v32, %v4155_v3  ;;  %v9457_v31 = vsel %vm4240_vm12, 2147483647, %v9202_v34  ;;  %v4198_v34 = vcvt.f32.s32 %v9320_v39  ;;  %v4213_v32 = vshll.u32 %v4212_v20, 16 }
 0xb5a   :  { %v4609_v29 = vshra.s32 %v9457_v31, 16  ;;  %v4524_v20 = vand.u32 65535, %v9385_v48 }
 0xb5b   :  { %vm4239_vm14 = vcmp.eq.s32.totalorder %v9207_v13, %v4158_v35  ;;  %v4199_v41 = vshll.u32 %v4198_v34, 16 }
 0xb5c   :  { %v9462_v16 = vsel %vm4239_vm14, 2147483647, %v9207_v13  ;;  %6092 = vmatprep.mubr.msk.f32.mxu0 %vm4239_vm14, %v9858_v6  ;;  %v9465_v59 = vcvt.s32.f32 %v4609_v29 }
 0xb5d   :  { %6093 = vmatmul.mubr.msk.f32.gmra.mrb[10].mxu0 %vm4240_vm12, %v9858_v6  ;;  %v4595_v4 = vshra.s32 %v9462_v16, 16 }
 0xb5e   :  { %4612 = vmin.xlane.f32.xlu0 %v9465_v59 }
 0xb5f   :  { %v9470_v61 = vcvt.s32.f32 %v4595_v4 }
 0xb61   :  { %4598 = vmin.xlane.f32.xlu1 %v9470_v61 }
 0xb66   :  { %v4196_v13 = vpop.xlane.xlu0 %4195 }
 0xb67   :  { %v4197_v12 = vcvt.f32.s32 %v4196_v13  ;;  %v4468_v13 = vand.u32 65535, %v9350_v25 }
 0xb69   :  { %v4200_v28 = vadd.s32 %v4199_v41, %v4197_v12  ;;  %v4182_v5 = vpop.xlane.xlu1 %4181  ;;  %v4482_v12 = vand.u32 65535, %v9362_v22 }
 0xb6a   :  { %v4183_v50 = vcvt.f32.s32 %v4182_v5  ;;  %v4470_v5 = vcvt.s32.f32 %v4468_v13 }
 0xb6b   :  { %vm4242_vm15 = vcmp.eq.s32.totalorder %v9222_v7, %v4200_v28 }
 0xb6c   :  { %v4186_v21 = vadd.s32 %v4185_v2, %v4183_v50  ;;  %v9477_v57 = vsel %vm4242_vm15, 2147483647, %v9222_v7  ;;  %v4226_v7 = vcvt.f32.s32 %v9330_v51  ;;  %v4496_v2 = vand.u32 65535, %v9370_v9 }
 0xb6d   :  { %v4637_v56 = vshra.s32 %v9477_v57, 16 }
 0xb6e   :  { %vm4241_vm0 = vcmp.eq.s32.totalorder %v9227_v33, %v4186_v21  ;;  %v4227_v58 = vshll.u32 %v4226_v7, 16 }
 0xb6f   :  { %v9482_v39 = vsel %vm4241_vm0, 2147483647, %v9227_v33  ;;  %6095 = vmatprep.mubr.msk.f32.mxu0 %vm4241_vm0, %v9858_v6  ;;  %v9485_v14 = vcvt.s32.f32 %v4637_v56 }
 0xb70   :  { %6096 = vmatmul.mubr.msk.f32.gmra.mrb[12].mxu0 %vm4242_vm15, %v9858_v6  ;;  %v4623_v38 = vshra.s32 %v9482_v39, 16 }
 0xb71   :  { %4640 = vmin.xlane.f32.xlu0 %v9485_v14 }
 0xb72   :  { %v9490_v44 = vcvt.s32.f32 %v4623_v38  ;;  %v4484_v38 = vcvt.s32.f32 %v4482_v12  ;;  %v4566_v12 = vand.u32 65535, %v9442_v26 }
 0xb74   :  { %4626 = vmin.xlane.f32.xlu1 %v9490_v44 }
 0xb79   :  { %v4224_v33 = vpop.xlane.xlu0 %4223 }
 0xb7a   :  { %v4225_v37 = vcvt.f32.s32 %v4224_v33 }
 0xb7c   :  { %v4228_v49 = vadd.s32 %v4227_v58, %v4225_v37  ;;  %v4210_v53 = vpop.xlane.xlu1 %4209  ;;  %v4510_v58 = vand.u32 65535, %v9392_v43 }
 0xb7d   :  { %v4211_v3 = vcvt.f32.s32 %v4210_v53 }
 0xb7e   :  { %vm4244_vm1 = vcmp.eq.s32.totalorder %v9242_v55, %v4228_v49  ;;  %v4526_v49 = vcvt.s32.f32 %v4524_v20 }
 0xb7f   :  { %v4214_v35 = vadd.s32 %v4213_v32, %v4211_v3  ;;  %v9497_v29 = vsel %vm4244_vm1, 2147483647, %v9242_v55  ;;  %v4454_v55 = vand.u32 65535, %v9346_v63  ;;  %v4512_v32 = vcvt.s32.f32 %v4510_v58 }
 0xb80   :  { %v4665_v4 = vshra.s32 %v9497_v29, 16  ;;  %v4552_v3 = vand.u32 65535, %v9415_v18 }
 0xb81   :  { %vm4243_vm2 = vcmp.eq.s32.totalorder %v9247_v54, %v4214_v35  ;;  %v4456_v41 = vcvt.s32.f32 %v4454_v55  ;;  %v4538_v35 = vand.u32 65535, %v9421_v45 }
 0xb82   :  { %v9502_v51 = vsel %vm4243_vm2, 2147483647, %v9247_v54  ;;  %6098 = vmatprep.mubr.msk.f32.mxu0 %vm4243_vm2, %v9858_v6  ;;  %v9505_v36 = vcvt.s32.f32 %v4665_v4 }
 0xb83   :  { %6099 = vmatmul.mubr.msk.f32.gmra.mrb[14].mxu0 %vm4244_vm1, %v9858_v6  ;;  %v4651_v34 = vshra.s32 %v9502_v51, 16  ;;  %v4540_v13 = vcvt.s32.f32 %v4538_v35 }
 0xb84   :  { %4668 = vmin.xlane.f32.xlu0 %v9505_v36 }
 0xb85   :  { %v9510_v42 = vcvt.s32.f32 %v4651_v34  ;;  %v4554_v34 = vcvt.s32.f32 %v4552_v3 }
 0xb87   :  { %4654 = vmin.xlane.f32.xlu1 %v9510_v42 }
 0xbaa   :  { %v9515_v54 = vpop.xlane.xlu1 %4458 }
 0xbab   :  { %vm4460_vm3 = vcmp.eq.f32.partialorder %v9358_v62, %v9515_v54  ;;  %v9520_v28 = vpop.xlane.xlu0 %4472  ;;  %v4498_v62 = vcvt.s32.f32 %v4496_v2 }
 0xbac   :  { %vm4474_vm4 = vcmp.eq.f32.partialorder %v9366_v24, %v9520_v28  ;;  %v4461_v50 = vsel %vm4460_vm3, %v4456_v41, inf  ;;  %v4580_v41 = vand.u32 65535, %v9437_v11 }
 0xbad   :  { %4462 = vmin.xlane.f32.xlu1 %v4461_v50  ;;  %v4475_v21 = vsel %vm4474_vm4, %v4470_v5, inf }
 0xbae   :  { %v9525_v56 = vpop.xlane.xlu1 %4486  ;;  %4476 = vmin.xlane.f32.xlu0 %v4475_v21  ;;  %v4582_v2 = vcvt.s32.f32 %v4580_v41  ;;  %v4568_v21 = vcvt.s32.f32 %v4566_v12 }
 0xbaf   :  { %vm4488_vm5 = vcmp.eq.f32.partialorder %v9377_v60, %v9525_v56  ;;  %v9529_v7 = vpop.xlane.xlu0 %4500 }
 0xbb0   :  { %vm4502_vm6 = vcmp.eq.f32.partialorder %v9380_v19, %v9529_v7  ;;  %v4489_v33 = vsel %vm4488_vm5, %v4484_v38, inf  ;;  %v4608_v38 = vand.u32 65535, %v9457_v31 }
 0xbb1   :  { %4490 = vmin.xlane.f32.xlu1 %v4489_v33  ;;  %v4503_v24 = vsel %vm4502_vm6, %v4498_v62, inf  ;;  %v4594_v62 = vand.u32 65535, %v9462_v16 }
 0xbb2   :  { %4504 = vmin.xlane.f32.xlu0 %v4503_v24  ;;  %v4610_v33 = vcvt.s32.f32 %v4608_v38  ;;  %v4493_v38 = vcvt.f32.s32 %v9525_v56 }
 0xbb3   :  { %v9535_v37 = vpop.xlane.xlu0 %4528  ;;  %v4596_v58 = vcvt.s32.f32 %v4594_v62 }
 0xbb4   :  { %vm4530_vm7 = vcmp.eq.f32.partialorder %v9397_v27, %v9535_v37  ;;  %v4535_v56 = vcvt.f32.s32 %v9535_v37 }
 0xbb5   :  { %v9539_v60 = vpop.xlane.xlu1 %4514  ;;  %v4531_v53 = vsel %vm4530_vm7, %v4526_v49, inf  ;;  %v4636_v49 = vand.u32 65535, %v9477_v57 }
 0xbb6   :  { %vm4516_vm8 = vcmp.eq.f32.partialorder %v9401_v0, %v9539_v60  ;;  %4532 = vmin.xlane.f32.xlu0 %v4531_v53  ;;  %v4622_v53 = vand.u32 65535, %v9482_v39 }
 0xbb7   :  { %v4517_v19 = vsel %vm4516_vm8, %v4512_v32, inf }
 0xbb8   :  { %4518 = vmin.xlane.f32.xlu1 %v4517_v19  ;;  %v4638_v19 = vcvt.s32.f32 %v4636_v49  ;;  %v4624_v35 = vcvt.s32.f32 %v4622_v53 }
 0xbc5   :  { %v9545_v4 = vpop.xlane.xlu0 %4556 }
 0xbc6   :  { %vm4558_vm9 = vcmp.eq.f32.partialorder %v9424_v23, %v9545_v4 }
 0xbc7   :  { %v4559_v27 = vsel %vm4558_vm9, %v4554_v34, inf  ;;  %v4664_v34 = vand.u32 65535, %v9497_v29 }
 0xbc8   :  { %v9549_v55 = vpop.xlane.xlu1 %4542  ;;  %4560 = vmin.xlane.f32.xlu0 %v4559_v27  ;;  %v4650_v27 = vand.u32 65535, %v9502_v51 }
 0xbc9   :  { %vm4544_vm10 = vcmp.eq.f32.partialorder %v9430_v47, %v9549_v55 }
 0xbca   :  { %v4545_v0 = vsel %vm4544_vm10, %v4540_v13, inf  ;;  %v4652_v12 = vcvt.s32.f32 %v4650_v27 }
 0xbcb   :  { %4546 = vmin.xlane.f32.xlu1 %v4545_v0  ;;  %v4666_v0 = vcvt.s32.f32 %v4664_v34 }
 0xbd8   :  { %v9555_v5 = vpop.xlane.xlu0 %4584 }
 0xbd9   :  { %vm4586_vm11 = vcmp.eq.f32.partialorder %v9445_v40, %v9555_v5 }
 0xbda   :  { %v4587_v23 = vsel %vm4586_vm11, %v4582_v2, inf  ;;  %v4465_v2 = vcvt.f32.s32 %v9515_v54 }
 0xbdb   :  { %v9559_v50 = vpop.xlane.xlu1 %4570  ;;  %4588 = vmin.xlane.f32.xlu0 %v4587_v23  ;;  %v4479_v23 = vcvt.f32.s32 %v9520_v28 }
 0xbdc   :  { %vm4572_vm13 = vcmp.eq.f32.partialorder %v9450_v46, %v9559_v50 }
 0xbdd   :  { %v4573_v47 = vsel %vm4572_vm13, %v4568_v21, inf }
 0xbde   :  { %4574 = vmin.xlane.f32.xlu1 %v4573_v47  ;;  %v4466_v47 = vshll.u32 %v4465_v2, 16 }
 0xbeb   :  { %v9565_v20 = vpop.xlane.xlu0 %4612 }
 0xbec   :  { %vm4614_vm12 = vcmp.eq.f32.partialorder %v9465_v59, %v9565_v20 }
 0xbed   :  { %v4615_v40 = vsel %vm4614_vm12, %v4610_v33, inf  ;;  %v4480_v33 = vshll.u32 %v4479_v23, 16 }
 0xbee   :  { %v9569_v24 = vpop.xlane.xlu1 %4598  ;;  %4616 = vmin.xlane.f32.xlu0 %v4615_v40  ;;  %v4507_v40 = vcvt.f32.s32 %v9529_v7  ;;  %v4521_v7 = vcvt.f32.s32 %v9539_v60 }
 0xbef   :  { %vm4600_vm14 = vcmp.eq.f32.partialorder %v9470_v61, %v9569_v24 }
 0xbf0   :  { %v4601_v46 = vsel %vm4600_vm14, %v4596_v58, inf  ;;  %v4508_v54 = vshll.u32 %v4507_v40, 16 }
 0xbf1   :  { %4602 = vmin.xlane.f32.xlu1 %v4601_v46 }
 0xbfe   :  { %v9575_v32 = vpop.xlane.xlu0 %4640 }
 0xbff   :  { %vm4642_vm15 = vcmp.eq.f32.partialorder %v9485_v14, %v9575_v32 }
 0xc00   :  { %v4643_v59 = vsel %vm4642_vm15, %v4638_v19, inf }
 0xc01   :  { %v9579_v3 = vpop.xlane.xlu1 %4626  ;;  %4644 = vmin.xlane.f32.xlu0 %v4643_v59 }
 0xc02   :  { %vm4628_vm0 = vcmp.eq.f32.partialorder %v9490_v44, %v9579_v3 }
 0xc03   :  { %v4629_v61 = vsel %vm4628_vm0, %v4624_v35, inf }
 0xc04   :  { %4630 = vmin.xlane.f32.xlu1 %v4629_v61 }
 0xc11   :  { %v9585_v13 = vpop.xlane.xlu0 %4668 }
 0xc12   :  { %vm4670_vm1 = vcmp.eq.f32.partialorder %v9505_v36, %v9585_v13 }
 0xc13   :  { %v4671_v14 = vsel %vm4670_vm1, %v4666_v0, inf  ;;  %v4522_v0 = vshll.u32 %v4521_v7, 16 }
 0xc14   :  { %v9589_v41 = vpop.xlane.xlu1 %4654  ;;  %4672 = vmin.xlane.f32.xlu0 %v4671_v14 }
 0xc15   :  { %vm4656_vm2 = vcmp.eq.f32.partialorder %v9510_v42, %v9589_v41  ;;  %v4494_v42 = vshll.u32 %v4493_v38, 16 }
 0xc16   :  { %v4657_v44 = vsel %vm4656_vm2, %v4652_v12, inf }
 0xc17   :  { %4658 = vmin.xlane.f32.xlu1 %v4657_v44 }
 0xc3a   :  { %v4463_v21 = vpop.xlane.xlu1 %4462 }
 0xc3b   :  { %v4464_v62 = vcvt.f32.s32 %v4463_v21  ;;  %v4477_v36 = vpop.xlane.xlu0 %4476 }
 0xc3c   :  { %v4478_v58 = vcvt.f32.s32 %v4477_v36 }
 0xc3d   :  { %v4467_v46 = vadd.s32 %v4466_v47, %v4464_v62 }
 0xc3e   :  { %v4481_v49 = vadd.s32 %v4480_v33, %v4478_v58  ;;  %v4491_v53 = vpop.xlane.xlu1 %4490 }
 0xc3f   :  { %v4492_v19 = vcvt.f32.s32 %v4491_v53  ;;  %v4505_v59 = vpop.xlane.xlu0 %4504  ;;  %vm4678_vm3 = vcmp.eq.s32.totalorder %v9346_v63, %v4467_v46  ;;  %v4536_v63 = vshll.u32 %v4535_v56, 16 }
 0xc40   :  { %vm4679_vm4 = vcmp.eq.s32.totalorder %v9350_v25, %v4481_v49  ;;  %v4506_v28 = vcvt.f32.s32 %v4505_v59  ;;  %6133 = vmatprep.mubr.msk.f32.mxu0 %vm4678_vm3, %v9858_v6  ;;  %vm4936_vm3 = vcmask 23552  }
 0xc41   :  { %v4495_v35 = vadd.s32 %v4494_v42, %v4492_v19  ;;  %6134 = vmatmul.mubr.msk.f32.vlgmr.msra.gmra.mrb[0].mxu0 %vm4679_vm4, %v9858_v6 }
 0xc42   :  { %v4509_v61 = vadd.s32 %v4508_v54, %v4506_v28 }
 0xc43   :  { %v4533_v34 = vpop.xlane.xlu0 %4532  ;;  %vm4680_vm5 = vcmp.eq.s32.totalorder %v9362_v22, %v4495_v35  ;;  %v4563_v22 = vcvt.f32.s32 %v9545_v4 }
 0xc44   :  { %v4534_v27 = vcvt.f32.s32 %v4533_v34  ;;  %6136 = vmatprep.mubr.msk.f32.mxu0 %vm4680_vm5, %v9858_v6  ;;  %vm4681_vm6 = vcmp.eq.s32.totalorder %v9370_v9, %v4509_v61  ;;  %v4549_v9 = vcvt.f32.s32 %v9549_v55 }
 0xc45   :  { %v4519_v25 = vpop.xlane.xlu1 %4518  ;;  %6137 = vmatmul.mubr.msk.f32.gmra.mrb[2].mxu0 %vm4681_vm6, %v9858_v6  ;;  %v4564_v2 = vshll.u32 %v4563_v22, 16 }
 0xc46   :  { %v4520_v37 = vcvt.f32.s32 %v4519_v25  ;;  %v4537_v14 = vadd.s32 %v4536_v63, %v4534_v27  ;;  %v4550_v21 = vshll.u32 %v4549_v9, 16 }
 0xc48   :  { %v4523_v12 = vadd.s32 %v4522_v0, %v4520_v37  ;;  %vm4683_vm8 = vcmp.eq.s32.totalorder %v9385_v48, %v4537_v14  ;;  %v4591_v48 = vcvt.f32.s32 %v9555_v5 }
 0xc4a   :  { %vm4682_vm7 = vcmp.eq.s32.totalorder %v9392_v43, %v4523_v12  ;;  %v4577_v43 = vcvt.f32.s32 %v9559_v50  ;;  %v4592_v36 = vshll.u32 %v4591_v48, 16 }
 0xc4b   :  { %6139 = vmatprep.mubr.msk.f32.mxu0 %vm4682_vm7, %v9858_v6 }
 0xc4c   :  { %6140 = vmatmul.mubr.msk.f32.gmra.mrb[4].mxu0 %vm4683_vm8, %v9858_v6  ;;  %v4578_v40 = vshll.u32 %v4577_v43, 16 }
 0xc55   :  { %v4561_v60 = vpop.xlane.xlu0 %4560 }
 0xc56   :  { %v4562_v44 = vcvt.f32.s32 %v4561_v60 }
 0xc58   :  { %v4547_v23 = vpop.xlane.xlu1 %4546  ;;  %v4565_v38 = vadd.s32 %v4564_v2, %v4562_v44 }
 0xc59   :  { %v4548_v47 = vcvt.f32.s32 %v4547_v23 }
 0xc5a   :  { %vm4685_vm10 = vcmp.eq.s32.totalorder %v9415_v18, %v4565_v38  ;;  %v4619_v18 = vcvt.f32.s32 %v9565_v20 }
 0xc5b   :  { %v4551_v62 = vadd.s32 %v4550_v21, %v4548_v47  ;;  %v6655_v21 = vld [vmem:[%s9769_s0 + $0x10] sm:$0xff] }
 0xc5c   :  { %v4620_v53 = vshll.u32 %v4619_v18, 16  ;;  %v4889_v47 = vmul.f32 10.0, %v6655_v21  ;;  %v6664_v21 = vld [vmem:[%s9769_s0 + $0x68] sm:$0xff] }
 0xc5d   :  { %vm4684_vm9 = vcmp.eq.s32.totalorder %v9421_v45, %v4551_v62  ;;  %v4605_v45 = vcvt.f32.s32 %v9569_v24 }
 0xc5e   :  { %6142 = vmatprep.mubr.msk.f32.mxu0 %vm4684_vm9, %v9858_v6 }
 0xc5f   :  { %6143 = vmatmul.mubr.msk.f32.gmra.mrb[6].mxu0 %vm4685_vm10, %v9858_v6  ;;  %v4606_v19 = vshll.u32 %v4605_v45, 16 }
 0xc68   :  { %v4589_v4 = vpop.xlane.xlu0 %4588 }
 0xc69   :  { %v4590_v55 = vcvt.f32.s32 %v4589_v4 }
 0xc6b   :  { %v4575_v33 = vpop.xlane.xlu1 %4574  ;;  %v4593_v46 = vadd.s32 %v4592_v36, %v4590_v55 }
 0xc6c   :  { %v4576_v58 = vcvt.f32.s32 %v4575_v33 }
 0xc6d   :  { %vm4687_vm13 = vcmp.eq.s32.totalorder %v9437_v11, %v4593_v46  ;;  %v4647_v11 = vcvt.f32.s32 %v9575_v32 }
 0xc6e   :  { %v4579_v49 = vadd.s32 %v4578_v40, %v4576_v58  ;;  %v6657_v40 = vld [vmem:[%s9769_s0 + $0x20] sm:$0xff] }
 0xc6f   :  { %v4648_v56 = vshll.u32 %v4647_v11, 16  ;;  %v4891_v58 = vmul.f32 10.0, %v6657_v40  ;;  %v9863_v11 = vld [vmem:[#allocation3_spill] sm:$0xff]  ;;  %v6666_v40 = vld [vmem:[%s9769_s0 + $0x78] sm:$0xff] }
 0xc70   :  { %vm4686_vm11 = vcmp.eq.s32.totalorder %v9442_v26, %v4579_v49  ;;  %v4633_v26 = vcvt.f32.s32 %v9579_v3 }
 0xc71   :  { %6145 = vmatprep.mubr.msk.f32.mxu0 %vm4686_vm11, %v9858_v6 }
 0xc72   :  { %6146 = vmatmul.mubr.msk.f32.gmra.mrb[8].mxu0 %vm4687_vm13, %v9858_v6  ;;  %v4634_v7 = vshll.u32 %v4633_v26, 16 }
 0xc7b   :  { %v4617_v5 = vpop.xlane.xlu0 %4616 }
 0xc7c   :  { %v4618_v50 = vcvt.f32.s32 %v4617_v5 }
 0xc7e   :  { %v4603_v42 = vpop.xlane.xlu1 %4602  ;;  %v4621_v54 = vadd.s32 %v4620_v53, %v4618_v50 }
 0xc7f   :  { %v4604_v59 = vcvt.f32.s32 %v4603_v42 }
 0xc80   :  { %vm4689_vm14 = vcmp.eq.s32.totalorder %v9457_v31, %v4621_v54  ;;  %v4675_v31 = vcvt.f32.s32 %v9585_v13 }
 0xc81   :  { %v4607_v28 = vadd.s32 %v4606_v19, %v4604_v59  ;;  %v6659_v19 = vld [vmem:[%s9769_s0 + $0x30] sm:$0xff] }
 0xc82   :  { %v4676_v63 = vshll.u32 %v4675_v31, 16  ;;  %v4893_v59 = vmul.f32 10.0, %v6659_v19  ;;  %v9864_v31 = vld [vmem:[#allocation15_spill] sm:$0xff] }
 0xc83   :  { %vm4688_vm12 = vcmp.eq.s32.totalorder %v9462_v16, %v4607_v28  ;;  %v4661_v16 = vcvt.f32.s32 %v9589_v41  ;;  %v6653_v41 = vld [vmem:[%s9769_s0] sm:$0xff] }
 0xc84   :  { %6148 = vmatprep.mubr.msk.f32.mxu0 %vm4688_vm12, %v9858_v6  ;;  %v4887_v22 = vmul.f32 10.0, %v6653_v41 }
 0xc85   :  { %6149 = vmatmul.mubr.msk.f32.gmra.mrb[10].mxu0 %vm4689_vm14, %v9858_v6  ;;  %v4662_v0 = vshll.u32 %v4661_v16, 16 }
 0xc8e   :  { %v4645_v20 = vpop.xlane.xlu0 %4644 }
 0xc8f   :  { %v4646_v24 = vcvt.f32.s32 %v4645_v20 }
 0xc91   :  { %v4631_v35 = vpop.xlane.xlu1 %4630  ;;  %v4649_v34 = vadd.s32 %v4648_v56, %v4646_v24 }
 0xc92   :  { %v4632_v61 = vcvt.f32.s32 %v4631_v35 }
 0xc93   :  { %vm4691_vm0 = vcmp.eq.s32.totalorder %v9477_v57, %v4649_v34  ;;  %v6652_v57 = vld [vmem:[%s9769_s0 + $0x8] sm:$0xff]  ;;  %v6661_v34 = vld [vmem:[%s9769_s0 + $0x40] sm:$0xff] }
 0xc94   :  { %v4635_v27 = vadd.s32 %v4634_v7, %v4632_v61 }
 0xc96   :  { %vm4690_vm15 = vcmp.eq.s32.totalorder %v9482_v39, %v4635_v27  ;;  %v4888_v39 = vmul.f32 10.0, %v6652_v57  ;;  %v4895_v27 = vmul.f32 10.0, %v6661_v34 }
 0xc97   :  { %6151 = vmatprep.mubr.msk.f32.mxu0 %vm4690_vm15, %v9858_v6 }
 0xc98   :  { %6152 = vmatmul.mubr.msk.f32.gmra.mrb[12].mxu0 %vm4691_vm0, %v9858_v6 }
 0xca1   :  { %v4673_v32 = vpop.xlane.xlu0 %4672 }
 0xca2   :  { %v4674_v3 = vcvt.f32.s32 %v4673_v32 }
 0xca4   :  { %v4659_v25 = vpop.xlane.xlu1 %4658  ;;  %v4677_v14 = vadd.s32 %v4676_v63, %v4674_v3  ;;  %v9865_v3 = vld [vmem:[#allocation2_spill] sm:$0xff] }
 0xca5   :  { %v4660_v37 = vcvt.f32.s32 %v4659_v25 }
 0xca6   :  { %vm4693_vm2 = vcmp.eq.s32.totalorder %v9497_v29, %v4677_v14 }
 0xca7   :  { %v4663_v12 = vadd.s32 %v4662_v0, %v4660_v37 }
 0xca9   :  { %vm4692_vm1 = vcmp.eq.s32.totalorder %v9502_v51, %v4663_v12  ;;  %v6662_v12 = vld [vmem:[%s9769_s0 + $0x58] sm:$0xff] }
 0xcaa   :  { %6154 = vmatprep.mubr.msk.f32.mxu0 %vm4692_vm1, %v9858_v6  ;;  %v4898_v57 = vmul.f32 10.0, %v6662_v12 }
 0xcab   :  { %6155 = vmatmul.mubr.msk.f32.gmra.mrb[14].mxu0 %vm4693_vm2, %v9858_v6  ;;  %v6654_v6 = vld [vmem:[%s9769_s0 + $0x18] sm:$0xff] }
 0xcac   :  { %v4890_v29 = vmul.f32 10.0, %v6654_v6 }
 0xd14   :  { %v6135_v13 = vpop.f32.mrb[0].mxu0 }
 0xd15   :  { %v6477_v9 = vadd.f32 %v6135_v13, %v8512_v10  ;;  %v4792_v51 = vpop.f32.mrb[1].mxu0  ;;  %v6663_v13 = vld [vmem:[%s9769_s0 + $0x50] sm:$0xff] }
 0xd16   :  { %v6478_v60 = vadd.f32 %v4792_v51, %v8516_v15  ;;  %v4897_v41 = vmul.f32 10.0, %v6663_v13 }
 0xd17   :  { %v4904_v44 = vsub.f32 %v6477_v9, %v4888_v39 }
 0xd18   :  { %v4903_v2 = vsub.f32 %v6478_v60, %v4887_v22  ;;  %v6138_v23 = vpop.f32.mrb[2].mxu0  ;;  %v9866_v22 = vld [vmem:[#allocation14_spill] sm:$0xff]  ;;  %v9867_v60 = vld [vmem:[#allocation5_spill] sm:$0xff] }
 0xd19   :  { %v4921_v38 = vmul.f32 0.11111111, %v4904_v44  ;;  %v6479_v10 = vadd.f32 %v6138_v23, %v8522_v52  ;;  %v4802_v62 = vpop.f32.mrb[3].mxu0  ;;  %v6656_v52 = vld [vmem:[%s9769_s0 + $0x28] sm:$0xff] }
 0xd1a   :  { %v4920_v48 = vmul.f32 0.11111111, %v4903_v2  ;;  %v6480_v15 = vadd.f32 %v4802_v62, %v8524_v30  ;;  %v4892_v33 = vmul.f32 10.0, %v6656_v52 }
 0xd1b   :  { %4938 = vst.msk [vmem:[%s9772_s3 + $0x8] sm:$0xff] %vm4936_vm3, %v4921_v38  ;;  %v4906_v43 = vsub.f32 %v6479_v10, %v4890_v29  ;;  %v6665_v10 = vld [vmem:[%s9769_s0 + $0x60] sm:$0xff] }
 0xd1c   :  { %4937 = vst.msk [vmem:[%s9772_s3] sm:$0xff] %vm4936_vm3, %v4920_v48  ;;  %v4905_v4 = vsub.f32 %v6480_v15, %v4889_v47  ;;  %v4900_v47 = vmul.f32 10.0, %v6664_v21  ;;  %v4899_v62 = vmul.f32 10.0, %v6665_v10  ;;  %v9868_v48 = vld [vmem:[#allocation17_spill] sm:$0xff] }
 0xd1d   :  { %v4923_v55 = vmul.f32 0.11111111, %v4906_v43 }
 0xd1e   :  { %v4922_v36 = vmul.f32 0.11111111, %v4905_v4  ;;  %v9869_v4 = vld [vmem:[#allocation4_spill] sm:$0xff] }
 0xd1f   :  { %4940 = vst.msk [vmem:[%s9772_s3 + $0x18] sm:$0xff] %vm4936_vm3, %v4923_v55  ;;  %v6141_v30 = vpop.f32.mrb[4].mxu0 }
 0xd20   :  { %4939 = vst.msk [vmem:[%s9772_s3 + $0x10] sm:$0xff] %vm4936_vm3, %v4922_v36  ;;  %v6481_v46 = vadd.f32 %v6141_v30, %v8526_v1  ;;  %v4812_v49 = vpop.f32.mrb[5].mxu0  ;;  %v6658_v1 = vld [vmem:[%s9769_s0 + $0x38] sm:$0xff] }
 0xd21   :  { %v6482_v18 = vadd.f32 %v4812_v49, %v8528_v8  ;;  %v4894_v42 = vmul.f32 10.0, %v6658_v1  ;;  %v6667_v49 = vld [vmem:[%s9769_s0 + $0x70] sm:$0xff] }
 0xd22   :  { %v4908_v45 = vsub.f32 %v6481_v46, %v4892_v33 }
 0xd23   :  { %v4907_v5 = vsub.f32 %v6482_v18, %v4891_v58  ;;  %v4902_v58 = vmul.f32 10.0, %v6666_v40  ;;  %v4901_v18 = vmul.f32 10.0, %v6667_v49 }
 0xd24   :  { %v4925_v50 = vmul.f32 0.11111111, %v4908_v45  ;;  %v9870_v45 = vld [vmem:[#allocation16_spill] sm:$0xff] }
 0xd25   :  { %v4924_v53 = vmul.f32 0.11111111, %v4907_v5 }
 0xd26   :  { %4942 = vst.msk [vmem:[%s9772_s3 + $0x28] sm:$0xff] %vm4936_vm3, %v4925_v50 }
 0xd27   :  { %4941 = vst.msk [vmem:[%s9772_s3 + $0x20] sm:$0xff] %vm4936_vm3, %v4924_v53  ;;  %v9871_v53 = vld [vmem:[#allocation7_spill] sm:$0xff] }
 0xd32   :  { %v6144_v8 = vpop.f32.mrb[6].mxu0 }
 0xd33   :  { %v6483_v54 = vadd.f32 %v6144_v8, %v8540_v17  ;;  %v4822_v28 = vpop.f32.mrb[7].mxu0  ;;  %v6660_v17 = vld [vmem:[%s9769_s0 + $0x48] sm:$0xff] }
 0xd34   :  { %v6484_v26 = vadd.f32 %v4822_v28, %v9863_v11  ;;  %v4896_v7 = vmul.f32 10.0, %v6660_v17 }
 0xd35   :  { %v4910_v20 = vsub.f32 %v6483_v54, %v4894_v42 }
 0xd36   :  { %v4909_v24 = vsub.f32 %v6484_v26, %v4893_v59 }
 0xd37   :  { %v4927_v56 = vmul.f32 0.11111111, %v4910_v20 }
 0xd38   :  { %v4926_v35 = vmul.f32 0.11111111, %v4909_v24 }
 0xd39   :  { %4944 = vst.msk [vmem:[%s9772_s3 + $0x38] sm:$0xff] %vm4936_vm3, %v4927_v56 }
 0xd3a   :  { %4943 = vst.msk [vmem:[%s9772_s3 + $0x30] sm:$0xff] %vm4936_vm3, %v4926_v35 }
 0xd45   :  { %v6147_v61 = vpop.f32.mrb[8].mxu0 }
 0xd46   :  { %v6485_v16 = vadd.f32 %v6147_v61, %v9864_v31  ;;  %v4832_v32 = vpop.f32.mrb[9].mxu0 }
 0xd47   :  { %v6486_v63 = vadd.f32 %v4832_v32, %v9865_v3 }
 0xd48   :  { %v4912_v25 = vsub.f32 %v6485_v16, %v4896_v7 }
 0xd49   :  { %v4911_v0 = vsub.f32 %v6486_v63, %v4895_v27 }
 0xd4a   :  { %v4929_v37 = vmul.f32 0.11111111, %v4912_v25 }
 0xd4b   :  { %v4928_v14 = vmul.f32 0.11111111, %v4911_v0 }
 0xd4c   :  { %4946 = vst.msk [vmem:[%s9772_s3 + $0x48] sm:$0xff] %vm4936_vm3, %v4929_v37 }
 0xd4d   :  { %4945 = vst.msk [vmem:[%s9772_s3 + $0x40] sm:$0xff] %vm4936_vm3, %v4928_v14 }
 0xd58   :  { %v6150_v39 = vpop.f32.mrb[10].mxu0 }
 0xd59   :  { %v6487_v9 = vadd.f32 %v6150_v39, %v9866_v22  ;;  %v4842_v51 = vpop.f32.mrb[11].mxu0 }
 0xd5a   :  { %v6488_v44 = vadd.f32 %v4842_v51, %v9867_v60 }
 0xd5b   :  { %v4914_v6 = vsub.f32 %v6487_v9, %v4898_v57 }
 0xd5c   :  { %v4913_v29 = vsub.f32 %v6488_v44, %v4897_v41 }
 0xd5d   :  { %v4931_v2 = vmul.f32 0.11111111, %v4914_v6 }
 0xd5e   :  { %v4930_v23 = vmul.f32 0.11111111, %v4913_v29 }
 0xd5f   :  { %4948 = vst.msk [vmem:[%s9772_s3 + $0x58] sm:$0xff] %vm4936_vm3, %v4931_v2 }
 0xd60   :  { %4947 = vst.msk [vmem:[%s9772_s3 + $0x50] sm:$0xff] %vm4936_vm3, %v4930_v23 }
 0xd6b   :  { %v6153_v38 = vpop.f32.mrb[12].mxu0 }
 0xd6c   :  { %v6489_v15 = vadd.f32 %v6153_v38, %v9868_v48  ;;  %v4852_v43 = vpop.f32.mrb[13].mxu0 }
 0xd6d   :  { %v6490_v55 = vadd.f32 %v4852_v43, %v9869_v4 }
 0xd6e   :  { %v4916_v36 = vsub.f32 %v6489_v15, %v4900_v47 }
 0xd6f   :  { %v4915_v52 = vsub.f32 %v6490_v55, %v4899_v62 }
 0xd70   :  { %v4933_v33 = vmul.f32 0.11111111, %v4916_v36 }
 0xd71   :  { %v4932_v30 = vmul.f32 0.11111111, %v4915_v52 }
 0xd72   :  { %4950 = vst.msk [vmem:[%s9772_s3 + $0x68] sm:$0xff] %vm4936_vm3, %v4933_v33 }
 0xd73   :  { %4949 = vst.msk [vmem:[%s9772_s3 + $0x60] sm:$0xff] %vm4936_vm3, %v4932_v30 }
 0xd7e   :  { %v6156_v46 = vpop.f32.mrb[14].mxu0 }
 0xd7f   :  { %v6491_v5 = vadd.f32 %v6156_v46, %v9870_v45  ;;  %v4862_v50 = vpop.f32.mrb[15].mxu0 }
 0xd80   :  { %v6492_v1 = vadd.f32 %v4862_v50, %v9871_v53 }
 0xd81   :  { %v4918_v42 = vsub.f32 %v6491_v5, %v4902_v58 }
 0xd82   :  { %v4917_v8 = vsub.f32 %v6492_v1, %v4901_v18 }
 0xd83   :  { %v4935_v19 = vmul.f32 0.11111111, %v4918_v42 }
 0xd84   :  { %v4934_v59 = vmul.f32 0.11111111, %v4917_v8 }
 0xd85   :  { %4952 = vst.msk [vmem:[%s9772_s3 + $0x78] sm:$0xff] %vm4936_vm3, %v4935_v19 }
 0xd86   :  { %4951 = vst.msk [vmem:[%s9772_s3 + $0x70] sm:$0xff] %vm4936_vm3, %v4934_v59 }

</bundles_post_ra>
